<compile_context>
chip_gen: v5e
topology: v5e:2x2
jax: 0.10.0
libtpu: 0.0.40
codegen_flags: <defaults>
</compile_context>

<pallas_src>
import functools

import jax
import jax.numpy as jnp
from jax.experimental import pallas as pl
from jax.experimental.pallas import tpu as pltpu


# ---------------------------- fused Pallas kernel ----------------------------

def _transformer_crf_kernel(
        # -------- inputs (per-grid-step blocks) --------
        x_ref,                                   # (B*S, E) f32 embeddings
        qkv_w_ref, qkv_b_ref,                    # (1, E, 3E) bf16 / (1, 1, 3E) f32
        out_w_ref, out_b_ref,                    # (1, E, E) bf16 / (1, 1, E) f32
        ln1_g_ref, ln1_b_ref,                    # (1, 1, E) f32
        ff1_w_ref, ff1_b_ref,                    # (1, E, TILE_FF) bf16 / (1, 1, TILE_FF) f32
        ff2_w_ref, ff2_b_ref,                    # (1, TILE_FF, E) bf16 / (1, 1, E) f32
        ln2_g_ref, ln2_b_ref,                    # (1, 1, E) f32
        h2t_w_ref, h2t_b_ref,                    # (E, T) bf16 / (1, T) f32
        g_ref, gt_ref,                           # (E, H) bf16 (scale folded in) / (H, E) bf16
        trans_ref,                               # (T, T) f32
        tags_next_ref, tags_prev_ref,            # (B, S) int32
        last_tag_ref, seqlen_ref,                # (B, 1) int32
        # -------- output --------
        loss_ref,                                # (1, 1) f32
        # -------- scratch (persists across grid steps) --------
        x_scr,                                   # (B*S, E) f32  layer input/output slab
        ln1_scr,                                 # (B*S, E) f32  post-LN1 (FFN residual)
        ln1b_scr,                                # (B*S, E) bf16 FF1 operand (cast once/layer)
        ffacc_scr,                               # (B*S, E) f32  FF2 accumulator
        *, num_heads, start_idx, stop_idx):
    f32, bf16 = jnp.float32, jnp.bfloat16
    B, S = tags_next_ref.shape
    BS, E = x_scr.shape
    T = trans_ref.shape[0]
    H = num_heads
    L, N = B, S                                  # batch_first=False quirk: attend over batch axis

    li = pl.program_id(0)                        # layer index
    kt = pl.program_id(1)                        # FF column-tile index
    n_layers = pl.num_programs(0)
    n_kt = pl.num_programs(1)

    def layer_norm(y, g, b):
        mu = jnp.mean(y, axis=-1, keepdims=True)
        var = jnp.mean((y - mu) ** 2, axis=-1, keepdims=True)
        return (y - mu) * jax.lax.rsqrt(var + 1e-5) * g + b

    # ---- load the embeddings into the persistent activation slab (first step only) ----
    @pl.when((li == 0) & (kt == 0))
    def _init():
        x_scr[...] = x_ref[...]

    # ---- QKV + attention + out-proj + LN1 (once per layer, at the first FF tile) ----
    @pl.when(kt == 0)
    def _attn():
        x = x_scr[...]
        xb = x.astype(bf16)
        qkv = jnp.dot(xb, qkv_w_ref[0], preferred_element_type=f32) + qkv_b_ref[0]
        q, k, v = qkv[:, :E], qkv[:, E:2 * E], qkv[:, 2 * E:]
        # self-attention over the L (= original batch) axis, independently per (n, head)
        q4 = q.reshape(L, 1, N, E)
        k4 = k.reshape(1, L, N, E)
        v4 = v.reshape(1, L, N, E)
        p = (q4 * k4).reshape(L * L * N, E)                         # per-pair q*k lane products
        s = jnp.dot(p.astype(bf16), g_ref[...],
                    preferred_element_type=f32)                     # (L*L*N, H); 1/sqrt(Dh) in G
        s4 = s.reshape(L, L, N, H)
        s_max = jnp.max(s4, axis=1, keepdims=True)
        p_exp = jnp.exp(s4 - s_max)
        denom = jnp.sum(p_exp, axis=1, keepdims=True)
        w4 = p_exp * pl.reciprocal(denom, approx=False)             # softmax over m (EUP)
        wl = jnp.dot(w4.reshape(L * L * N, H).astype(bf16), gt_ref[...],
                     preferred_element_type=f32)                    # per-head weight -> head lanes
        o = jnp.sum(wl.reshape(L, L, N, E) * v4, axis=1).reshape(BS, E)
        a = jnp.dot(o.astype(bf16), out_w_ref[0], preferred_element_type=f32) + out_b_ref[0]
        xl = layer_norm(x + a, ln1_g_ref[0], ln1_b_ref[0])
        ln1_scr[...] = xl
        ln1b_scr[...] = xl.astype(bf16)                             # cast once, reused by all FF tiles
        ffacc_scr[...] = jnp.broadcast_to(ff2_b_ref[0], (BS, E))    # seed accumulator with ff2 bias

    # ---- FFN column tile: relu(x @ ff1[:, tile]) @ ff2[tile, :], accumulated (every step) ----
    h = jnp.dot(ln1b_scr[...], ff1_w_ref[0], preferred_element_type=f32) + ff1_b_ref[0]
    h = jnp.maximum(h, 0.0)
    ffacc_scr[...] += jnp.dot(h.astype(bf16), ff2_w_ref[0], preferred_element_type=f32)

    # ---- residual + LN2 (once per layer, at the last FF tile) ----
    @pl.when(kt == n_kt - 1)
    def _ln2():
        x_scr[...] = layer_norm(ln1_scr[...] + ffacc_scr[...], ln2_g_ref[0], ln2_b_ref[0])

    # ---- hidden2tag + CRF neg-log-likelihood (last layer, last FF tile only) ----
    @pl.when((li == n_layers - 1) & (kt == n_kt - 1))
    def _crf():
        feats2d = (jnp.dot(x_scr[...].astype(bf16), h2t_w_ref[...],
                           preferred_element_type=f32) + h2t_b_ref[...])    # (B*S, T)
        feats3 = feats2d.reshape(B, S, T)
        trans = trans_ref[...]                                              # (T, T) f32
        trans_b = trans[None, :, :]                 # hoisted out of the unrolled recurrence
        seqlen = seqlen_ref[...]                                            # (B, 1)

        # forward algorithm (log partition), statically unrolled over S
        col = jax.lax.broadcasted_iota(jnp.int32, (B, T), 1)
        fv = jnp.where(col == start_idx, 0.0, -10000.0).astype(f32)         # (B, T)
        sel = fv
        for i in range(S):
            emit = feats3[:, i, :]                                          # (B, T)
            # tag_var[b, next, prev] = fv[b, prev] + trans[next, prev] + emit[b, next]
            tag_var = fv[:, None, :] + trans_b + emit[:, :, None]
            mx = jnp.max(tag_var, axis=-1)
            fv = mx + jnp.log(jnp.sum(jnp.exp(tag_var - mx[:, :, None]), axis=-1))
            sel = jnp.where(seqlen == (i + 1), fv, sel)                     # forward_var[:, seq_len, :]
        terminal = sel + trans[stop_idx:stop_idx + 1, :]                    # (B, T)
        mterm = jnp.max(terminal, axis=-1, keepdims=True)
        alpha = mterm + jnp.log(jnp.sum(jnp.exp(terminal - mterm),
                                        axis=-1, keepdims=True))            # (B, 1)

        # gold-path score (one-hot formulation; kept f32 to match CRF numerics exactly)
        ti = jax.lax.broadcasted_iota(jnp.int32, (B, S, T), 2)
        pos = jax.lax.broadcasted_iota(jnp.int32, (B, S), 1)
        maskf = (pos < seqlen).astype(f32)                                  # (B, S)
        ohn = (tags_next_ref[...][:, :, None] == ti).astype(f32) * maskf[:, :, None]
        ohp = (tags_prev_ref[...][:, :, None] == ti).astype(f32)
        ohn_f = ohn.reshape(BS, T)
        ohp_f = ohp.reshape(BS, T)
        emit_rows = jnp.sum(ohn_f * feats2d, axis=-1, keepdims=True)        # (B*S, 1)
        trans_rows = jnp.sum(jnp.dot(ohn_f, trans, preferred_element_type=f32) * ohp_f,
                             axis=-1, keepdims=True)                        # (B*S, 1)
        gold = (emit_rows + trans_rows).reshape(B, S, 1).sum(axis=1)        # (B, 1)
        tl = jax.lax.broadcasted_iota(jnp.int32, (B, T), 1)
        oh_last = (last_tag_ref[...] == tl).astype(f32)                     # (B, T)
        gold = gold + jnp.sum(oh_last * trans[stop_idx:stop_idx + 1, :],
                              axis=-1, keepdims=True)

        # neg_log_likelihood = mean(forward_score - gold_score)
        loss_ref[...] = jnp.sum(alpha - gold, axis=0, keepdims=True) * (1.0 / B)


# ---------------------------- wrapper / glue ----------------------------

def transformer_crf_loss(params, sentence, seq_len, tags, *, num_heads,
                         start_idx, stop_idx, tile_ff=512):
    emb = jnp.take(params["embedding"], sentence, axis=0)           # (B, S, E) gather (JAX glue)
    B, S, E = emb.shape
    BS = B * S
    x2d = emb.reshape(BS, E)                                        # (L*N, E), batch-major rows

    num_layers = params["qkv_w"].shape[0]
    FF = params["ff1_w"].shape[-1]
    T = params["transitions"].shape[0]
    H = num_heads
    dh = E // H
    tile_ff = min(tile_ff, FF)
    assert FF % tile_ff == 0 and tile_ff % 128 == 0

    # Head-grouping constants: G sums each head's dh lanes (scale folded in), GT broadcasts
    # a per-head scalar back over its dh lanes.  Entries are exact in bf16 (0 / 0.5 / 1).
    grp = (jnp.arange(E)[:, None] // dh == jnp.arange(H)[None, :]).astype(jnp.float32)
    g_mat = (grp * (1.0 / float(dh) ** 0.5)).astype(jnp.bfloat16)   # (E, H)
    gt_mat = grp.T.astype(jnp.bfloat16)                             # (H, E)

    tags_i = tags.astype(jnp.int32)
    seq_len_i = seq_len.astype(jnp.int32)
    start_col = jnp.full((B, 1), start_idx, jnp.int32)
    tags_prev = jnp.concatenate([start_col, tags_i[:, :-1]], axis=1)       # tags_ext[:, :-1]
    last_pos = jnp.clip(seq_len_i - 1, 0, S - 1)
    last_tag = jnp.take_along_axis(tags_i, last_pos[:, None], axis=1)      # (B, 1)
    last_tag = jnp.where(seq_len_i[:, None] == 0, start_idx, last_tag)
    seqlen2d = seq_len_i.reshape(B, 1)

    operands = (
        x2d,
        params["qkv_w"], params["qkv_b"],
        params["out_w"], params["out_b"],
        params["ln1_g"], params["ln1_b"],
        params["ff1_w"], params["ff1_b"],
        params["ff2_w"], params["ff2_b"],
        params["ln2_g"], params["ln2_b"],
        params["h2t_w"], params["h2t_b"],
        g_mat, gt_mat,
        params["transitions"],
        tags_i, tags_prev, last_tag, seqlen2d,
    )

    layer_map3 = lambda l, t: (l, 0, 0)
    fixed_map2 = lambda l, t: (0, 0)
    in_specs = [
        pl.BlockSpec((BS, E), fixed_map2),                       # x2d (fetched once)
        pl.BlockSpec((1, E, 3 * E), layer_map3),                 # qkv_w
        pl.BlockSpec((1, 1, 3 * E), layer_map3),                 # qkv_b
        pl.BlockSpec((1, E, E), layer_map3),                     # out_w
        pl.BlockSpec((1, 1, E), layer_map3),                     # out_b
        pl.BlockSpec((1, 1, E), layer_map3),                     # ln1_g
        pl.BlockSpec((1, 1, E), layer_map3),                     # ln1_b
        pl.BlockSpec((1, E, tile_ff), lambda l, t: (l, 0, t)),   # ff1_w column tile
        pl.BlockSpec((1, 1, tile_ff), lambda l, t: (l, 0, t)),   # ff1_b column tile
        pl.BlockSpec((1, tile_ff, E), lambda l, t: (l, t, 0)),   # ff2_w row tile
        pl.BlockSpec((1, 1, E), layer_map3),                     # ff2_b
        pl.BlockSpec((1, 1, E), layer_map3),                     # ln2_g
        pl.BlockSpec((1, 1, E), layer_map3),                     # ln2_b
        pl.BlockSpec((E, T), fixed_map2),                        # h2t_w
        pl.BlockSpec((1, T), fixed_map2),                        # h2t_b
        pl.BlockSpec((E, H), fixed_map2),                        # G
        pl.BlockSpec((H, E), fixed_map2),                        # GT
        pl.BlockSpec((T, T), fixed_map2),                        # transitions
        pl.BlockSpec((B, S), fixed_map2),                        # tags_next
        pl.BlockSpec((B, S), fixed_map2),                        # tags_prev
        pl.BlockSpec((B, 1), fixed_map2),                        # last_tag
        pl.BlockSpec((B, 1), fixed_map2),                        # seq_len
    ]

    # Advisory cost estimate so XLA schedules the gather / tag-shift glue around the kernel.
    flops_layer = (2 * BS * E * 3 * E + 2 * (B * B * S) * E * H + 2 * (B * B * S) * H * E
                   + 2 * BS * E * E + 4 * BS * E * FF)
    flops = num_layers * flops_layer + 2 * BS * E * T + 2 * BS * T * T
    transcendentals = num_layers * B * B * S * H + 2 * (S * B * T * T + B * T)
    bytes_accessed = sum(int(op.size) * op.dtype.itemsize for op in operands) + 4

    kernel = functools.partial(_transformer_crf_kernel, num_heads=num_heads,
                               start_idx=start_idx, stop_idx=stop_idx)
    loss = pl.pallas_call(
        kernel,
        out_shape=jax.ShapeDtypeStruct((1, 1), jnp.float32),
        grid_spec=pltpu.PrefetchScalarGridSpec(
            num_scalar_prefetch=0,
            grid=(num_layers, FF // tile_ff),
            in_specs=in_specs,
            out_specs=pl.BlockSpec((1, 1), fixed_map2),
            scratch_shapes=[
                pltpu.VMEM((BS, E), jnp.float32),    # activation slab (layer in/out)
                pltpu.VMEM((BS, E), jnp.float32),    # post-LN1 residual
                pltpu.VMEM((BS, E), jnp.bfloat16),   # bf16 FF1 operand
                pltpu.VMEM((BS, E), jnp.float32),    # FF2 accumulator
            ]),
        compiler_params=pltpu.CompilerParams(
            # Both axes carry sequential dependencies (layer chain / FFN accumulation).
            dimension_semantics=("arbitrary", "arbitrary")),
        cost_estimate=pl.CostEstimate(flops=int(flops),
                                      transcendentals=int(transcendentals),
                                      bytes_accessed=int(bytes_accessed)),
    )(*operands)
    return loss[0, 0]


def init_params(key, vocab_size, E, FF, T, num_layers, start_idx, stop_idx):
    keys = jax.random.split(key, 3 + num_layers)
    s = 0.05
    params = {"embedding": jax.random.normal(keys[0], (vocab_size, E), jnp.float32)}

    layer_ws = []
    for li in range(num_layers):
        k = jax.random.split(keys[1 + li], 8)
        layer_ws.append(dict(
            in_w=jax.random.normal(k[0], (3 * E, E), jnp.float32) * s,
            in_b=jax.random.normal(k[1], (3 * E,), jnp.float32) * s,
            out_w=jax.random.normal(k[2], (E, E), jnp.float32) * s,
            out_b=jax.random.normal(k[3], (E,), jnp.float32) * s,
            ff1_w=jax.random.normal(k[4], (FF, E), jnp.float32) * s,
            ff1_b=jax.random.normal(k[5], (FF,), jnp.float32) * s,
            ff2_w=jax.random.normal(k[6], (E, FF), jnp.float32) * s,
            ff2_b=jax.random.normal(k[7], (E,), jnp.float32) * s,
        ))

    def stack(name):
        return jnp.stack([lw[name] for lw in layer_ws], axis=0)

    def pt(w):  # (NL, out_f, in_f) torch layout -> pre-transposed (NL, in_f, out_f) bf16
        return jnp.transpose(w, (0, 2, 1)).astype(jnp.bfloat16)

    params.update(
        qkv_w=pt(stack("in_w")),                       # (NL, E, 3E) fused q|k|v columns
        qkv_b=stack("in_b")[:, None, :],               # (NL, 1, 3E)
        out_w=pt(stack("out_w")), out_b=stack("out_b")[:, None, :],
        ff1_w=pt(stack("ff1_w")), ff1_b=stack("ff1_b")[:, None, :],
        ff2_w=pt(stack("ff2_w")), ff2_b=stack("ff2_b")[:, None, :],
        ln1_g=jnp.ones((num_layers, 1, E), jnp.float32),
        ln1_b=jnp.zeros((num_layers, 1, E), jnp.float32),
        ln2_g=jnp.ones((num_layers, 1, E), jnp.float32),
        ln2_b=jnp.zeros((num_layers, 1, E), jnp.float32),
    )

    k2 = jax.random.split(keys[1 + num_layers], 2)
    h2t_w = jax.random.normal(k2[0], (T, E), jnp.float32) * s
    h2t_b = jax.random.normal(k2[1], (T,), jnp.float32) * s
    params["h2t_w"] = h2t_w.T.astype(jnp.bfloat16)     # (E, T) pre-transposed
    params["h2t_b"] = h2t_b.reshape(1, T)

    trans = jax.random.normal(keys[2 + num_layers], (T, T), jnp.float32)
    trans = trans.at[start_idx, :].set(-10000.0)       # transitions into <START> forbidden
    trans = trans.at[:, stop_idx].set(-10000.0)        # transitions out of <STOP> forbidden
    params["transitions"] = trans
    return params


if __name__ == "__main__":
    B, S = 2, 8
    E, FF = 32, 2048            # embedding_dim=32, TransformerEncoderLayer default dim_feedforward=2048
    NUM_HEADS, NUM_LAYERS = 8, 2
    hidden_dim = 64             # stored by the torch module but unused in its forward pass
    vocab_size = 50
    label_map = {"O": 0, "B-PER": 1, "I-PER": 2, "B-LOC": 3, "I-LOC": 4,
                 "B-ORG": 5, "<START>": 6, "<STOP>": 7}
    T = len(label_map)
    START, STOP = label_map["<START>"], label_map["<STOP>"]

    key = jax.random.PRNGKey(0)
    pkey, skey, tkey = jax.random.split(key, 3)
    params = init_params(pkey, vocab_size, E, FF, T, NUM_LAYERS, START, STOP)

    sentence = jax.random.randint(skey, (B, S), 0, vocab_size, dtype=jnp.int32)
    tags = jax.random.randint(tkey, (B, S), 0, 6, dtype=jnp.int32)   # real tags only
    seq_len = jnp.array([8, 5], dtype=jnp.int32)

    fwd = functools.partial(transformer_crf_loss, num_heads=NUM_HEADS,
                            start_idx=START, stop_idx=STOP)
    loss = jax.jit(fwd)(params, sentence, seq_len, tags)
    jax.block_until_ready(loss)
    print("KERNEL_OK")
</pallas_src>

<mosaic_0001>
module attributes {stable_mosaic.version = 11 : i64} {
  func.func @_transformer_crf_kernel(%arg0: i32, %arg1: i32, %arg2: memref<16x32xf32, #tpu.memory_space<vmem>>, %arg3: memref<1x32x96xbf16, #tpu.memory_space<vmem>>, %arg4: memref<1x1x96xf32, #tpu.memory_space<vmem>>, %arg5: memref<1x32x32xbf16, #tpu.memory_space<vmem>>, %arg6: memref<1x1x32xf32, #tpu.memory_space<vmem>>, %arg7: memref<1x1x32xf32, #tpu.memory_space<vmem>>, %arg8: memref<1x1x32xf32, #tpu.memory_space<vmem>>, %arg9: memref<1x32x512xbf16, #tpu.memory_space<vmem>>, %arg10: memref<1x1x512xf32, #tpu.memory_space<vmem>>, %arg11: memref<1x512x32xbf16, #tpu.memory_space<vmem>>, %arg12: memref<1x1x32xf32, #tpu.memory_space<vmem>>, %arg13: memref<1x1x32xf32, #tpu.memory_space<vmem>>, %arg14: memref<1x1x32xf32, #tpu.memory_space<vmem>>, %arg15: memref<32x8xbf16, #tpu.memory_space<vmem>>, %arg16: memref<1x8xf32, #tpu.memory_space<vmem>>, %arg17: memref<32x8xbf16, #tpu.memory_space<vmem>>, %arg18: memref<8x32xbf16, #tpu.memory_space<vmem>>, %arg19: memref<8x8xf32, #tpu.memory_space<vmem>>, %arg20: memref<2x8xi32, #tpu.memory_space<vmem>>, %arg21: memref<2x8xi32, #tpu.memory_space<vmem>>, %arg22: memref<2x1xi32, #tpu.memory_space<vmem>>, %arg23: memref<2x1xi32, #tpu.memory_space<vmem>>, %arg24: memref<1x1xf32, #tpu.memory_space<vmem>>, %arg25: memref<16x32xf32, #tpu.memory_space<vmem>>, %arg26: memref<16x32xf32, #tpu.memory_space<vmem>>, %arg27: memref<16x32xbf16, #tpu.memory_space<vmem>>, %arg28: memref<16x32xf32, #tpu.memory_space<vmem>>) attributes {dimension_semantics = [#tpu.dimension_semantics<arbitrary>, #tpu.dimension_semantics<arbitrary>], iteration_bounds = array<i64: 2, 4>, scalar_prefetch = 0 : i64, scratch_operands = 4 : i64, tpu.core_type = #tpu.core_type<tc>, window_params = [{pipeline_mode = #tpu.pipeline_mode<synchronous>, transform_indices = @transform_0, window_bounds = array<i64: 16, 32>}, {transform_indices = @transform_1, window_bounds = array<i64: 1, 32, 96>}, {transform_indices = @transform_2, window_bounds = array<i64: 1, 1, 96>}, {transform_indices = @transform_3, window_bounds = array<i64: 1, 32, 32>}, {transform_indices = @transform_4, window_bounds = array<i64: 1, 1, 32>}, {transform_indices = @transform_5, window_bounds = array<i64: 1, 1, 32>}, {transform_indices = @transform_6, window_bounds = array<i64: 1, 1, 32>}, {transform_indices = @transform_7, window_bounds = array<i64: 1, 32, 512>}, {transform_indices = @transform_8, window_bounds = array<i64: 1, 1, 512>}, {transform_indices = @transform_9, window_bounds = array<i64: 1, 512, 32>}, {transform_indices = @transform_10, window_bounds = array<i64: 1, 1, 32>}, {transform_indices = @transform_11, window_bounds = array<i64: 1, 1, 32>}, {transform_indices = @transform_12, window_bounds = array<i64: 1, 1, 32>}, {pipeline_mode = #tpu.pipeline_mode<synchronous>, transform_indices = @transform_13, window_bounds = array<i64: 32, 8>}, {pipeline_mode = #tpu.pipeline_mode<synchronous>, transform_indices = @transform_14, window_bounds = array<i64: 1, 8>}, {pipeline_mode = #tpu.pipeline_mode<synchronous>, transform_indices = @transform_15, window_bounds = array<i64: 32, 8>}, {pipeline_mode = #tpu.pipeline_mode<synchronous>, transform_indices = @transform_16, window_bounds = array<i64: 8, 32>}, {pipeline_mode = #tpu.pipeline_mode<synchronous>, transform_indices = @transform_17, window_bounds = array<i64: 8, 8>}, {pipeline_mode = #tpu.pipeline_mode<synchronous>, transform_indices = @transform_18, window_bounds = array<i64: 2, 8>}, {pipeline_mode = #tpu.pipeline_mode<synchronous>, transform_indices = @transform_19, window_bounds = array<i64: 2, 8>}, {pipeline_mode = #tpu.pipeline_mode<synchronous>, transform_indices = @transform_20, window_bounds = array<i64: 2, 1>}, {pipeline_mode = #tpu.pipeline_mode<synchronous>, transform_indices = @transform_21, window_bounds = array<i64: 2, 1>}, {pipeline_mode = #tpu.pipeline_mode<synchronous>, transform_indices = @transform_22, window_bounds = array<i64: 1, 1>}]} {
    %c0_i32 = arith.constant 0 : i32
    %0 = arith.cmpi eq, %arg0, %c0_i32 : i32
    %c0_i32_0 = arith.constant 0 : i32
    %1 = arith.cmpi eq, %arg1, %c0_i32_0 : i32
    %2 = arith.andi %0, %1 : i1
    %3 = arith.extui %2 : i1 to i32
    %c0_i32_1 = arith.constant 0 : i32
    %4 = arith.cmpi ne, %3, %c0_i32_1 : i32
    scf.if %4 {
      %c0_23 = arith.constant 0 : index
      %c0_24 = arith.constant 0 : index
      %33 = vector.load %arg2[%c0_23, %c0_24] : memref<16x32xf32, #tpu.memory_space<vmem>>, vector<16x32xf32>
      %c0_25 = arith.constant 0 : index
      %c0_26 = arith.constant 0 : index
      %34 = vector.load %arg25[%c0_25, %c0_26] : memref<16x32xf32, #tpu.memory_space<vmem>>, vector<16x32xf32>
      tpu.vector_store %arg25[%c0_25, %c0_26], %33 {strides = array<i32>} : memref<16x32xf32, #tpu.memory_space<vmem>>, vector<16x32xf32>,
    } else {
    }
    %c0_i32_2 = arith.constant 0 : i32
    %5 = arith.cmpi eq, %arg1, %c0_i32_2 : i32
    %6 = arith.extui %5 : i1 to i32
    %c0_i32_3 = arith.constant 0 : i32
    %7 = arith.cmpi ne, %6, %c0_i32_3 : i32
    scf.if %7 {
      %c0_23 = arith.constant 0 : index
      %c0_24 = arith.constant 0 : index
      %33 = vector.load %arg25[%c0_23, %c0_24] : memref<16x32xf32, #tpu.memory_space<vmem>>, vector<16x32xf32>
      %34 = arith.truncf %33 : vector<16x32xf32> to vector<16x32xbf16>
      %c0_25 = arith.constant 0 : index
      %c0_26 = arith.constant 0 : index
      %c0_27 = arith.constant 0 : index
      %35 = vector.load %arg3[%c0_25, %c0_26, %c0_27] : memref<1x32x96xbf16, #tpu.memory_space<vmem>>, vector<1x32x96xbf16>
      %36 = vector.shape_cast %35 : vector<1x32x96xbf16> to vector<32x96xbf16>
      %cst_28 = arith.constant dense<0.000000e+00> : vector<16x96xf32>
      %37 = tpu.matmul %34, %36, %cst_28 {dimension_numbers = #tpu.dot_dimension_numbers<[1], [0], [0], [1], [0, 0, 1, 1], [], []>} : vector<16x32xbf16>, vector<32x96xbf16>, vector<16x96xf32> -> vector<16x96xf32>
      %c0_29 = arith.constant 0 : index
      %c0_30 = arith.constant 0 : index
      %c0_31 = arith.constant 0 : index
      %38 = vector.load %arg4[%c0_29, %c0_30, %c0_31] : memref<1x1x96xf32, #tpu.memory_space<vmem>>, vector<1x1x96xf32>
      %39 = vector.shape_cast %38 : vector<1x1x96xf32> to vector<1x96xf32>
      %40 = vector.broadcast %39 : vector<1x96xf32> to vector<16x96xf32>
      %41 = arith.addf %37, %40 : vector<16x96xf32>
      %42 = vector.extract_strided_slice %41 {offsets = [0, 0], sizes = [16, 32], strides = [1, 1]} : vector<16x96xf32> to vector<16x32xf32>
      %43 = vector.extract_strided_slice %41 {offsets = [0, 32], sizes = [16, 32], strides = [1, 1]} : vector<16x96xf32> to vector<16x32xf32>
      %44 = vector.extract_strided_slice %41 {offsets = [0, 64], sizes = [16, 32], strides = [1, 1]} : vector<16x96xf32> to vector<16x32xf32>
      %45 = vector.shape_cast %42 : vector<16x32xf32> to vector<2x1x8x32xf32>
      %46 = vector.shape_cast %43 : vector<16x32xf32> to vector<1x2x8x32xf32>
      %47 = vector.shape_cast %44 : vector<16x32xf32> to vector<1x2x8x32xf32>
      %48 = vector.broadcast %45 : vector<2x1x8x32xf32> to vector<2x2x8x32xf32>
      %49 = vector.broadcast %46 : vector<1x2x8x32xf32> to vector<2x2x8x32xf32>
      %50 = arith.mulf %48, %49 : vector<2x2x8x32xf32>
      %51 = vector.shape_cast %50 : vector<2x2x8x32xf32> to vector<32x32xf32>
      %52 = arith.truncf %51 : vector<32x32xf32> to vector<32x32xbf16>
      %c0_32 = arith.constant 0 : index
      %c0_33 = arith.constant 0 : index
      %53 = vector.load %arg17[%c0_32, %c0_33] : memref<32x8xbf16, #tpu.memory_space<vmem>>, vector<32x8xbf16>
      %cst_34 = arith.constant dense<0.000000e+00> : vector<32x8xf32>
      %54 = tpu.matmul %52, %53, %cst_34 {dimension_numbers = #tpu.dot_dimension_numbers<[1], [0], [0], [1], [0, 0, 1, 1], [], []>} : vector<32x32xbf16>, vector<32x8xbf16>, vector<32x8xf32> -> vector<32x8xf32>
      %55 = vector.shape_cast %54 : vector<32x8xf32> to vector<2x2x8x8xf32>
      %cst_35 = arith.constant dense<0xFF800000> : vector<2x8x8xf32>
      %56 = vector.multi_reduction <maximumf>, %55, %cst_35 [1] : vector<2x2x8x8xf32> to vector<2x8x8xf32>
      %57 = vector.shape_cast %56 : vector<2x8x8xf32> to vector<2x1x8x8xf32>
      %58 = vector.broadcast %57 : vector<2x1x8x8xf32> to vector<2x2x8x8xf32>
      %59 = arith.subf %55, %58 : vector<2x2x8x8xf32>
      %60 = math.exp %59 : vector<2x2x8x8xf32>
      %cst_36 = arith.constant dense<0.000000e+00> : vector<2x8x8xf32>
      %61 = vector.multi_reduction <add>, %60, %cst_36 [1] : vector<2x2x8x8xf32> to vector<2x8x8xf32>
      %62 = vector.shape_cast %61 : vector<2x8x8xf32> to vector<2x1x8x8xf32>
      %63 = tpu.reciprocal %62 : vector<2x1x8x8xf32> -> vector<2x1x8x8xf32>
      %64 = vector.broadcast %63 : vector<2x1x8x8xf32> to vector<2x2x8x8xf32>
      %65 = arith.mulf %60, %64 : vector<2x2x8x8xf32>
      %66 = vector.shape_cast %65 : vector<2x2x8x8xf32> to vector<32x8xf32>
      %67 = arith.truncf %66 : vector<32x8xf32> to vector<32x8xbf16>
      %c0_37 = arith.constant 0 : index
      %c0_38 = arith.constant 0 : index
      %68 = vector.load %arg18[%c0_37, %c0_38] : memref<8x32xbf16, #tpu.memory_space<vmem>>, vector<8x32xbf16>
      %cst_39 = arith.constant dense<0.000000e+00> : vector<32x32xf32>
      %69 = tpu.matmul %67, %68, %cst_39 {dimension_numbers = #tpu.dot_dimension_numbers<[1], [0], [0], [1], [0, 0, 1, 1], [], []>} : vector<32x8xbf16>, vector<8x32xbf16>, vector<32x32xf32> -> vector<32x32xf32>
      %70 = vector.shape_cast %69 : vector<32x32xf32> to vector<2x2x8x32xf32>
      %71 = vector.broadcast %47 : vector<1x2x8x32xf32> to vector<2x2x8x32xf32>
      %72 = arith.mulf %70, %71 : vector<2x2x8x32xf32>
      %cst_40 = arith.constant dense<0.000000e+00> : vector<2x8x32xf32>
      %73 = vector.multi_reduction <add>, %72, %cst_40 [1] : vector<2x2x8x32xf32> to vector<2x8x32xf32>
      %74 = vector.shape_cast %73 : vector<2x8x32xf32> to vector<16x32xf32>
      %75 = arith.truncf %74 : vector<16x32xf32> to vector<16x32xbf16>
      %c0_41 = arith.constant 0 : index
      %c0_42 = arith.constant 0 : index
      %c0_43 = arith.constant 0 : index
      %76 = vector.load %arg5[%c0_41, %c0_42, %c0_43] : memref<1x32x32xbf16, #tpu.memory_space<vmem>>, vector<1x32x32xbf16>
      %77 = vector.shape_cast %76 : vector<1x32x32xbf16> to vector<32x32xbf16>
      %cst_44 = arith.constant dense<0.000000e+00> : vector<16x32xf32>
      %78 = tpu.matmul %75, %77, %cst_44 {dimension_numbers = #tpu.dot_dimension_numbers<[1], [0], [0], [1], [0, 0, 1, 1], [], []>} : vector<16x32xbf16>, vector<32x32xbf16>, vector<16x32xf32> -> vector<16x32xf32>
      %c0_45 = arith.constant 0 : index
      %c0_46 = arith.constant 0 : index
      %c0_47 = arith.constant 0 : index
      %79 = vector.load %arg6[%c0_45, %c0_46, %c0_47] : memref<1x1x32xf32, #tpu.memory_space<vmem>>, vector<1x1x32xf32>
      %80 = vector.shape_cast %79 : vector<1x1x32xf32> to vector<1x32xf32>
      %81 = vector.broadcast %80 : vector<1x32xf32> to vector<16x32xf32>
      %82 = arith.addf %78, %81 : vector<16x32xf32>
      %83 = arith.addf %33, %82 : vector<16x32xf32>
      %c0_48 = arith.constant 0 : index
      %c0_49 = arith.constant 0 : index
      %c0_50 = arith.constant 0 : index
      %84 = vector.load %arg7[%c0_48, %c0_49, %c0_50] : memref<1x1x32xf32, #tpu.memory_space<vmem>>, vector<1x1x32xf32>
      %85 = vector.shape_cast %84 : vector<1x1x32xf32> to vector<1x32xf32>
      %c0_51 = arith.constant 0 : index
      %c0_52 = arith.constant 0 : index
      %c0_53 = arith.constant 0 : index
      %86 = vector.load %arg8[%c0_51, %c0_52, %c0_53] : memref<1x1x32xf32, #tpu.memory_space<vmem>>, vector<1x1x32xf32>
      %87 = vector.shape_cast %86 : vector<1x1x32xf32> to vector<1x32xf32>
      %cst_54 = arith.constant dense<0.000000e+00> : vector<16xf32>
      %88 = vector.multi_reduction <add>, %83, %cst_54 [1] : vector<16x32xf32> to vector<16xf32>
      %89 = vector.shape_cast %88 : vector<16xf32> to vector<16x1xf32>
      %cst_55 = arith.constant 3.200000e+01 : f32
      %90 = vector.broadcast %cst_55 : f32 to vector<16x1xf32>
      %91 = arith.divf %89, %90 : vector<16x1xf32>
      %92 = vector.broadcast %91 : vector<16x1xf32> to vector<16x32xf32>
      %93 = arith.subf %83, %92 : vector<16x32xf32>
      %94 = arith.mulf %93, %93 : vector<16x32xf32>
      %cst_56 = arith.constant dense<0.000000e+00> : vector<16xf32>
      %95 = vector.multi_reduction <add>, %94, %cst_56 [1] : vector<16x32xf32> to vector<16xf32>
      %96 = vector.shape_cast %95 : vector<16xf32> to vector<16x1xf32>
      %cst_57 = arith.constant 3.200000e+01 : f32
      %97 = vector.broadcast %cst_57 : f32 to vector<16x1xf32>
      %98 = arith.divf %96, %97 : vector<16x1xf32>
      %99 = vector.broadcast %91 : vector<16x1xf32> to vector<16x32xf32>
      %100 = arith.subf %83, %99 : vector<16x32xf32>
      %cst_58 = arith.constant 9.99999974E-6 : f32
      %101 = vector.broadcast %cst_58 : f32 to vector<16x1xf32>
      %102 = arith.addf %98, %101 : vector<16x1xf32>
      %103 = math.rsqrt %102 : vector<16x1xf32>
      %104 = vector.broadcast %103 : vector<16x1xf32> to vector<16x32xf32>
      %105 = arith.mulf %100, %104 : vector<16x32xf32>
      %106 = vector.broadcast %85 : vector<1x32xf32> to vector<16x32xf32>
      %107 = arith.mulf %105, %106 : vector<16x32xf32>
      %108 = vector.broadcast %87 : vector<1x32xf32> to vector<16x32xf32>
      %109 = arith.addf %107, %108 : vector<16x32xf32>
      %c0_59 = arith.constant 0 : index
      %c0_60 = arith.constant 0 : index
      %110 = vector.load %arg26[%c0_59, %c0_60] : memref<16x32xf32, #tpu.memory_space<vmem>>, vector<16x32xf32>
      tpu.vector_store %arg26[%c0_59, %c0_60], %109 {strides = array<i32>} : memref<16x32xf32, #tpu.memory_space<vmem>>, vector<16x32xf32>,
      %111 = arith.truncf %109 : vector<16x32xf32> to vector<16x32xbf16>
      %c0_61 = arith.constant 0 : index
      %c0_62 = arith.constant 0 : index
      %112 = vector.load %arg27[%c0_61, %c0_62] : memref<16x32xbf16, #tpu.memory_space<vmem>>, vector<16x32xbf16>
      tpu.vector_store %arg27[%c0_61, %c0_62], %111 {strides = array<i32>} : memref<16x32xbf16, #tpu.memory_space<vmem>>, vector<16x32xbf16>,
      %c0_63 = arith.constant 0 : index
      %c0_64 = arith.constant 0 : index
      %c0_65 = arith.constant 0 : index
      %113 = vector.load %arg12[%c0_63, %c0_64, %c0_65] : memref<1x1x32xf32, #tpu.memory_space<vmem>>, vector<1x1x32xf32>
      %114 = vector.shape_cast %113 : vector<1x1x32xf32> to vector<1x32xf32>
      %115 = vector.shape_cast %114 : vector<1x32xf32> to vector<1x32xf32>
      %116 = vector.broadcast %115 : vector<1x32xf32> to vector<16x32xf32>
      %c0_66 = arith.constant 0 : index
      %c0_67 = arith.constant 0 : index
      %117 = vector.load %arg28[%c0_66, %c0_67] : memref<16x32xf32, #tpu.memory_space<vmem>>, vector<16x32xf32>
      tpu.vector_store %arg28[%c0_66, %c0_67], %116 {strides = array<i32>} : memref<16x32xf32, #tpu.memory_space<vmem>>, vector<16x32xf32>,
    } else {
    }
    %c0 = arith.constant 0 : index
    %c0_4 = arith.constant 0 : index
    %8 = vector.load %arg27[%c0, %c0_4] : memref<16x32xbf16, #tpu.memory_space<vmem>>, vector<16x32xbf16>
    %c0_5 = arith.constant 0 : index
    %c0_6 = arith.constant 0 : index
    %c0_7 = arith.constant 0 : index
    %9 = vector.load %arg9[%c0_5, %c0_6, %c0_7] : memref<1x32x512xbf16, #tpu.memory_space<vmem>>, vector<1x32x512xbf16>
    %10 = vector.shape_cast %9 : vector<1x32x512xbf16> to vector<32x512xbf16>
    %cst = arith.constant dense<0.000000e+00> : vector<16x512xf32>
    %11 = tpu.matmul %8, %10, %cst {dimension_numbers = #tpu.dot_dimension_numbers<[1], [0], [0], [1], [0, 0, 1, 1], [], []>} : vector<16x32xbf16>, vector<32x512xbf16>, vector<16x512xf32> -> vector<16x512xf32>
    %c0_8 = arith.constant 0 : index
    %c0_9 = arith.constant 0 : index
    %c0_10 = arith.constant 0 : index
    %12 = vector.load %arg10[%c0_8, %c0_9, %c0_10] : memref<1x1x512xf32, #tpu.memory_space<vmem>>, vector<1x1x512xf32>
    %13 = vector.shape_cast %12 : vector<1x1x512xf32> to vector<1x512xf32>
    %14 = vector.broadcast %13 : vector<1x512xf32> to vector<16x512xf32>
    %15 = arith.addf %11, %14 : vector<16x512xf32>
    %cst_11 = arith.constant 0.000000e+00 : f32
    %16 = vector.broadcast %cst_11 : f32 to vector<16x512xf32>
    %17 = arith.maximumf %15, %16 : vector<16x512xf32>
    %c0_12 = arith.constant 0 : index
    %c0_13 = arith.constant 0 : index
    %18 = vector.load %arg28[%c0_12, %c0_13] : memref<16x32xf32, #tpu.memory_space<vmem>>, vector<16x32xf32>
    %19 = arith.truncf %17 : vector<16x512xf32> to vector<16x512xbf16>
    %c0_14 = arith.constant 0 : index
    %c0_15 = arith.constant 0 : index
    %c0_16 = arith.constant 0 : index
    %20 = vector.load %arg11[%c0_14, %c0_15, %c0_16] : memref<1x512x32xbf16, #tpu.memory_space<vmem>>, vector<1x512x32xbf16>
    %21 = vector.shape_cast %20 : vector<1x512x32xbf16> to vector<512x32xbf16>
    %cst_17 = arith.constant dense<0.000000e+00> : vector<16x32xf32>
    %22 = tpu.matmul %19, %21, %cst_17 {dimension_numbers = #tpu.dot_dimension_numbers<[1], [0], [0], [1], [0, 0, 1, 1], [], []>} : vector<16x512xbf16>, vector<512x32xbf16>, vector<16x32xf32> -> vector<16x32xf32>
    %23 = arith.addf %18, %22 : vector<16x32xf32>
    %c0_18 = arith.constant 0 : index
    %c0_19 = arith.constant 0 : index
    %24 = vector.load %arg28[%c0_18, %c0_19] : memref<16x32xf32, #tpu.memory_space<vmem>>, vector<16x32xf32>
    tpu.vector_store %arg28[%c0_18, %c0_19], %23 {strides = array<i32>} : memref<16x32xf32, #tpu.memory_space<vmem>>, vector<16x32xf32>,
    %c3_i32 = arith.constant 3 : i32
    %25 = arith.cmpi eq, %arg1, %c3_i32 : i32
    %26 = arith.extui %25 : i1 to i32
    %c0_i32_20 = arith.constant 0 : i32
    %27 = arith.cmpi ne, %26, %c0_i32_20 : i32
    scf.if %27 {
      %c0_23 = arith.constant 0 : index
      %c0_24 = arith.constant 0 : index
      %33 = vector.load %arg26[%c0_23, %c0_24] : memref<16x32xf32, #tpu.memory_space<vmem>>, vector<16x32xf32>
      %c0_25 = arith.constant 0 : index
      %c0_26 = arith.constant 0 : index
      %34 = vector.load %arg28[%c0_25, %c0_26] : memref<16x32xf32, #tpu.memory_space<vmem>>, vector<16x32xf32>
      %35 = arith.addf %33, %34 : vector<16x32xf32>
      %c0_27 = arith.constant 0 : index
      %c0_28 = arith.constant 0 : index
      %c0_29 = arith.constant 0 : index
      %36 = vector.load %arg13[%c0_27, %c0_28, %c0_29] : memref<1x1x32xf32, #tpu.memory_space<vmem>>, vector<1x1x32xf32>
      %37 = vector.shape_cast %36 : vector<1x1x32xf32> to vector<1x32xf32>
      %c0_30 = arith.constant 0 : index
      %c0_31 = arith.constant 0 : index
      %c0_32 = arith.constant 0 : index
      %38 = vector.load %arg14[%c0_30, %c0_31, %c0_32] : memref<1x1x32xf32, #tpu.memory_space<vmem>>, vector<1x1x32xf32>
      %39 = vector.shape_cast %38 : vector<1x1x32xf32> to vector<1x32xf32>
      %cst_33 = arith.constant dense<0.000000e+00> : vector<16xf32>
      %40 = vector.multi_reduction <add>, %35, %cst_33 [1] : vector<16x32xf32> to vector<16xf32>
      %41 = vector.shape_cast %40 : vector<16xf32> to vector<16x1xf32>
      %cst_34 = arith.constant 3.200000e+01 : f32
      %42 = vector.broadcast %cst_34 : f32 to vector<16x1xf32>
      %43 = arith.divf %41, %42 : vector<16x1xf32>
      %44 = vector.broadcast %43 : vector<16x1xf32> to vector<16x32xf32>
      %45 = arith.subf %35, %44 : vector<16x32xf32>
      %46 = arith.mulf %45, %45 : vector<16x32xf32>
      %cst_35 = arith.constant dense<0.000000e+00> : vector<16xf32>
      %47 = vector.multi_reduction <add>, %46, %cst_35 [1] : vector<16x32xf32> to vector<16xf32>
      %48 = vector.shape_cast %47 : vector<16xf32> to vector<16x1xf32>
      %cst_36 = arith.constant 3.200000e+01 : f32
      %49 = vector.broadcast %cst_36 : f32 to vector<16x1xf32>
      %50 = arith.divf %48, %49 : vector<16x1xf32>
      %51 = vector.broadcast %43 : vector<16x1xf32> to vector<16x32xf32>
      %52 = arith.subf %35, %51 : vector<16x32xf32>
      %cst_37 = arith.constant 9.99999974E-6 : f32
      %53 = vector.broadcast %cst_37 : f32 to vector<16x1xf32>
      %54 = arith.addf %50, %53 : vector<16x1xf32>
      %55 = math.rsqrt %54 : vector<16x1xf32>
      %56 = vector.broadcast %55 : vector<16x1xf32> to vector<16x32xf32>
      %57 = arith.mulf %52, %56 : vector<16x32xf32>
      %58 = vector.broadcast %37 : vector<1x32xf32> to vector<16x32xf32>
      %59 = arith.mulf %57, %58 : vector<16x32xf32>
      %60 = vector.broadcast %39 : vector<1x32xf32> to vector<16x32xf32>
      %61 = arith.addf %59, %60 : vector<16x32xf32>
      %c0_38 = arith.constant 0 : index
      %c0_39 = arith.constant 0 : index
      %62 = vector.load %arg25[%c0_38, %c0_39] : memref<16x32xf32, #tpu.memory_space<vmem>>, vector<16x32xf32>
      tpu.vector_store %arg25[%c0_38, %c0_39], %61 {strides = array<i32>} : memref<16x32xf32, #tpu.memory_space<vmem>>, vector<16x32xf32>,
    } else {
    }
    %c1_i32 = arith.constant 1 : i32
    %28 = arith.cmpi eq, %arg0, %c1_i32 : i32
    %c3_i32_21 = arith.constant 3 : i32
    %29 = arith.cmpi eq, %arg1, %c3_i32_21 : i32
    %30 = arith.andi %28, %29 : i1
    %31 = arith.extui %30 : i1 to i32
    %c0_i32_22 = arith.constant 0 : i32
    %32 = arith.cmpi ne, %31, %c0_i32_22 : i32
    scf.if %32 {
      %c0_23 = arith.constant 0 : index
      %c0_24 = arith.constant 0 : index
      %33 = vector.load %arg25[%c0_23, %c0_24] : memref<16x32xf32, #tpu.memory_space<vmem>>, vector<16x32xf32>
      %34 = arith.truncf %33 : vector<16x32xf32> to vector<16x32xbf16>
      %c0_25 = arith.constant 0 : index
      %c0_26 = arith.constant 0 : index
      %35 = vector.load %arg15[%c0_25, %c0_26] : memref<32x8xbf16, #tpu.memory_space<vmem>>, vector<32x8xbf16>
      %cst_27 = arith.constant dense<0.000000e+00> : vector<16x8xf32>
      %36 = tpu.matmul %34, %35, %cst_27 {dimension_numbers = #tpu.dot_dimension_numbers<[1], [0], [0], [1], [0, 0, 1, 1], [], []>} : vector<16x32xbf16>, vector<32x8xbf16>, vector<16x8xf32> -> vector<16x8xf32>
      %c0_28 = arith.constant 0 : index
      %c0_29 = arith.constant 0 : index
      %37 = vector.load %arg16[%c0_28, %c0_29] : memref<1x8xf32, #tpu.memory_space<vmem>>, vector<1x8xf32>
      %38 = vector.broadcast %37 : vector<1x8xf32> to vector<16x8xf32>
      %39 = arith.addf %36, %38 : vector<16x8xf32>
      %40 = vector.shape_cast %39 : vector<16x8xf32> to vector<2x8x8xf32>
      %c0_30 = arith.constant 0 : index
      %c0_31 = arith.constant 0 : index
      %41 = vector.load %arg19[%c0_30, %c0_31] : memref<8x8xf32, #tpu.memory_space<vmem>>, vector<8x8xf32>
      %42 = vector.shape_cast %41 : vector<8x8xf32> to vector<1x8x8xf32>
      %c0_32 = arith.constant 0 : index
      %c0_33 = arith.constant 0 : index
      %43 = vector.load %arg23[%c0_32, %c0_33] : memref<2x1xi32, #tpu.memory_space<vmem>>, vector<2x1xi32>
      %44 = tpu.iota {dimensions = array<i32: 1>} : vector<2x8xi32>
      %c6_i32 = arith.constant 6 : i32
      %45 = vector.broadcast %c6_i32 : i32 to vector<2x8xi32>
      %46 = arith.cmpi eq, %44, %45 : vector<2x8xi32>
      %cst_34 = arith.constant 0.000000e+00 : f32
      %cst_35 = arith.constant -1.000000e+04 : f32
      %47 = vector.broadcast %cst_34 : f32 to vector<2x8xf32>
      %48 = vector.broadcast %cst_35 : f32 to vector<2x8xf32>
      %49 = arith.select %46, %47, %48 : vector<2x8xi1>, vector<2x8xf32>
      %50 = vector.extract_strided_slice %40 {offsets = [0, 0, 0], sizes = [2, 1, 8], strides = [1, 1, 1]} : vector<2x8x8xf32> to vector<2x1x8xf32>
      %51 = vector.shape_cast %50 : vector<2x1x8xf32> to vector<2x8xf32>
      %52 = vector.shape_cast %49 : vector<2x8xf32> to vector<2x1x8xf32>
      %53 = vector.broadcast %52 : vector<2x1x8xf32> to vector<2x8x8xf32>
      %54 = vector.broadcast %42 : vector<1x8x8xf32> to vector<2x8x8xf32>
      %55 = arith.addf %53, %54 : vector<2x8x8xf32>
      %56 = vector.shape_cast %51 : vector<2x8xf32> to vector<2x8x1xf32>
      %57 = vector.broadcast %56 : vector<2x8x1xf32> to vector<2x8x8xf32>
      %58 = arith.addf %55, %57 : vector<2x8x8xf32>
      %cst_36 = arith.constant dense<0xFF800000> : vector<2x8xf32>
      %59 = vector.multi_reduction <maximumf>, %58, %cst_36 [2] : vector<2x8x8xf32> to vector<2x8xf32>
      %60 = vector.shape_cast %59 : vector<2x8xf32> to vector<2x8x1xf32>
      %61 = vector.broadcast %60 : vector<2x8x1xf32> to vector<2x8x8xf32>
      %62 = arith.subf %58, %61 : vector<2x8x8xf32>
      %63 = math.exp %62 : vector<2x8x8xf32>
      %cst_37 = arith.constant dense<0.000000e+00> : vector<2x8xf32>
      %64 = vector.multi_reduction <add>, %63, %cst_37 [2] : vector<2x8x8xf32> to vector<2x8xf32>
      %65 = math.log %64 : vector<2x8xf32>
      %66 = arith.addf %59, %65 : vector<2x8xf32>
      %c1_i32_38 = arith.constant 1 : i32
      %67 = vector.broadcast %c1_i32_38 : i32 to vector<2x1xi32>
      %68 = arith.cmpi eq, %43, %67 : vector<2x1xi32>
      %69 = vector.shape_cast %68 : vector<2x1xi1> to vector<2x1xi1>
      %70 = vector.broadcast %69 : vector<2x1xi1> to vector<2x8xi1>
      %71 = arith.select %70, %66, %49 : vector<2x8xi1>, vector<2x8xf32>
      %72 = vector.extract_strided_slice %40 {offsets = [0, 1, 0], sizes = [2, 1, 8], strides = [1, 1, 1]} : vector<2x8x8xf32> to vector<2x1x8xf32>
      %73 = vector.shape_cast %72 : vector<2x1x8xf32> to vector<2x8xf32>
      %74 = vector.shape_cast %66 : vector<2x8xf32> to vector<2x1x8xf32>
      %75 = vector.broadcast %74 : vector<2x1x8xf32> to vector<2x8x8xf32>
      %76 = vector.broadcast %42 : vector<1x8x8xf32> to vector<2x8x8xf32>
      %77 = arith.addf %75, %76 : vector<2x8x8xf32>
      %78 = vector.shape_cast %73 : vector<2x8xf32> to vector<2x8x1xf32>
      %79 = vector.broadcast %78 : vector<2x8x1xf32> to vector<2x8x8xf32>
      %80 = arith.addf %77, %79 : vector<2x8x8xf32>
      %cst_39 = arith.constant dense<0xFF800000> : vector<2x8xf32>
      %81 = vector.multi_reduction <maximumf>, %80, %cst_39 [2] : vector<2x8x8xf32> to vector<2x8xf32>
      %82 = vector.shape_cast %81 : vector<2x8xf32> to vector<2x8x1xf32>
      %83 = vector.broadcast %82 : vector<2x8x1xf32> to vector<2x8x8xf32>
      %84 = arith.subf %80, %83 : vector<2x8x8xf32>
      %85 = math.exp %84 : vector<2x8x8xf32>
      %cst_40 = arith.constant dense<0.000000e+00> : vector<2x8xf32>
      %86 = vector.multi_reduction <add>, %85, %cst_40 [2] : vector<2x8x8xf32> to vector<2x8xf32>
      %87 = math.log %86 : vector<2x8xf32>
      %88 = arith.addf %81, %87 : vector<2x8xf32>
      %c2_i32 = arith.constant 2 : i32
      %89 = vector.broadcast %c2_i32 : i32 to vector<2x1xi32>
      %90 = arith.cmpi eq, %43, %89 : vector<2x1xi32>
      %91 = vector.shape_cast %90 : vector<2x1xi1> to vector<2x1xi1>
      %92 = vector.broadcast %91 : vector<2x1xi1> to vector<2x8xi1>
      %93 = arith.select %92, %88, %71 : vector<2x8xi1>, vector<2x8xf32>
      %94 = vector.extract_strided_slice %40 {offsets = [0, 2, 0], sizes = [2, 1, 8], strides = [1, 1, 1]} : vector<2x8x8xf32> to vector<2x1x8xf32>
      %95 = vector.shape_cast %94 : vector<2x1x8xf32> to vector<2x8xf32>
      %96 = vector.shape_cast %88 : vector<2x8xf32> to vector<2x1x8xf32>
      %97 = vector.broadcast %96 : vector<2x1x8xf32> to vector<2x8x8xf32>
      %98 = vector.broadcast %42 : vector<1x8x8xf32> to vector<2x8x8xf32>
      %99 = arith.addf %97, %98 : vector<2x8x8xf32>
      %100 = vector.shape_cast %95 : vector<2x8xf32> to vector<2x8x1xf32>
      %101 = vector.broadcast %100 : vector<2x8x1xf32> to vector<2x8x8xf32>
      %102 = arith.addf %99, %101 : vector<2x8x8xf32>
      %cst_41 = arith.constant dense<0xFF800000> : vector<2x8xf32>
      %103 = vector.multi_reduction <maximumf>, %102, %cst_41 [2] : vector<2x8x8xf32> to vector<2x8xf32>
      %104 = vector.shape_cast %103 : vector<2x8xf32> to vector<2x8x1xf32>
      %105 = vector.broadcast %104 : vector<2x8x1xf32> to vector<2x8x8xf32>
      %106 = arith.subf %102, %105 : vector<2x8x8xf32>
      %107 = math.exp %106 : vector<2x8x8xf32>
      %cst_42 = arith.constant dense<0.000000e+00> : vector<2x8xf32>
      %108 = vector.multi_reduction <add>, %107, %cst_42 [2] : vector<2x8x8xf32> to vector<2x8xf32>
      %109 = math.log %108 : vector<2x8xf32>
      %110 = arith.addf %103, %109 : vector<2x8xf32>
      %c3_i32_43 = arith.constant 3 : i32
      %111 = vector.broadcast %c3_i32_43 : i32 to vector<2x1xi32>
      %112 = arith.cmpi eq, %43, %111 : vector<2x1xi32>
      %113 = vector.shape_cast %112 : vector<2x1xi1> to vector<2x1xi1>
      %114 = vector.broadcast %113 : vector<2x1xi1> to vector<2x8xi1>
      %115 = arith.select %114, %110, %93 : vector<2x8xi1>, vector<2x8xf32>
      %116 = vector.extract_strided_slice %40 {offsets = [0, 3, 0], sizes = [2, 1, 8], strides = [1, 1, 1]} : vector<2x8x8xf32> to vector<2x1x8xf32>
      %117 = vector.shape_cast %116 : vector<2x1x8xf32> to vector<2x8xf32>
      %118 = vector.shape_cast %110 : vector<2x8xf32> to vector<2x1x8xf32>
      %119 = vector.broadcast %118 : vector<2x1x8xf32> to vector<2x8x8xf32>
      %120 = vector.broadcast %42 : vector<1x8x8xf32> to vector<2x8x8xf32>
      %121 = arith.addf %119, %120 : vector<2x8x8xf32>
      %122 = vector.shape_cast %117 : vector<2x8xf32> to vector<2x8x1xf32>
      %123 = vector.broadcast %122 : vector<2x8x1xf32> to vector<2x8x8xf32>
      %124 = arith.addf %121, %123 : vector<2x8x8xf32>
      %cst_44 = arith.constant dense<0xFF800000> : vector<2x8xf32>
      %125 = vector.multi_reduction <maximumf>, %124, %cst_44 [2] : vector<2x8x8xf32> to vector<2x8xf32>
      %126 = vector.shape_cast %125 : vector<2x8xf32> to vector<2x8x1xf32>
      %127 = vector.broadcast %126 : vector<2x8x1xf32> to vector<2x8x8xf32>
      %128 = arith.subf %124, %127 : vector<2x8x8xf32>
      %129 = math.exp %128 : vector<2x8x8xf32>
      %cst_45 = arith.constant dense<0.000000e+00> : vector<2x8xf32>
      %130 = vector.multi_reduction <add>, %129, %cst_45 [2] : vector<2x8x8xf32> to vector<2x8xf32>
      %131 = math.log %130 : vector<2x8xf32>
      %132 = arith.addf %125, %131 : vector<2x8xf32>
      %c4_i32 = arith.constant 4 : i32
      %133 = vector.broadcast %c4_i32 : i32 to vector<2x1xi32>
      %134 = arith.cmpi eq, %43, %133 : vector<2x1xi32>
      %135 = vector.shape_cast %134 : vector<2x1xi1> to vector<2x1xi1>
      %136 = vector.broadcast %135 : vector<2x1xi1> to vector<2x8xi1>
      %137 = arith.select %136, %132, %115 : vector<2x8xi1>, vector<2x8xf32>
      %138 = vector.extract_strided_slice %40 {offsets = [0, 4, 0], sizes = [2, 1, 8], strides = [1, 1, 1]} : vector<2x8x8xf32> to vector<2x1x8xf32>
      %139 = vector.shape_cast %138 : vector<2x1x8xf32> to vector<2x8xf32>
      %140 = vector.shape_cast %132 : vector<2x8xf32> to vector<2x1x8xf32>
      %141 = vector.broadcast %140 : vector<2x1x8xf32> to vector<2x8x8xf32>
      %142 = vector.broadcast %42 : vector<1x8x8xf32> to vector<2x8x8xf32>
      %143 = arith.addf %141, %142 : vector<2x8x8xf32>
      %144 = vector.shape_cast %139 : vector<2x8xf32> to vector<2x8x1xf32>
      %145 = vector.broadcast %144 : vector<2x8x1xf32> to vector<2x8x8xf32>
      %146 = arith.addf %143, %145 : vector<2x8x8xf32>
      %cst_46 = arith.constant dense<0xFF800000> : vector<2x8xf32>
      %147 = vector.multi_reduction <maximumf>, %146, %cst_46 [2] : vector<2x8x8xf32> to vector<2x8xf32>
      %148 = vector.shape_cast %147 : vector<2x8xf32> to vector<2x8x1xf32>
      %149 = vector.broadcast %148 : vector<2x8x1xf32> to vector<2x8x8xf32>
      %150 = arith.subf %146, %149 : vector<2x8x8xf32>
      %151 = math.exp %150 : vector<2x8x8xf32>
      %cst_47 = arith.constant dense<0.000000e+00> : vector<2x8xf32>
      %152 = vector.multi_reduction <add>, %151, %cst_47 [2] : vector<2x8x8xf32> to vector<2x8xf32>
      %153 = math.log %152 : vector<2x8xf32>
      %154 = arith.addf %147, %153 : vector<2x8xf32>
      %c5_i32 = arith.constant 5 : i32
      %155 = vector.broadcast %c5_i32 : i32 to vector<2x1xi32>
      %156 = arith.cmpi eq, %43, %155 : vector<2x1xi32>
      %157 = vector.shape_cast %156 : vector<2x1xi1> to vector<2x1xi1>
      %158 = vector.broadcast %157 : vector<2x1xi1> to vector<2x8xi1>
      %159 = arith.select %158, %154, %137 : vector<2x8xi1>, vector<2x8xf32>
      %160 = vector.extract_strided_slice %40 {offsets = [0, 5, 0], sizes = [2, 1, 8], strides = [1, 1, 1]} : vector<2x8x8xf32> to vector<2x1x8xf32>
      %161 = vector.shape_cast %160 : vector<2x1x8xf32> to vector<2x8xf32>
      %162 = vector.shape_cast %154 : vector<2x8xf32> to vector<2x1x8xf32>
      %163 = vector.broadcast %162 : vector<2x1x8xf32> to vector<2x8x8xf32>
      %164 = vector.broadcast %42 : vector<1x8x8xf32> to vector<2x8x8xf32>
      %165 = arith.addf %163, %164 : vector<2x8x8xf32>
      %166 = vector.shape_cast %161 : vector<2x8xf32> to vector<2x8x1xf32>
      %167 = vector.broadcast %166 : vector<2x8x1xf32> to vector<2x8x8xf32>
      %168 = arith.addf %165, %167 : vector<2x8x8xf32>
      %cst_48 = arith.constant dense<0xFF800000> : vector<2x8xf32>
      %169 = vector.multi_reduction <maximumf>, %168, %cst_48 [2] : vector<2x8x8xf32> to vector<2x8xf32>
      %170 = vector.shape_cast %169 : vector<2x8xf32> to vector<2x8x1xf32>
      %171 = vector.broadcast %170 : vector<2x8x1xf32> to vector<2x8x8xf32>
      %172 = arith.subf %168, %171 : vector<2x8x8xf32>
      %173 = math.exp %172 : vector<2x8x8xf32>
      %cst_49 = arith.constant dense<0.000000e+00> : vector<2x8xf32>
      %174 = vector.multi_reduction <add>, %173, %cst_49 [2] : vector<2x8x8xf32> to vector<2x8xf32>
      %175 = math.log %174 : vector<2x8xf32>
      %176 = arith.addf %169, %175 : vector<2x8xf32>
      %c6_i32_50 = arith.constant 6 : i32
      %177 = vector.broadcast %c6_i32_50 : i32 to vector<2x1xi32>
      %178 = arith.cmpi eq, %43, %177 : vector<2x1xi32>
      %179 = vector.shape_cast %178 : vector<2x1xi1> to vector<2x1xi1>
      %180 = vector.broadcast %179 : vector<2x1xi1> to vector<2x8xi1>
      %181 = arith.select %180, %176, %159 : vector<2x8xi1>, vector<2x8xf32>
      %182 = vector.extract_strided_slice %40 {offsets = [0, 6, 0], sizes = [2, 1, 8], strides = [1, 1, 1]} : vector<2x8x8xf32> to vector<2x1x8xf32>
      %183 = vector.shape_cast %182 : vector<2x1x8xf32> to vector<2x8xf32>
      %184 = vector.shape_cast %176 : vector<2x8xf32> to vector<2x1x8xf32>
      %185 = vector.broadcast %184 : vector<2x1x8xf32> to vector<2x8x8xf32>
      %186 = vector.broadcast %42 : vector<1x8x8xf32> to vector<2x8x8xf32>
      %187 = arith.addf %185, %186 : vector<2x8x8xf32>
      %188 = vector.shape_cast %183 : vector<2x8xf32> to vector<2x8x1xf32>
      %189 = vector.broadcast %188 : vector<2x8x1xf32> to vector<2x8x8xf32>
      %190 = arith.addf %187, %189 : vector<2x8x8xf32>
      %cst_51 = arith.constant dense<0xFF800000> : vector<2x8xf32>
      %191 = vector.multi_reduction <maximumf>, %190, %cst_51 [2] : vector<2x8x8xf32> to vector<2x8xf32>
      %192 = vector.shape_cast %191 : vector<2x8xf32> to vector<2x8x1xf32>
      %193 = vector.broadcast %192 : vector<2x8x1xf32> to vector<2x8x8xf32>
      %194 = arith.subf %190, %193 : vector<2x8x8xf32>
      %195 = math.exp %194 : vector<2x8x8xf32>
      %cst_52 = arith.constant dense<0.000000e+00> : vector<2x8xf32>
      %196 = vector.multi_reduction <add>, %195, %cst_52 [2] : vector<2x8x8xf32> to vector<2x8xf32>
      %197 = math.log %196 : vector<2x8xf32>
      %198 = arith.addf %191, %197 : vector<2x8xf32>
      %c7_i32 = arith.constant 7 : i32
      %199 = vector.broadcast %c7_i32 : i32 to vector<2x1xi32>
      %200 = arith.cmpi eq, %43, %199 : vector<2x1xi32>
      %201 = vector.shape_cast %200 : vector<2x1xi1> to vector<2x1xi1>
      %202 = vector.broadcast %201 : vector<2x1xi1> to vector<2x8xi1>
      %203 = arith.select %202, %198, %181 : vector<2x8xi1>, vector<2x8xf32>
      %204 = vector.extract_strided_slice %40 {offsets = [0, 7, 0], sizes = [2, 1, 8], strides = [1, 1, 1]} : vector<2x8x8xf32> to vector<2x1x8xf32>
      %205 = vector.shape_cast %204 : vector<2x1x8xf32> to vector<2x8xf32>
      %206 = vector.shape_cast %198 : vector<2x8xf32> to vector<2x1x8xf32>
      %207 = vector.broadcast %206 : vector<2x1x8xf32> to vector<2x8x8xf32>
      %208 = vector.broadcast %42 : vector<1x8x8xf32> to vector<2x8x8xf32>
      %209 = arith.addf %207, %208 : vector<2x8x8xf32>
      %210 = vector.shape_cast %205 : vector<2x8xf32> to vector<2x8x1xf32>
      %211 = vector.broadcast %210 : vector<2x8x1xf32> to vector<2x8x8xf32>
      %212 = arith.addf %209, %211 : vector<2x8x8xf32>
      %cst_53 = arith.constant dense<0xFF800000> : vector<2x8xf32>
      %213 = vector.multi_reduction <maximumf>, %212, %cst_53 [2] : vector<2x8x8xf32> to vector<2x8xf32>
      %214 = vector.shape_cast %213 : vector<2x8xf32> to vector<2x8x1xf32>
      %215 = vector.broadcast %214 : vector<2x8x1xf32> to vector<2x8x8xf32>
      %216 = arith.subf %212, %215 : vector<2x8x8xf32>
      %217 = math.exp %216 : vector<2x8x8xf32>
      %cst_54 = arith.constant dense<0.000000e+00> : vector<2x8xf32>
      %218 = vector.multi_reduction <add>, %217, %cst_54 [2] : vector<2x8x8xf32> to vector<2x8xf32>
      %219 = math.log %218 : vector<2x8xf32>
      %220 = arith.addf %213, %219 : vector<2x8xf32>
      %c8_i32 = arith.constant 8 : i32
      %221 = vector.broadcast %c8_i32 : i32 to vector<2x1xi32>
      %222 = arith.cmpi eq, %43, %221 : vector<2x1xi32>
      %223 = vector.shape_cast %222 : vector<2x1xi1> to vector<2x1xi1>
      %224 = vector.broadcast %223 : vector<2x1xi1> to vector<2x8xi1>
      %225 = arith.select %224, %220, %203 : vector<2x8xi1>, vector<2x8xf32>
      %226 = vector.extract_strided_slice %41 {offsets = [7, 0], sizes = [1, 8], strides = [1, 1]} : vector<8x8xf32> to vector<1x8xf32>
      %227 = vector.broadcast %226 : vector<1x8xf32> to vector<2x8xf32>
      %228 = arith.addf %225, %227 : vector<2x8xf32>
      %cst_55 = arith.constant dense<0xFF800000> : vector<2xf32>
      %229 = vector.multi_reduction <maximumf>, %228, %cst_55 [1] : vector<2x8xf32> to vector<2xf32>
      %230 = vector.shape_cast %229 : vector<2xf32> to vector<2x1xf32>
      %231 = vector.broadcast %230 : vector<2x1xf32> to vector<2x8xf32>
      %232 = arith.subf %228, %231 : vector<2x8xf32>
      %233 = math.exp %232 : vector<2x8xf32>
      %cst_56 = arith.constant dense<0.000000e+00> : vector<2xf32>
      %234 = vector.multi_reduction <add>, %233, %cst_56 [1] : vector<2x8xf32> to vector<2xf32>
      %235 = vector.shape_cast %234 : vector<2xf32> to vector<2x1xf32>
      %236 = math.log %235 : vector<2x1xf32>
      %237 = arith.addf %230, %236 : vector<2x1xf32>
      %238 = tpu.iota {dimensions = array<i32: 2>} : vector<2x8x8xi32>
      %239 = tpu.iota {dimensions = array<i32: 1>} : vector<2x8xi32>
      %240 = vector.broadcast %43 : vector<2x1xi32> to vector<2x8xi32>
      %241 = arith.cmpi slt, %239, %240 : vector<2x8xi32>
      %242 = arith.extui %241 : vector<2x8xi1> to vector<2x8xi32>
      %243 = arith.sitofp %242 : vector<2x8xi32> to vector<2x8xf32>
      %c0_57 = arith.constant 0 : index
      %c0_58 = arith.constant 0 : index
      %244 = vector.load %arg20[%c0_57, %c0_58] : memref<2x8xi32, #tpu.memory_space<vmem>>, vector<2x8xi32>
      %245 = vector.shape_cast %244 : vector<2x8xi32> to vector<2x8x1xi32>
      %246 = vector.broadcast %245 : vector<2x8x1xi32> to vector<2x8x8xi32>
      %247 = arith.cmpi eq, %246, %238 : vector<2x8x8xi32>
      %248 = arith.extui %247 : vector<2x8x8xi1> to vector<2x8x8xi32>
      %249 = arith.sitofp %248 : vector<2x8x8xi32> to vector<2x8x8xf32>
      %250 = vector.shape_cast %243 : vector<2x8xf32> to vector<2x8x1xf32>
      %251 = vector.broadcast %250 : vector<2x8x1xf32> to vector<2x8x8xf32>
      %252 = arith.mulf %249, %251 : vector<2x8x8xf32>
      %c0_59 = arith.constant 0 : index
      %c0_60 = arith.constant 0 : index
      %253 = vector.load %arg21[%c0_59, %c0_60] : memref<2x8xi32, #tpu.memory_space<vmem>>, vector<2x8xi32>
      %254 = vector.shape_cast %253 : vector<2x8xi32> to vector<2x8x1xi32>
      %255 = vector.broadcast %254 : vector<2x8x1xi32> to vector<2x8x8xi32>
      %256 = arith.cmpi eq, %255, %238 : vector<2x8x8xi32>
      %257 = arith.extui %256 : vector<2x8x8xi1> to vector<2x8x8xi32>
      %258 = arith.sitofp %257 : vector<2x8x8xi32> to vector<2x8x8xf32>
      %259 = vector.shape_cast %252 : vector<2x8x8xf32> to vector<16x8xf32>
      %260 = vector.shape_cast %258 : vector<2x8x8xf32> to vector<16x8xf32>
      %261 = arith.mulf %259, %39 : vector<16x8xf32>
      %cst_61 = arith.constant dense<0.000000e+00> : vector<16xf32>
      %262 = vector.multi_reduction <add>, %261, %cst_61 [1] : vector<16x8xf32> to vector<16xf32>
      %263 = vector.shape_cast %262 : vector<16xf32> to vector<16x1xf32>
      %cst_62 = arith.constant dense<0.000000e+00> : vector<16x8xf32>
      %264 = tpu.matmul %259, %41, %cst_62 {dimension_numbers = #tpu.dot_dimension_numbers<[1], [0], [0], [1], [0, 0, 1, 1], [], []>} : vector<16x8xf32>, vector<8x8xf32>, vector<16x8xf32> -> vector<16x8xf32>
      %265 = arith.mulf %264, %260 : vector<16x8xf32>
      %cst_63 = arith.constant dense<0.000000e+00> : vector<16xf32>
      %266 = vector.multi_reduction <add>, %265, %cst_63 [1] : vector<16x8xf32> to vector<16xf32>
      %267 = vector.shape_cast %266 : vector<16xf32> to vector<16x1xf32>
      %268 = arith.addf %263, %267 : vector<16x1xf32>
      %269 = vector.shape_cast %268 : vector<16x1xf32> to vector<2x8x1xf32>
      %cst_64 = arith.constant dense<0.000000e+00> : vector<2x1xf32>
      %270 = vector.multi_reduction <add>, %269, %cst_64 [1] : vector<2x8x1xf32> to vector<2x1xf32>
      %271 = tpu.iota {dimensions = array<i32: 1>} : vector<2x8xi32>
      %c0_65 = arith.constant 0 : index
      %c0_66 = arith.constant 0 : index
      %272 = vector.load %arg22[%c0_65, %c0_66] : memref<2x1xi32, #tpu.memory_space<vmem>>, vector<2x1xi32>
      %273 = vector.broadcast %272 : vector<2x1xi32> to vector<2x8xi32>
      %274 = arith.cmpi eq, %273, %271 : vector<2x8xi32>
      %275 = arith.extui %274 : vector<2x8xi1> to vector<2x8xi32>
      %276 = arith.sitofp %275 : vector<2x8xi32> to vector<2x8xf32>
      %277 = vector.extract_strided_slice %41 {offsets = [7, 0], sizes = [1, 8], strides = [1, 1]} : vector<8x8xf32> to vector<1x8xf32>
      %278 = vector.broadcast %277 : vector<1x8xf32> to vector<2x8xf32>
      %279 = arith.mulf %276, %278 : vector<2x8xf32>
      %cst_67 = arith.constant dense<0.000000e+00> : vector<2xf32>
      %280 = vector.multi_reduction <add>, %279, %cst_67 [1] : vector<2x8xf32> to vector<2xf32>
      %281 = vector.shape_cast %280 : vector<2xf32> to vector<2x1xf32>
      %282 = arith.addf %270, %281 : vector<2x1xf32>
      %283 = arith.subf %237, %282 : vector<2x1xf32>
      %cst_68 = arith.constant dense<0.000000e+00> : vector<1xf32>
      %284 = vector.multi_reduction <add>, %283, %cst_68 [0] : vector<2x1xf32> to vector<1xf32>
      %285 = vector.shape_cast %284 : vector<1xf32> to vector<1x1xf32>
      %cst_69 = arith.constant 5.000000e-01 : f32
      %286 = vector.broadcast %cst_69 : f32 to vector<1x1xf32>
      %287 = arith.mulf %285, %286 : vector<1x1xf32>
      %c0_70 = arith.constant 0 : index
      %c0_71 = arith.constant 0 : index
      %288 = vector.load %arg24[%c0_70, %c0_71] : memref<1x1xf32, #tpu.memory_space<vmem>>, vector<1x1xf32>
      tpu.vector_store %arg24[%c0_70, %c0_71], %287 {strides = array<i32>} : memref<1x1xf32, #tpu.memory_space<vmem>>, vector<1x1xf32>,
    } else {
    }
    return
  }
  func.func @transform_0(%arg0: i32, %arg1: i32) -> (i32, i32) {
    %c0_i32 = arith.constant 0 : i32
    %c0_i32_0 = arith.constant 0 : i32
    %c0_i32_1 = arith.constant 0 : i32
    return %c0_i32, %c0_i32_0 : i32, i32
  }
  func.func @transform_1(%arg0: i32, %arg1: i32) -> (i32, i32, i32) {
    %c0_i32 = arith.constant 0 : i32
    %c0_i32_0 = arith.constant 0 : i32
    %c0_i32_1 = arith.constant 0 : i32
    return %arg0, %c0_i32, %c0_i32_0 : i32, i32, i32
  }
  func.func @transform_2(%arg0: i32, %arg1: i32) -> (i32, i32, i32) {
    %c0_i32 = arith.constant 0 : i32
    %c0_i32_0 = arith.constant 0 : i32
    %c0_i32_1 = arith.constant 0 : i32
    return %arg0, %c0_i32, %c0_i32_0 : i32, i32, i32
  }
  func.func @transform_3(%arg0: i32, %arg1: i32) -> (i32, i32, i32) {
    %c0_i32 = arith.constant 0 : i32
    %c0_i32_0 = arith.constant 0 : i32
    %c0_i32_1 = arith.constant 0 : i32
    return %arg0, %c0_i32, %c0_i32_0 : i32, i32, i32
  }
  func.func @transform_4(%arg0: i32, %arg1: i32) -> (i32, i32, i32) {
    %c0_i32 = arith.constant 0 : i32
    %c0_i32_0 = arith.constant 0 : i32
    %c0_i32_1 = arith.constant 0 : i32
    return %arg0, %c0_i32, %c0_i32_0 : i32, i32, i32
  }
  func.func @transform_5(%arg0: i32, %arg1: i32) -> (i32, i32, i32) {
    %c0_i32 = arith.constant 0 : i32
    %c0_i32_0 = arith.constant 0 : i32
    %c0_i32_1 = arith.constant 0 : i32
    return %arg0, %c0_i32, %c0_i32_0 : i32, i32, i32
  }
  func.func @transform_6(%arg0: i32, %arg1: i32) -> (i32, i32, i32) {
    %c0_i32 = arith.constant 0 : i32
    %c0_i32_0 = arith.constant 0 : i32
    %c0_i32_1 = arith.constant 0 : i32
    return %arg0, %c0_i32, %c0_i32_0 : i32, i32, i32
  }
  func.func @transform_7(%arg0: i32, %arg1: i32) -> (i32, i32, i32) {
    %c0_i32 = arith.constant 0 : i32
    %c0_i32_0 = arith.constant 0 : i32
    return %arg0, %c0_i32, %arg1 : i32, i32, i32
  }
  func.func @transform_8(%arg0: i32, %arg1: i32) -> (i32, i32, i32) {
    %c0_i32 = arith.constant 0 : i32
    %c0_i32_0 = arith.constant 0 : i32
    return %arg0, %c0_i32, %arg1 : i32, i32, i32
  }
  func.func @transform_9(%arg0: i32, %arg1: i32) -> (i32, i32, i32) {
    %c0_i32 = arith.constant 0 : i32
    %c0_i32_0 = arith.constant 0 : i32
    return %arg0, %arg1, %c0_i32 : i32, i32, i32
  }
  func.func @transform_10(%arg0: i32, %arg1: i32) -> (i32, i32, i32) {
    %c0_i32 = arith.constant 0 : i32
    %c0_i32_0 = arith.constant 0 : i32
    %c0_i32_1 = arith.constant 0 : i32
    return %arg0, %c0_i32, %c0_i32_0 : i32, i32, i32
  }
  func.func @transform_11(%arg0: i32, %arg1: i32) -> (i32, i32, i32) {
    %c0_i32 = arith.constant 0 : i32
    %c0_i32_0 = arith.constant 0 : i32
    %c0_i32_1 = arith.constant 0 : i32
    return %arg0, %c0_i32, %c0_i32_0 : i32, i32, i32
  }
  func.func @transform_12(%arg0: i32, %arg1: i32) -> (i32, i32, i32) {
    %c0_i32 = arith.constant 0 : i32
    %c0_i32_0 = arith.constant 0 : i32
    %c0_i32_1 = arith.constant 0 : i32
    return %arg0, %c0_i32, %c0_i32_0 : i32, i32, i32
  }
  func.func @transform_13(%arg0: i32, %arg1: i32) -> (i32, i32) {
    %c0_i32 = arith.constant 0 : i32
    %c0_i32_0 = arith.constant 0 : i32
    %c0_i32_1 = arith.constant 0 : i32
    return %c0_i32, %c0_i32_0 : i32, i32
  }
  func.func @transform_14(%arg0: i32, %arg1: i32) -> (i32, i32) {
    %c0_i32 = arith.constant 0 : i32
    %c0_i32_0 = arith.constant 0 : i32
    %c0_i32_1 = arith.constant 0 : i32
    return %c0_i32, %c0_i32_0 : i32, i32
  }
  func.func @transform_15(%arg0: i32, %arg1: i32) -> (i32, i32) {
    %c0_i32 = arith.constant 0 : i32
    %c0_i32_0 = arith.constant 0 : i32
    %c0_i32_1 = arith.constant 0 : i32
    return %c0_i32, %c0_i32_0 : i32, i32
  }
  func.func @transform_16(%arg0: i32, %arg1: i32) -> (i32, i32) {
    %c0_i32 = arith.constant 0 : i32
    %c0_i32_0 = arith.constant 0 : i32
    %c0_i32_1 = arith.constant 0 : i32
    return %c0_i32, %c0_i32_0 : i32, i32
  }
  func.func @transform_17(%arg0: i32, %arg1: i32) -> (i32, i32) {
    %c0_i32 = arith.constant 0 : i32
    %c0_i32_0 = arith.constant 0 : i32
    %c0_i32_1 = arith.constant 0 : i32
    return %c0_i32, %c0_i32_0 : i32, i32
  }
  func.func @transform_18(%arg0: i32, %arg1: i32) -> (i32, i32) {
    %c0_i32 = arith.constant 0 : i32
    %c0_i32_0 = arith.constant 0 : i32
    %c0_i32_1 = arith.constant 0 : i32
    return %c0_i32, %c0_i32_0 : i32, i32
  }
  func.func @transform_19(%arg0: i32, %arg1: i32) -> (i32, i32) {
    %c0_i32 = arith.constant 0 : i32
    %c0_i32_0 = arith.constant 0 : i32
    %c0_i32_1 = arith.constant 0 : i32
    return %c0_i32, %c0_i32_0 : i32, i32
  }
  func.func @transform_20(%arg0: i32, %arg1: i32) -> (i32, i32) {
    %c0_i32 = arith.constant 0 : i32
    %c0_i32_0 = arith.constant 0 : i32
    %c0_i32_1 = arith.constant 0 : i32
    return %c0_i32, %c0_i32_0 : i32, i32
  }
  func.func @transform_21(%arg0: i32, %arg1: i32) -> (i32, i32) {
    %c0_i32 = arith.constant 0 : i32
    %c0_i32_0 = arith.constant 0 : i32
    %c0_i32_1 = arith.constant 0 : i32
    return %c0_i32, %c0_i32_0 : i32, i32
  }
  func.func @transform_22(%arg0: i32, %arg1: i32) -> (i32, i32) {
    %c0_i32 = arith.constant 0 : i32
    %c0_i32_0 = arith.constant 0 : i32
    %c0_i32_1 = arith.constant 0 : i32
    return %c0_i32, %c0_i32_0 : i32, i32
  }
}

</mosaic_0001>

<bundles_post_ra>
// kernel: transformer_crf_loss.1
= control target key start
LH: loop header
LB: loop body
LE: loop exit
PB: predicated region body
PF: predicated region fallthrough
CT: control target
= control target key end

     0   :  { %s7626_s0 = inlined_call_operand.vmem [shape: f32[16,32], index: 0, kind: input, shape index: {}]   ;;  %s7627_s1 = inlined_call_operand.vmem [shape: bf16[2,32,96], index: 1, kind: input, shape index: {}]   ;;  %s7628_s2 = inlined_call_operand.vmem [shape: f32[2,1,96], index: 2, kind: input, shape index: {}]   ;;  %s7629_s3 = inlined_call_operand.vmem [shape: bf16[2,32,32], index: 3, kind: input, shape index: {}]   ;;  %s7630_s4 = inlined_call_operand.vmem [shape: f32[2,1,32], index: 4, kind: input, shape index: {}]   ;;  %s7631_s5 = inlined_call_operand.vmem [shape: f32[2,1,32], index: 5, kind: input, shape index: {}]   ;;  %s7632_s6 = inlined_call_operand.vmem [shape: f32[2,1,32], index: 6, kind: input, shape index: {}]   ;;  %s7633_s7 = inlined_call_operand.vmem [shape: bf16[2,32,2048], index: 7, kind: input, shape index: {}]   ;;  %s7634_s8 = inlined_call_operand.vmem [shape: f32[2,1,2048], index: 8, kind: input, shape index: {}]   ;;  %s7635_s9 = inlined_call_operand.vmem [shape: bf16[2,2048,32], index: 9, kind: input, shape index: {}]   ;;  %s7636_s10 = inlined_call_operand.vmem [shape: f32[2,1,32], index: 10, kind: input, shape index: {}]   ;;  %s7637_s11 = inlined_call_operand.vmem [shape: f32[2,1,32], index: 11, kind: input, shape index: {}]   ;;  %s7638_s12 = inlined_call_operand.vmem [shape: f32[2,1,32], index: 12, kind: input, shape index: {}]   ;;  %s7639_s13 = inlined_call_operand.vmem [shape: bf16[32,8], index: 13, kind: input, shape index: {}]   ;;  %s7640_s14 = inlined_call_operand.vmem [shape: f32[1,8], index: 14, kind: input, shape index: {}]   ;;  %s7641_s15 = inlined_call_operand.vmem [shape: bf16[32,8], index: 15, kind: input, shape index: {}]   ;;  %s7642_s16 = inlined_call_operand.vmem [shape: bf16[8,32], index: 16, kind: input, shape index: {}]   ;;  %s7643_s17 = inlined_call_operand.vmem [shape: f32[8,8], index: 17, kind: input, shape index: {}]   ;;  %s7644_s18 = inlined_call_operand.vmem [shape: s32[2,8], index: 18, kind: input, shape index: {}]   ;;  %s7645_s19 = inlined_call_operand.vmem [shape: s32[2,8], index: 19, kind: input, shape index: {}]   ;;  %s7646_s20 = inlined_call_operand.vmem [shape: s32[2,1], index: 20, kind: input, shape index: {}]   ;;  %s7647_s21 = inlined_call_operand.vmem [shape: s32[2,1], index: 21, kind: input, shape index: {}]   ;;  %s7648_s22 = inlined_call_operand.hbm [shape: f32[1,1], index: 22, kind: output, shape index: {}]  }
   0x1   :  { %7660 = sst [smem:[#allocation18_spill]] %s7626_s0 }
   0x2   :  { %7661 = sst [smem:[#allocation19_spill]] %s7627_s1 }
   0x3   :  { %7662 = sst [smem:[#allocation20_spill]] %s7628_s2 }
   0x4   :  { %7663 = sst [smem:[#allocation21_spill]] %s7629_s3 }
   0x5   :  { %7664 = sst [smem:[#allocation22_spill]] %s7630_s4 }
   0x6   :  { %7665 = sst [smem:[#allocation23_spill]] %s7631_s5 }
   0x7   :  { %7666 = sst [smem:[#allocation24_spill]] %s7632_s6 }
   0x8   :  { %7667 = sst [smem:[#allocation25_spill]] %s7633_s7 }
   0x9   :  { %7668 = sst [smem:[#allocation26_spill]] %s7639_s13 }
   0xa   :  { %7669 = sst [smem:[#allocation27_spill]] %s7640_s14 }
   0xb   :  { %7670 = sst [smem:[#allocation28_spill]] %s7641_s15 }
   0xc   :  { %7671 = sst [smem:[#allocation29_spill]] %s7642_s16 }
   0xd   :  { %7672 = sst [smem:[#allocation30_spill]] %s7643_s17 }
   0xe   :  { %7673 = sst [smem:[#allocation31_spill]] %s7644_s18 }
   0xf   :  { %7674 = sst [smem:[#allocation32_spill]] %s7645_s19 }
  0x10   :  { %7675 = sst [smem:[#allocation33_spill]] %s7646_s20 }
  0x11   :  { %7676 = sst [smem:[#allocation34_spill]] %s7647_s21 }
  0x12   :  { %7677 = sst [smem:[#allocation35_spill]] %s7648_s22 }
  0x13   :  { %27 = vsyncpa [#allocation8], 0  ;;  %s5928_s3 = smov 0   ;;  %s5930_s28 = smov 0  }
  0x14   :  { %s5932_s29 = smov 0   ;;  %s5934_s30 = smov 0  }
  0x15   :  { %s5936_s4 = smov 0   ;;  %s5938_s0 = smov 0  }
  0x16   :  { %s5940_s23 = smov 0  }
  0x17 LB: > { %7678 = sst [smem:[#allocation10_spill]] %s5783_s28  ;;  %s42_s5 = sadd.s32 1, %s5795_s4  ;;  %s5803_s23 = sphi %s5940_s23, %s33_s23   ;;  %s5799_s0 = sphi %s5938_s0, %s7718_s0   ;;  %s5795_s4 = sphi %s5936_s4, %s7717_s4   ;;  %s5791_s30 = sphi %s5934_s30, %s7716_s30   ;;  %s5787_s29 = sphi %s5932_s29, %s7715_s29   ;;  %s5783_s28 = sphi %s5930_s28, %s7714_s28   ;;  %s5779_s3 = sphi %s5928_s3, %s7713_s3  }
  0x18   : > { %7679 = sst [smem:[#allocation11_spill]] %s5795_s4  ;;  %p43_p0 = scmp.ge.s32.totalorder %s42_s5, 4 }
  0x19   : > { %7680 = sst [smem:[#allocation12_spill]] %s5799_s0  ;;  %s45_s24 = sadd.s32 1, %s5799_s0 }
  0x1a   : > { %7681 = sst [smem:[#allocation13_spill]] %s5803_s23  ;;  %p238_p1 = scmp.ne.s32.totalorder %s5783_s28, %s5779_s3 }
  0x1b   : > { %s7720_s5 = smov (%p43_p0, %s42_s5), 0  ;;  %s7722_s24 = smov (!%p43_p0, %s45_s24), %s5799_s0 }
  0x1c   : > { %7682 = sst [smem:[#allocation14_spill]] %s7720_s5  ;;  %p239_p2 = scmp.eq.s32.totalorder %s5803_s23, 0 }
  0x1d   : > { %p47_p3 = scmp.ge.s32.totalorder %s7722_s24, 2  ;;  %s227_s6 = ssub.s32 %s5795_s4, %s7720_s5 }
  0x1e   : > { %p240_p4 = por %p239_p2, %p238_p1  ;;  %s231_s2 = sadd.s32 1, %s5783_s28 }
  0x1f   : > { %s7724_s24 = smov (%p47_p3, %s7722_s24), 0  ;;  %p5033_p6 = scmp.ge.s32.totalorder %s5803_s23, 8 }
  0x20   : > { %7683 = sst [smem:[#allocation15_spill]] %s7724_s24  ;;  %s226_s25 = ssub.s32 %s5799_s0, %s7724_s24 }
  0x21   : > { %s228_s26 = sor.u32 %s227_s6, %s226_s25 }
  0x22   : > { %p229_p5 = scmp.eq.s32.totalorder %s228_s26, 0  ;;  %638 = sbr.rel (%p5033_p6) target bundleno = 57 (0x39), region = 56 }
  0x24   : > { %s5980_s27 = scalar_select %p229_p5, %s5783_s28, %s231_s2  }
  0x26   : > { %7684 = sst [smem:[#allocation16_spill]] %s5980_s27 }
  0x27   : > { %681 = sbr.rel (!%p240_p4) target bundleno = 57 (0x39), region = 84  ;;  %s683_s1 = sand.u32 (%p240_p4), 1, %s5783_s28  }
  0x28   : > { %s5035_s22 = sshll.u32 (%p240_p4), %s5795_s4, 2  ;;  %s5034_s5 = sshll.u32 (%p240_p4), %s683_s1, 6 }
  0x29   : > { %s5036_s20 = sshll.u32 (%p240_p4), %s5799_s0, 6  ;;  %s7685_s7 = sld [smem:[#allocation25_spill]] (%p240_p4) }
  0x2a   : > { %s688_s19 = sadd.s32 (%p240_p4), %s5036_s20, %s5035_s22  ;;  %s685_s25 = scalar_lea.vmem (%p240_p4), [#allocation6], %s5034_s5 }
  0x2b   : > { %s5037_s18 = sshll.u32 (%p240_p4), %s688_s19, 2 }
  0x2f   : > { %s690_s6 = scalar_lea.vmem %s7685_s7, %s5037_s18 }
  0x30   : > { %v703_v0 = vld [vmem:[%s690_s6] sm:$0xff]  ;;  %v705_v1 = vld [vmem:[%s690_s6 + $0x8] sm:$0xff] }
  0x31   : > { %v707_v2 = vld [vmem:[%s690_s6 + $0x40] sm:$0xff]  ;;  %704 = vst [vmem:[%s685_s25] sm:$0xff] %v703_v0  ;;  %v709_v3 = vld [vmem:[%s690_s6 + $0x48] sm:$0xff] }
  0x32   : > { %706 = vst [vmem:[%s685_s25 + $0x8] sm:$0xff] %v705_v1  ;;  %v711_v4 = vld [vmem:[%s690_s6 + $0x80] sm:$0xff]  ;;  %v713_v5 = vld [vmem:[%s690_s6 + $0x88] sm:$0xff] }
  0x33   : > { %708 = vst [vmem:[%s685_s25 + $0x10] sm:$0xff] %v707_v2  ;;  %v715_v6 = vld [vmem:[%s690_s6 + $0xc0] sm:$0xff]  ;;  %v717_v7 = vld [vmem:[%s690_s6 + $0xc8] sm:$0xff] }
  0x34   : > { %710 = vst [vmem:[%s685_s25 + $0x18] sm:$0xff] %v709_v3 }
  0x35   : > { %712 = vst [vmem:[%s685_s25 + $0x20] sm:$0xff] %v711_v4 }
  0x36   : > { %714 = vst [vmem:[%s685_s25 + $0x28] sm:$0xff] %v713_v5 }
  0x37   : > { %716 = vst [vmem:[%s685_s25 + $0x30] sm:$0xff] %v715_v6 }
  0x38   : > { %718 = vst [vmem:[%s685_s25 + $0x38] sm:$0xff] %v717_v7 }
  0x39 PF: > { %p5038_p7 = scmp.ge.s32.totalorder %s5803_s23, 1  ;;  %p766_p8 = scmp.lt.s32.totalorder %s5803_s23, 9 }
  0x3b   : > { %p767_p9 = pnand %p5038_p7, %p766_p8 }
  0x3d   : > { %770 = sbr.rel (%p767_p9) target bundleno = 6399 (0x18ff), region = 127 }
  0x42   : > { %s773_s18 = sand.u32 1, %s5779_s3   ;;  %p877_p10 = scmp.lt.s32.totalorder %s5791_s30, 1 }
  0x43   : > { %s5039_s19 = sshll.u32 %s773_s18, 6  ;;  %s5044_s20 = sshll.u32 %s5787_s29, 2 }
  0x44   : > { %p903_p11 = scmp.lt.s32.totalorder %s5044_s20, 15  ;;  %s7687_s6 = sld [smem:[#allocation19_spill]] }
  0x45   : > { %s5995_s21 = scalar_select %p877_p10, %s5791_s30, 1 }
  0x46   : > { %s7726_s20 = smov (!%p903_p11, %s5044_s20), 15  ;;  %s7688_s0 = sld [smem:[#allocation21_spill]] }
  0x47   : > { %s5270_s22 = sshll.u32 %s5995_s21, 4  ;;  %s7690_s23 = sld [smem:[#allocation22_spill]] }
  0x48   : > { %s7691_s1 = sld [smem:[#allocation23_spill]]  ;;  %s906_s2 = sadd.s32 %s5270_s22, %s7726_s20 }
  0x49   : > { %s7692_s16 = sld [smem:[#allocation24_spill]]  ;;  %s6027_s7 = scalar_lea.vmem %s7634_s8, %s906_s2 }
  0x4a   : > { %s6005_s25 = scalar_lea.vmem %s7687_s6, %s5270_s22  ;;  %s5047_s18 = sshll.u32 %s5995_s21, 8 }
  0x4b   : > { %s924_s17 = scalar_lea.vmem %s7637_s11, %s5995_s21  ;;  %s927_s20 = scalar_lea.vmem %s7638_s12, %s5995_s21 }
  0x4c   : > { %s6010_s4 = scalar_lea.vmem %s7688_s0, %s5270_s22  ;;  %s5046_s0 = sshll.u32 %s5787_s29, 6 }
  0x4d   : > { %7689 = sst [smem:[#allocation17_spill]] %s6010_s4  ;;  %s892_s14 = scalar_lea.vmem %s7690_s23, %s5995_s21 }
  0x4e   : > { %s895_s3 = scalar_lea.vmem %s7691_s1, %s5995_s21  ;;  %p912_p12 = scmp.lt.s32.totalorder %s5046_s0, 255 }
  0x4f   : > { %s898_s26 = scalar_lea.vmem %s7692_s16, %s5995_s21  ;;  %s921_s23 = scalar_lea.vmem %s7636_s10, %s5995_s21 }
  0x50   : > { %s7728_s0 = smov (!%p912_p12, %s5046_s0), 255  ;;  %p929_p13 = scmp.eq.s32.totalorder %s5791_s30, 0 }
  0x51   : > { %s915_s15 = sadd.s32 %s5047_s18, %s7728_s0  ;;  %p930_p0 = scmp.eq.s32.totalorder %s5787_s29, 0 }
  0x52   : > { %s5048_s22 = sshll.u32 %s915_s15, 2  ;;  %s6050_s4 = scalar_lea.vmem [#allocation6], %s5039_s19 }
  0x53   : > { %s6048_s2 = scalar_lea.vmem %s7635_s9, %s5048_s22  ;;  %p931_p1 = pnand %p930_p0, %p929_p13 }
  0x54   : > { %s7693_s27 = sld [smem:[#allocation18_spill]] (!%p931_p1) }
  0x55   : > { %934 = sbr.rel (%p931_p1) target bundleno = 93 (0x5d), region = 135 }
  0x5a   : > { %v935_v8 = vld [vmem:[%s7693_s27] sm:$0xff]  ;;  %vm937_vm0 = vcmask 261120   ;;  %v936_v9 = vld [vmem:[%s7693_s27 + $0x8] sm:$0xff] }
  0x5b   : > { %938 = vst.msk [vmem:[#allocation2] sm:$0xff] %vm937_vm0, %v935_v8 }
  0x5c   : > { %939 = vst.msk [vmem:[#allocation2 + $0x8] sm:$0xff] %vm937_vm0, %v936_v9 }
  0x5d PF: > { %p5049_p2 = scmp.ne.s32.totalorder %s5787_s29, 0 }
  0x5e   : > { %s5806_s16 = smov (!%p5049_p2), 96   ;;  %s7696_s1 = sld [smem:[#allocation28_spill]] (!%p5049_p2) }
  0x5f   : > { %942 = sbr.rel (%p5049_p2) target bundleno = 1114 (0x45a), region = 139  ;;  %s7697_s24 = sld [smem:[#allocation29_spill]] (!%p5049_p2) }
  0x60   : > { %s7698_s19 = sld [smem:[#allocation17_spill]] (!%p5049_p2) }
  0x64   : > { %v5273_v10 = vld [vmem:[%s6005_s25 + $0x8] sm:$0xff]  ;;  %v5272_v11 = vld [vmem:[%s6005_s25] sm:$0xff]  ;;  %vm966_vm1 = vcmask 261120   ;;  %s7694_s25 = sld [smem:[#allocation20_spill]]  ;;  %vm1039_vm2 = vcmask 64512   ;;  %vm1105_vm3 = vcmask 1043456  }
  0x65   : > { %v6061_v12 = vld [vmem:[#allocation2] sm:$0xff]  ;;  %976 = vmatpush.bf16.msra.mxu0 %v5273_v10  ;;  %v6063_v14 = vld [vmem:[#allocation2 + $0x8] sm:$0xff] }
  0x66   : > { %v5391_v13 = vld [vmem:[%s921_s23] ss:$0 sm:$0xff]  ;;  %v945_v15 = vpack.c.bf16 %v6063_v14, %v6061_v12  ;;  %s5805_s23 = smov 64   ;;  %v5275_v21 = vld [vmem:[%s7696_s1 + $0x8] sm:$0xff] }
  0x67   : > { %1258 = vst.msk [vmem:[#allocation5] sm:$0xff] %vm966_vm1, %v5391_v13  ;;  %1026 = vmatpush.bf16.msra.mxu1 %v5275_v21  ;;  %v5274_v22 = vld [vmem:[%s7696_s1] sm:$0xff] }
  0x68   : > { %1259 = vst.msk [vmem:[#allocation5 + $0x8] sm:$0xff] %vm966_vm1, %v5391_v13  ;;  %v1098_v36 = vld [vmem:[%s7697_s24] sm:$0xf] }
  0x69   : > { %977 = vmatpush.bf16.msra.mxu0 %v5272_v11  ;;  %v1107_v39 = vsel %vm1105_vm3, %v1098_v36, 0 }
  0x6a   : > { %s7695_s18 = scalar_lea.vmem %s7694_s25, %s5995_s21  ;;  %1116 = vmatpush.bf16.msra.mxu2 %v1107_v39 }
  0x6b   : > { %v5392_v16 = vld [vmem:[%s7695_s18] ss:$0 sm:$0xff]  ;;  %1027 = vmatpush.bf16.msra.mxu1 %v5274_v22 }
  0x6c   : > { %5058 = vmatmul.msk.bf16.vlgmr.msra.gmra.mxu0 %vm966_vm1, %v945_v15 }
  0xe9   : > { %v979_v17 = vpop.f32.mrf.mxu0 }
  0xea   : > { %v980_v18 = vadd.f32 %v5392_v16, %v979_v17 }
  0xec   : > { %1128 = vrot.lane.b32.xlu1 %v980_v18, %s5805_s23  ;;  %986 = vrot.lane.b32.xlu0 %v980_v18, %s5806_s16 }
  0xf1   : > { %v981_v19 = vpop.f32.mrf.mxu0 }
  0xf2   : > { %v982_v20 = vadd.f32 %v5392_v16, %v981_v19 }
  0xf4   : > { %1130 = vrot.lane.b32.xlu1 %v982_v20, %s5805_s23  ;;  %988 = vrot.lane.b32.xlu0 %v982_v20, %s5806_s16 }
 0x15e   : > { %v987_v23 = vpop.permute.xlu0 %986 }
 0x15f   : > { %v992_v25 = vmul.f32 %v987_v23, %v980_v18  ;;  %v994_v29 = vmul.f32 %v987_v23, %v982_v20 }
 0x166   : > { %v989_v24 = vpop.permute.xlu0 %988 }
 0x167   : > { %v993_v26 = vmul.f32 %v989_v24, %v980_v18  ;;  %v995_v28 = vmul.f32 %v989_v24, %v982_v20 }
 0x169   : > { %v996_v27 = vpack.c.bf16 %v993_v26, %v992_v25  ;;  %v997_v30 = vpack.c.bf16 %v995_v28, %v994_v29  ;;  %v5277_v25 = vld [vmem:[%s7698_s19 + $0x8] sm:$0xff]  ;;  %v5276_v26 = vld [vmem:[%s7698_s19] sm:$0xff]  ;;  %v1129_v29 = vpop.permute.xlu1 %1128 }
 0x16a   : > { %1174 = vmatpush.bf16.msra.mxu3 %v5277_v25 }
 0x16b   : > { %5067 = vmatmul.msk.bf16.vlgmr.msra.gmra.mxu1 %vm966_vm1, %v996_v27 }
 0x16e   : > { %1175 = vmatpush.bf16.msra.mxu3 %v5276_v26 }
 0x17b   : > { %5068 = vmatmul.msk.bf16.gmra.mxu1 %vm966_vm1, %v997_v30 }
 0x1e8   : > { %v1029_v31 = vpop.f32.mrf.mxu1 }
 0x1e9   : > { %v1040_v33 = vsel %vm1039_vm2, %v1029_v31, -inf }
 0x1f0   : > { %v1031_v32 = vpop.f32.mrf.mxu1 }
 0x1f1   : > { %v1041_v34 = vsel %vm1039_vm2, %v1031_v32, -inf }
 0x1f2   : > { %v1042_v35 = vmax.f32 %v1040_v33, %v1041_v34 }
 0x1f4   : > { %v1046_v37 = vsub.f32 %v1029_v31, %v1042_v35  ;;  %v1047_v38 = vsub.f32 %v1031_v32, %v1042_v35  ;;  %v1131_v31 = vpop.permute.xlu1 %1130 }
 0x1f6   : > { %v1050_v40 = vmul.f32 1.442695, %v1046_v37  ;;  %v1052_v41 = vmul.f32 1.442695, %v1047_v38 }
 0x1f8   : > { %5396 = vpow2.f32 %v1050_v40  ;;  %v1034_v42 = vpop.f32.mrf.mxu1 }
 0x1f9   : > { %5398 = vpow2.f32 %v1052_v41  ;;  %v1043_v49 = vsel %vm1039_vm2, %v1034_v42, -inf }
 0x1fe   : > { %v5397_v43 = vpop.eup %5396 }
 0x1ff   : > { %v5399_v44 = vpop.eup %5398  ;;  %v1058_v45 = vsel %vm1039_vm2, %v5397_v43, 0.0 }
 0x200   : > { %v1059_v46 = vsel %vm1039_vm2, %v5399_v44, 0.0  ;;  %v1036_v47 = vpop.f32.mrf.mxu1 }
 0x201   : > { %v1060_v48 = vadd.f32 %v1059_v46, %v1058_v45  ;;  %v1044_v50 = vsel %vm1039_vm2, %v1036_v47, -inf }
 0x202   : > { %v1045_v51 = vmax.f32 %v1043_v49, %v1044_v50 }
 0x203   : > { %5400 = vrcp.f32 %v1060_v48  ;;  %v1075_v59 = vand.u32 2147483648, %v1060_v48  ;;  %v1073_v62 = vand.u32 2147483647, %v1060_v48  ;;  %vm1069_vm5 = vweird.f32 %v1060_v48 }
 0x204   : > { %v1048_v52 = vsub.f32 %v1034_v42, %v1045_v51  ;;  %v1049_v53 = vsub.f32 %v1036_v47, %v1045_v51 }
 0x205   : > { %v1076_v4 = vor.u32 1.1754944e-38, %v1075_v59  ;;  %vm1074_vm7 = vcmp.eq.f32.partialorder %v1073_v62, 8.507059e+37 }
 0x206   : > { %v1054_v54 = vmul.f32 1.442695, %v1048_v52  ;;  %v1056_v55 = vmul.f32 1.442695, %v1049_v53  ;;  %v5807_v53 = vmov 32.0  }
 0x208   : > { %5402 = vpow2.f32 %v1054_v54 }
 0x209   : > { %v5401_v56 = vpop.eup %5400  ;;  %5404 = vpow2.f32 %v1056_v55 }
 0x20a   : > { %v1065_v57 = vmul.f32 %v5401_v56, %v1060_v48  ;;  %vm1070_vm4 = vweird.f32 %v5401_v56 }
 0x20b   : > { %vm1071_vm6 = vmor %vm1069_vm5, %vm1070_vm4 }
 0x20c   : > { %v1066_v58 = vsub.f32 1.0, %v1065_v57 }
 0x20e   : > { %v5403_v60 = vpop.eup %5402  ;;  %v1067_v61 = vmul.f32 %v5401_v56, %v1066_v58 }
 0x20f   : > { %v5405_v63 = vpop.eup %5404  ;;  %v1061_v0 = vsel %vm1039_vm2, %v5403_v60, 0.0 }
 0x210   : > { %v1062_v1 = vsel %vm1039_vm2, %v5405_v63, 0.0  ;;  %v1068_v2 = vadd.f32 %v5401_v56, %v1067_v61 }
 0x211   : > { %v1063_v3 = vadd.f32 %v1062_v1, %v1061_v0 }
 0x212   : > { %v1072_v5 = vsel %vm1071_vm6, %v5401_v56, %v1068_v2 }
 0x213   : > { %5406 = vrcp.f32 %v1063_v3  ;;  %v1077_v6 = vsel %vm1074_vm7, %v1076_v4, %v1072_v5  ;;  %v1089_v15 = vand.u32 2147483648, %v1063_v3  ;;  %v1087_v17 = vand.u32 2147483647, %v1063_v3 }
 0x214   : > { %v1092_v7 = vmul.f32 %v5397_v43, %v1077_v6  ;;  %v1093_v8 = vmul.f32 %v5399_v44, %v1077_v6  ;;  %vm1083_vm9 = vweird.f32 %v1063_v3  ;;  %v5393_v44 = vld [vmem:[%s892_s14] ss:$0 sm:$0xff]  ;;  %5408 = vrcp.f32 %v5807_v53 }
 0x215   : > { %v1090_v19 = vor.u32 1.1754944e-38, %v1089_v15  ;;  %vm1088_vm11 = vcmp.eq.f32.partialorder %v1087_v17, 8.507059e+37 }
 0x216   : > { %v1096_v9 = vpack.c.bf16 %v1093_v8, %v1092_v7 }
 0x218   : > { %5069 = vmatmul.msk.bf16.vlgmr.msra.gmra.mxu2 %vm1039_vm2, %v1096_v9 }
 0x219   : > { %v5407_v10 = vpop.eup %5406 }
 0x21a   : > { %v1079_v11 = vmul.f32 %v5407_v10, %v1063_v3  ;;  %vm1084_vm8 = vweird.f32 %v5407_v10  ;;  %v5409_v54 = vpop.eup %5408 }
 0x21b   : > { %vm1085_vm10 = vmor %vm1083_vm9, %vm1084_vm8  ;;  %v1193_v55 = vmul.f32 32.0, %v5409_v54  ;;  %vm1197_vm12 = vweird.f32 %v5409_v54 }
 0x21c   : > { %v1080_v13 = vsub.f32 1.0, %v1079_v11 }
 0x21d   : > { %v1194_v56 = vsub.f32 1.0, %v1193_v55 }
 0x21e   : > { %v1081_v16 = vmul.f32 %v5407_v10, %v1080_v13 }
 0x21f   : > { %v1195_v57 = vmul.f32 %v5409_v54, %v1194_v56 }
 0x220   : > { %v1082_v18 = vadd.f32 %v5407_v10, %v1081_v16 }
 0x221   : > { %v1196_v58 = vadd.f32 %v5409_v54, %v1195_v57 }
 0x222   : > { %v1086_v20 = vsel %vm1085_vm10, %v5407_v10, %v1082_v18 }
 0x223   : > { %v1091_v21 = vsel %vm1088_vm11, %v1090_v19, %v1086_v20  ;;  %v1198_v59 = vsel %vm1197_vm12, %v5409_v54, %v1196_v58  ;;  %v5394_v20 = vld [vmem:[%s895_s3] ss:$0 sm:$0xff] }
 0x224   : > { %v1094_v22 = vmul.f32 %v5403_v60, %v1091_v21  ;;  %v1095_v23 = vmul.f32 %v5405_v63, %v1091_v21 }
 0x226   : > { %v1097_v24 = vpack.c.bf16 %v1095_v23, %v1094_v22  ;;  %v5395_v23 = vld [vmem:[%s898_s26] ss:$0 sm:$0xff] }
 0x228   : > { %5070 = vmatmul.msk.bf16.gmra.mxu2 %vm1039_vm2, %v1097_v24  ;;  %vm1251_vm2 = vcmask 257024  }
 0x29b   : > { %v1118_v27 = vpop.f32.mrf.mxu2 }
 0x29c   : > { %v1134_v33 = vmul.f32 %v1129_v29, %v1118_v27 }
 0x29e   : > { %v1138_v38 = vsel %vm966_vm1, %v1134_v33, 0.0 }
 0x2a3   : > { %v1120_v28 = vpop.f32.mrf.mxu2 }
 0x2a4   : > { %v1135_v32 = vmul.f32 %v1131_v31, %v1120_v28 }
 0x2a6   : > { %v1139_v36 = vsel %vm966_vm1, %v1135_v32, 0.0 }
 0x2a7   : > { %v1140_v41 = vadd.f32 %v1139_v36, %v1138_v38 }
 0x2ab   : > { %v1123_v30 = vpop.f32.mrf.mxu2 }
 0x2ac   : > { %v1136_v34 = vmul.f32 %v1129_v29, %v1123_v30 }
 0x2ae   : > { %v1141_v39 = vsel %vm966_vm1, %v1136_v34, 0.0 }
 0x2b3   : > { %v1125_v35 = vpop.f32.mrf.mxu2 }
 0x2b4   : > { %v1137_v37 = vmul.f32 %v1131_v31, %v1125_v35 }
 0x2b6   : > { %v1142_v40 = vsel %vm966_vm1, %v1137_v37, 0.0 }
 0x2b7   : > { %v1143_v42 = vadd.f32 %v1142_v40, %v1141_v39 }
 0x2b9   : > { %v1144_v43 = vpack.c.bf16 %v1143_v42, %v1140_v41 }
 0x2bb   : > { %5079 = vmatmul.msk.bf16.vlgmr.msra.gmra.mxu3 %vm966_vm1, %v1144_v43 }
 0x33e   : > { %v1177_v45 = vpop.f32.mrf.mxu3 }
 0x33f   : > { %v1178_v46 = vadd.f32 %v5393_v44, %v1177_v45 }
 0x341   : > { %v1182_v47 = vadd.f32 %v1178_v46, %v6061_v12 }
 0x343   : > { %v1186_v48 = vsel %vm966_vm1, %v1182_v47, 0.0 }
 0x344   : > { %1187 = vadd.xlane.f32.xlu2 %v1186_v48 }
 0x346   : > { %v1179_v49 = vpop.f32.mrf.mxu3 }
 0x347   : > { %v1180_v50 = vadd.f32 %v5393_v44, %v1179_v49 }
 0x349   : > { %v1183_v51 = vadd.f32 %v1180_v50, %v6063_v14 }
 0x34b   : > { %v1189_v52 = vsel %vm966_vm1, %v1183_v51, 0.0 }
 0x34c   : > { %1190 = vadd.xlane.f32.xlu2 %v1189_v52 }
 0x3b7   : > { %v1188_v12 = vpop.xlane.xlu2 %1187 }
 0x3b8   : > { %v1199_v60 = vmul.f32 %v1198_v59, %v1188_v12 }
 0x3ba   : > { %v1201_v61 = vsub.f32 %v1182_v47, %v1199_v60 }
 0x3bc   : > { %v1203_v62 = vmul.f32 %v1201_v61, %v1201_v61 }
 0x3be   : > { %v1205_v63 = vsel %vm966_vm1, %v1203_v62, 0.0 }
 0x3bf   : > { %1206 = vadd.xlane.f32.xlu0 %v1205_v63  ;;  %v1191_v14 = vpop.xlane.xlu2 %1190 }
 0x3c0   : > { %v1200_v0 = vmul.f32 %v1198_v59, %v1191_v14 }
 0x3c2   : > { %v1202_v1 = vsub.f32 %v1183_v51, %v1200_v0 }
 0x3c4   : > { %v1204_v2 = vmul.f32 %v1202_v1, %v1202_v1 }
 0x3c6   : > { %v1208_v3 = vsel %vm966_vm1, %v1204_v2, 0.0 }
 0x3c7   : > { %1209 = vadd.xlane.f32.xlu1 %v1208_v3 }
 0x432   : > { %v1207_v4 = vpop.xlane.xlu0 %1206 }
 0x433   : > { %v1211_v5 = vmul.f32 %v1207_v4, %v1198_v59 }
 0x435   : > { %v1213_v6 = vadd.f32 1e-05, %v1211_v5 }
 0x437   : > { %5410 = vrsqrt.f32 %v1213_v6  ;;  %vm1221_vm14 = vweird.f32 %v1213_v6 }
 0x43a   : > { %v1210_v7 = vpop.xlane.xlu1 %1209 }
 0x43b   : > { %v1212_v8 = vmul.f32 %v1210_v7, %v1198_v59 }
 0x43d   : > { %v5411_v9 = vpop.eup %5410  ;;  %v1214_v10 = vadd.f32 1e-05, %v1212_v8 }
 0x43e   : > { %v1216_v11 = vmul.f32 %v5411_v9, %v1213_v6  ;;  %vm1222_vm13 = vweird.f32 %v5411_v9 }
 0x43f   : > { %5412 = vrsqrt.f32 %v1214_v10  ;;  %vm1223_vm15 = vmor %vm1221_vm14, %vm1222_vm13  ;;  %vm1231_vm3 = vweird.f32 %v1214_v10 }
 0x440   : > { %v1217_v13 = vmul.f32 %v5411_v9, %v1216_v11 }
 0x442   : > { %v1218_v15 = vmul.f32 0.5, %v1217_v13 }
 0x444   : > { %v1219_v16 = vsub.f32 1.5, %v1218_v15 }
 0x445   : > { %v5413_v17 = vpop.eup %5412 }
 0x446   : > { %v1220_v18 = vmul.f32 %v5411_v9, %v1219_v16  ;;  %v1226_v19 = vmul.f32 %v5413_v17, %v1214_v10  ;;  %vm1232_vm0 = vweird.f32 %v5413_v17 }
 0x447   : > { %vm1233_vm4 = vmor %vm1231_vm3, %vm1232_vm0 }
 0x448   : > { %v1224_v21 = vsel %vm1223_vm15, %v5411_v9, %v1220_v18  ;;  %v1227_v22 = vmul.f32 %v5413_v17, %v1226_v19 }
 0x449   : > { %v1235_v24 = vmul.f32 %v1224_v21, %v1201_v61 }
 0x44a   : > { %v1228_v25 = vmul.f32 0.5, %v1227_v22 }
 0x44b   : > { %v1240_v26 = vmul.f32 %v5394_v20, %v1235_v24 }
 0x44c   : > { %v1229_v27 = vsub.f32 1.5, %v1228_v25 }
 0x44d   : > { %v1245_v28 = vadd.f32 %v5395_v23, %v1240_v26 }
 0x44e   : > { %v1230_v29 = vmul.f32 %v5413_v17, %v1229_v27 }
 0x44f   : > { %1247 = vst.msk [vmem:[#allocation3] sm:$0xff] %vm966_vm1, %v1245_v28  ;;  %v1249_v30 = vpack.c.bf16 %v1245_v28, %v1245_v28 }
 0x450   : > { %v1234_v31 = vsel %vm1233_vm4, %v5413_v17, %v1230_v29 }
 0x451   : > { %1252 = vst.msk [vmem:[#allocation4] sm:$0xf] %vm1251_vm2, %v1249_v30  ;;  %v1236_v32 = vmul.f32 %v1234_v31, %v1202_v1 }
 0x453   : > { %v1241_v33 = vmul.f32 %v5394_v20, %v1236_v32 }
 0x455   : > { %v1246_v34 = vadd.f32 %v5395_v23, %v1241_v33 }
 0x457   : > { %1248 = vst.msk [vmem:[#allocation3 + $0x8] sm:$0xff] %vm966_vm1, %v1246_v34  ;;  %v1250_v35 = vpack.c.bf16 %v1246_v34, %v1246_v34 }
 0x459   : > { %1253 = vst.msk [vmem:[#allocation4 + $0x4] sm:$0xf] %vm1251_vm2, %v1250_v35 }
 0x45a PF: > { %v5102_v36 = vld [vmem:[%s6050_s4 + $0x20] sm:$0xf]  ;;  %v5285_v37 = vld [vmem:[%s6050_s4 + $0x2c] sm:$0xf0]  ;;  %v5283_v38 = vld [vmem:[%s6050_s4 + $0x24] sm:$0xf] }
 0x45b   : > { %v5103_v39 = vor.u32 %v5285_v37, %v5102_v36  ;;  %v5104_v40 = vld [vmem:[%s6050_s4 + $0x30] sm:$0xf0]  ;;  %v5110_v41 = vld [vmem:[%s6050_s4 + $0x28] sm:$0xf]  ;;  %v5286_v42 = vld [vmem:[%s6050_s4 + $0x34] sm:$0xf0] }
 0x45c   : > { %v5107_v43 = vor.u32 %v5283_v38, %v5104_v40  ;;  %v5111_v44 = vor.u32 %v5286_v42, %v5110_v41  ;;  %v5284_v45 = vld [vmem:[%s6050_s4 + $0x2c] sm:$0xf]  ;;  %v5112_v46 = vld [vmem:[%s6050_s4 + $0x38] sm:$0xf0]  ;;  %v5086_v47 = vld [vmem:[%s6050_s4] sm:$0xf] }
 0x45d   : > { %1335 = vmatpush.bf16.msra.mxu0 %v5103_v39  ;;  %v5115_v48 = vor.u32 %v5284_v45, %v5112_v46  ;;  %v5281_v49 = vld [vmem:[%s6050_s4 + $0xc] sm:$0xf0]  ;;  %v5279_v50 = vld [vmem:[%s6050_s4 + $0x4] sm:$0xf]  ;;  %v5088_v51 = vld [vmem:[%s6050_s4 + $0x10] sm:$0xf0] }
 0x45e   : > { %1349 = vmatpush.bf16.msra.mxu1 %v5107_v43  ;;  %1363 = vmatpush.bf16.msra.mxu2 %v5111_v44  ;;  %v5087_v52 = vor.u32 %v5281_v49, %v5086_v47  ;;  %v5091_v53 = vor.u32 %v5279_v50, %v5088_v51  ;;  %v5094_v54 = vld [vmem:[%s6050_s4 + $0x8] sm:$0xf]  ;;  %v5282_v55 = vld [vmem:[%s6050_s4 + $0x14] sm:$0xf0]  ;;  %v5280_v56 = vld [vmem:[%s6050_s4 + $0xc] sm:$0xf] }
 0x45f   : > { %1377 = vmatpush.bf16.msra.mxu3 %v5115_v48  ;;  %v5095_v57 = vor.u32 %v5282_v55, %v5094_v54  ;;  %v5096_v58 = vld [vmem:[%s6050_s4 + $0x18] sm:$0xf0]  ;;  %v5294_v59 = vld [vmem:[%s6048_s2 + $0x38] sm:$0xff]  ;;  %vm1325_vm1 = vcmask 261120   ;;  %v5292_v2 = vld [vmem:[%s6048_s2 + $0x28] sm:$0xff]  ;;  %p1715_p3 = scmp.eq.s32.totalorder %s5787_s29, 3 }
 0x460   : > { %v5099_v12 = vor.u32 %v5280_v56, %v5096_v58  ;;  %v5278_v60 = vld [vmem:[#allocation4] sm:$0xff]  ;;  %v5302_v61 = vld [vmem:[%s6048_s2 + $0x78] sm:$0xff]  ;;  %v5293_v63 = vld [vmem:[%s6048_s2 + $0x30] sm:$0xff]  ;;  %p5248_p4 = scmp.ne.s32.totalorder %s5787_s29, 3 }
 0x461   : > { %1336 = vmatpush.bf16.msra.mxu0 %v5087_v52  ;;  %v5310_v62 = vld [vmem:[%s6048_s2 + $0xb8] sm:$0xff]  ;;  %v5301_v0 = vld [vmem:[%s6048_s2 + $0x70] sm:$0xff]  ;;  %v5300_v4 = vld [vmem:[%s6048_s2 + $0x68] sm:$0xff] }
 0x462   : > { %1350 = vmatpush.bf16.msra.mxu1 %v5091_v53  ;;  %1364 = vmatpush.bf16.msra.mxu2 %v5095_v57  ;;  %v5318_v14 = vld [vmem:[%s6048_s2 + $0xf8] sm:$0xff]  ;;  %v5309_v1 = vld [vmem:[%s6048_s2 + $0xb0] sm:$0xff]  ;;  %v5308_v5 = vld [vmem:[%s6048_s2 + $0xa8] sm:$0xff] }
 0x463   : > { %1378 = vmatpush.bf16.msra.mxu3 %v5099_v12  ;;  %v5317_v3 = vld [vmem:[%s6048_s2 + $0xf0] sm:$0xff]  ;;  %v5291_v6 = vld [vmem:[%s6048_s2 + $0x20] sm:$0xff]  ;;  %v5316_v7 = vld [vmem:[%s6048_s2 + $0xe8] sm:$0xff] }
 0x464   : > { %5116 = vmatmul.msk.bf16.vlgmr.msra.gmra.mxu0 %vm1325_vm1, %v5278_v60  ;;  %v5299_v8 = vld [vmem:[%s6048_s2 + $0x60] sm:$0xff]  ;;  %v5290_v9 = vld [vmem:[%s6048_s2 + $0x18] sm:$0xff]  ;;  %v5289_v15 = vld [vmem:[%s6048_s2 + $0x10] sm:$0xff] }
 0x465   : > { %1655 = vmatpush.bf16.msrb.mxu0 %v5294_v59  ;;  %5117 = vmatmul.msk.bf16.vlgmr.msra.gmra.mxu1 %vm1325_vm1, %v5278_v60  ;;  %v5298_v10 = vld [vmem:[%s6048_s2 + $0x58] sm:$0xff]  ;;  %v5307_v11 = vld [vmem:[%s6048_s2 + $0xa0] sm:$0xff]  ;;  %v5297_v16 = vld [vmem:[%s6048_s2 + $0x50] sm:$0xff] }
 0x466   : > { %1669 = vmatpush.bf16.msrb.mxu1 %v5302_v61  ;;  %5118 = vmatmul.msk.bf16.vlgmr.msra.gmra.mxu2 %vm1325_vm1, %v5278_v60  ;;  %v5315_v13 = vld [vmem:[%s6048_s2 + $0xe0] sm:$0xff]  ;;  %v5306_v17 = vld [vmem:[%s6048_s2 + $0x98] sm:$0xff]  ;;  %v5288_v19 = vld [vmem:[%s6048_s2 + $0x8] sm:$0xff] }
 0x467   : > { %5119 = vmatmul.msk.bf16.vlgmr.msra.gmra.mxu3 %vm1325_vm1, %v5278_v60  ;;  %1683 = vmatpush.bf16.msrb.mxu2 %v5310_v62  ;;  %v5314_v18 = vld [vmem:[%s6048_s2 + $0xd8] sm:$0xff]  ;;  %v5296_v20 = vld [vmem:[%s6048_s2 + $0x48] sm:$0xff]  ;;  %v5305_v21 = vld [vmem:[%s6048_s2 + $0x90] sm:$0xff] }
 0x468   : > { %1697 = vmatpush.bf16.msrb.mxu3 %v5318_v14  ;;  %v5313_v22 = vld [vmem:[%s6048_s2 + $0xd0] sm:$0xff]  ;;  %v5287_v23 = vld [vmem:[%s6048_s2] sm:$0xff]  ;;  %v5304_v25 = vld [vmem:[%s6048_s2 + $0x88] sm:$0xff] }
 0x469   : > { %1656 = vmatpush.bf16.msrb.mxu0 %v5293_v63  ;;  %v5295_v24 = vld [vmem:[%s6048_s2 + $0x40] sm:$0xff]  ;;  %v5312_v26 = vld [vmem:[%s6048_s2 + $0xc8] sm:$0xff] }
 0x46a   : > { %1670 = vmatpush.bf16.msrb.mxu1 %v5301_v0  ;;  %v5303_v27 = vld [vmem:[%s6048_s2 + $0x80] sm:$0xff] }
 0x46b   : > { %1684 = vmatpush.bf16.msrb.mxu2 %v5309_v1  ;;  %v5311_v28 = vld [vmem:[%s6048_s2 + $0xc0] sm:$0xff] }
 0x46c   : > { %1698 = vmatpush.bf16.msrb.mxu3 %v5317_v3  ;;  %v1270_v29 = vld [vmem:[%s6027_s7] sm:$0xf] }
 0x46d   : > { %1657 = vmatpush.bf16.msrb.mxu0 %v5292_v2  ;;  %v1272_v31 = vperm.slane %v1270_v29, 0  ;;  %v1273_v33 = vperm.slane %v1270_v29, 1  ;;  %v1274_v43 = vperm.slane %v1270_v29, 2  ;;  %v1275_v45 = vperm.slane %v1270_v29, 3  ;;  %v1393_v2 = vld [vmem:[#allocation5] sm:$0xff] }
 0x46e   : > { %1671 = vmatpush.bf16.msrb.mxu1 %v5300_v4 }
 0x46f   : > { %1685 = vmatpush.bf16.msrb.mxu2 %v5308_v5 }
 0x470   : > { %1699 = vmatpush.bf16.msrb.mxu3 %v5316_v7 }
 0x471   : > { %1658 = vmatpush.bf16.msrb.mxu0 %v5291_v6 }
 0x472   : > { %1672 = vmatpush.bf16.msrb.mxu1 %v5299_v8 }
 0x473   : > { %1686 = vmatpush.bf16.msrb.mxu2 %v5307_v11 }
 0x474   : > { %1700 = vmatpush.bf16.msrb.mxu3 %v5315_v13 }
 0x475   : > { %1659 = vmatpush.bf16.msrb.mxu0 %v5290_v9 }
 0x476   : > { %1673 = vmatpush.bf16.msrb.mxu1 %v5298_v10  ;;  %v1394_v10 = vld [vmem:[#allocation5 + $0x8] sm:$0xff] }
 0x477   : > { %1687 = vmatpush.bf16.msrb.mxu2 %v5306_v17 }
 0x478   : > { %1701 = vmatpush.bf16.msrb.mxu3 %v5314_v18 }
 0x479   : > { %1660 = vmatpush.bf16.msrb.mxu0 %v5289_v15 }
 0x47a   : > { %1674 = vmatpush.bf16.msrb.mxu1 %v5297_v16 }
 0x47b   : > { %1688 = vmatpush.bf16.msrb.mxu2 %v5305_v21 }
 0x47c   : > { %1702 = vmatpush.bf16.msrb.mxu3 %v5313_v22 }
 0x47d   : > { %1661 = vmatpush.bf16.msrb.mxu0 %v5288_v19 }
 0x47e   : > { %1675 = vmatpush.bf16.msrb.mxu1 %v5296_v20 }
 0x47f   : > { %1689 = vmatpush.bf16.msrb.mxu2 %v5304_v25 }
 0x480   : > { %1703 = vmatpush.bf16.msrb.mxu3 %v5312_v26 }
 0x481   : > { %1662 = vmatpush.bf16.msrb.mxu0 %v5287_v23 }
 0x482   : > { %1676 = vmatpush.bf16.msrb.mxu1 %v5295_v24 }
 0x483   : > { %1690 = vmatpush.bf16.msrb.mxu2 %v5303_v27 }
 0x484   : > { %1704 = vmatpush.bf16.msrb.mxu3 %v5311_v28 }
 0x4e1   : > { %v1338_v30 = vpop.f32.mrf.mxu0 }
 0x4e2   : > { %v1352_v32 = vpop.f32.mrf.mxu1  ;;  %v1339_v34 = vadd.f32 %v1338_v30, %v1272_v31 }
 0x4e3   : > { %v1353_v35 = vadd.f32 %v1352_v32, %v1273_v33 }
 0x4e4   : > { %v1385_v39 = vmax.f32 %v1339_v34, 0.0 }
 0x4e5   : > { %v1386_v42 = vmax.f32 %v1353_v35, 0.0 }
 0x4e9   : > { %v1366_v36 = vpop.f32.mrf.mxu2  ;;  %v1340_v38 = vpop.f32.mrf.mxu0 }
 0x4ea   : > { %v1380_v37 = vpop.f32.mrf.mxu3  ;;  %v1341_v40 = vadd.f32 %v1340_v38, %v1272_v31  ;;  %v1354_v41 = vpop.f32.mrf.mxu1  ;;  %v1367_v49 = vadd.f32 %v1366_v36, %v1274_v43 }
 0x4eb   : > { %v1355_v44 = vadd.f32 %v1354_v41, %v1273_v33  ;;  %v1381_v51 = vadd.f32 %v1380_v37, %v1275_v45 }
 0x4ec   : > { %v1389_v46 = vmax.f32 %v1341_v40, 0.0  ;;  %v1387_v56 = vmax.f32 %v1367_v49, 0.0 }
 0x4ed   : > { %v1390_v47 = vmax.f32 %v1355_v44, 0.0  ;;  %v1388_v58 = vmax.f32 %v1381_v51, 0.0 }
 0x4ee   : > { %v1395_v48 = vpack.c.bf16 %v1389_v46, %v1385_v39 }
 0x4ef   : > { %v1396_v50 = vpack.c.bf16 %v1390_v47, %v1386_v42 }
 0x4f0   : > { %1663 = vmatmul.bf16.vlgmr.msrb.gmra.mxu0 %v1395_v48 }
 0x4f1   : > { %v1368_v52 = vpop.f32.mrf.mxu2  ;;  %1677 = vmatmul.bf16.vlgmr.msrb.gmra.mxu1 %v1396_v50 }
 0x4f2   : > { %v1369_v53 = vadd.f32 %v1368_v52, %v1274_v43  ;;  %v1382_v54 = vpop.f32.mrf.mxu3 }
 0x4f3   : > { %v1383_v55 = vadd.f32 %v1382_v54, %v1275_v45 }
 0x4f4   : > { %v1391_v57 = vmax.f32 %v1369_v53, 0.0 }
 0x4f5   : > { %v1392_v59 = vmax.f32 %v1383_v55, 0.0 }
 0x4f6   : > { %v1397_v12 = vpack.c.bf16 %v1391_v57, %v1387_v56 }
 0x4f7   : > { %v1398_v60 = vpack.c.bf16 %v1392_v59, %v1388_v58 }
 0x4f8   : > { %1691 = vmatmul.bf16.vlgmr.msrb.gmra.mxu2 %v1397_v12 }
 0x4f9   : > { %1705 = vmatmul.bf16.vlgmr.msrb.gmra.mxu3 %v1398_v60 }
 0x56d   : > { %v1664_v61 = vpop.f32.mrf.mxu0 }
 0x56e   : > { %v1678_v62 = vpop.f32.mrf.mxu1 }
 0x56f   : > { %v1679_v63 = vadd.f32 %v1678_v62, %v1664_v61 }
 0x575   : > { %v1666_v4 = vpop.f32.mrf.mxu0 }
 0x576   : > { %v1680_v5 = vpop.f32.mrf.mxu1 }
 0x577   : > { %v1681_v7 = vadd.f32 %v1680_v5, %v1666_v4 }
 0x57b   : > { %v1692_v14 = vpop.f32.mrf.mxu2 }
 0x57c   : > { %v1693_v0 = vadd.f32 %v1692_v14, %v1679_v63  ;;  %v1706_v1 = vpop.f32.mrf.mxu3 }
 0x57e   : > { %v1707_v3 = vadd.f32 %v1706_v1, %v1693_v0 }
 0x580   : > { %v1711_v6 = vadd.f32 %v1707_v3, %v1393_v2 }
 0x582   : > { %1713 = vst.msk [vmem:[#allocation5] sm:$0xff] %vm1325_vm1, %v1711_v6 }
 0x583   : > { %v1694_v8 = vpop.f32.mrf.mxu2 }
 0x584   : > { %v1695_v9 = vadd.f32 %v1694_v8, %v1681_v7  ;;  %v1708_v11 = vpop.f32.mrf.mxu3 }
 0x586   : > { %v1709_v13 = vadd.f32 %v1708_v11, %v1695_v9  ;;  %1718 = sbr.rel (%p5248_p4) target bundleno = 1699 (0x6a3), region = 143 }
 0x588   : > { %v1712_v15 = vadd.f32 %v1709_v13, %v1394_v10 }
 0x58a   : > { %1714 = vst.msk [vmem:[#allocation5 + $0x8] sm:$0xff] %vm1325_vm1, %v1712_v15 }
 0x58b   : > { %v1719_v16 = vld [vmem:[#allocation3] sm:$0xff]  ;;  %v1721_v17 = vld [vmem:[#allocation5] sm:$0xff]  ;;  %v1720_v19 = vld [vmem:[#allocation3 + $0x8] sm:$0xff]  ;;  %v5808_v24 = vmov 32.0  }
 0x58c   : > { %v1723_v18 = vadd.f32 %v1721_v17, %v1719_v16  ;;  %5416 = vrcp.f32 %v5808_v24  ;;  %v5414_v55 = vld [vmem:[%s924_s17] ss:$0 sm:$0xff] }
 0x58d   : > { %v5415_v58 = vld [vmem:[%s927_s20] ss:$0 sm:$0xff] }
 0x58e   : > { %v1727_v21 = vsel %vm1325_vm1, %v1723_v18, 0.0 }
 0x58f   : > { %1728 = vadd.xlane.f32.xlu0 %v1727_v21 }
 0x591   : > { %v1722_v20 = vld [vmem:[#allocation5 + $0x8] sm:$0xff] }
 0x592   : > { %v1724_v22 = vadd.f32 %v1722_v20, %v1720_v19  ;;  %v5417_v25 = vpop.eup %5416 }
 0x593   : > { %v1734_v26 = vmul.f32 32.0, %v5417_v25  ;;  %vm1738_vm5 = vweird.f32 %v5417_v25 }
 0x594   : > { %v1730_v23 = vsel %vm1325_vm1, %v1724_v22, 0.0 }
 0x595   : > { %v1735_v27 = vsub.f32 1.0, %v1734_v26 }
 0x597   : > { %1731 = vadd.xlane.f32.xlu0 %v1730_v23  ;;  %v1736_v28 = vmul.f32 %v5417_v25, %v1735_v27 }
 0x599   : > { %v1737_v29 = vadd.f32 %v5417_v25, %v1736_v28 }
 0x59b   : > { %v1739_v30 = vsel %vm1738_vm5, %v5417_v25, %v1737_v29 }
 0x602   : > { %v1729_v31 = vpop.xlane.xlu0 %1728 }
 0x603   : > { %v1740_v32 = vmul.f32 %v1739_v30, %v1729_v31 }
 0x605   : > { %v1742_v33 = vsub.f32 %v1723_v18, %v1740_v32 }
 0x607   : > { %v1744_v34 = vmul.f32 %v1742_v33, %v1742_v33 }
 0x609   : > { %v1746_v35 = vsel %vm1325_vm1, %v1744_v34, 0.0 }
 0x60a   : > { %1747 = vadd.xlane.f32.xlu1 %v1746_v35  ;;  %v1732_v36 = vpop.xlane.xlu0 %1731 }
 0x60b   : > { %v1741_v37 = vmul.f32 %v1739_v30, %v1732_v36 }
 0x60d   : > { %v1743_v38 = vsub.f32 %v1724_v22, %v1741_v37 }
 0x60f   : > { %v1745_v39 = vmul.f32 %v1743_v38, %v1743_v38 }
 0x611   : > { %v1749_v40 = vsel %vm1325_vm1, %v1745_v39, 0.0 }
 0x612   : > { %1750 = vadd.xlane.f32.xlu1 %v1749_v40 }
 0x67d   : > { %v1748_v41 = vpop.xlane.xlu1 %1747 }
 0x67e   : > { %v1752_v42 = vmul.f32 %v1748_v41, %v1739_v30 }
 0x680   : > { %v1754_v43 = vadd.f32 1e-05, %v1752_v42 }
 0x682   : > { %5418 = vrsqrt.f32 %v1754_v43  ;;  %vm1762_vm7 = vweird.f32 %v1754_v43 }
 0x685   : > { %v1751_v44 = vpop.xlane.xlu1 %1750 }
 0x686   : > { %v1753_v45 = vmul.f32 %v1751_v44, %v1739_v30 }
 0x688   : > { %v5419_v46 = vpop.eup %5418  ;;  %v1755_v47 = vadd.f32 1e-05, %v1753_v45 }
 0x689   : > { %v1757_v48 = vmul.f32 %v5419_v46, %v1754_v43  ;;  %vm1763_vm6 = vweird.f32 %v5419_v46 }
 0x68a   : > { %5420 = vrsqrt.f32 %v1755_v47  ;;  %vm1764_vm8 = vmor %vm1762_vm7, %vm1763_vm6  ;;  %vm1772_vm10 = vweird.f32 %v1755_v47 }
 0x68b   : > { %v1758_v49 = vmul.f32 %v5419_v46, %v1757_v48 }
 0x68d   : > { %v1759_v50 = vmul.f32 0.5, %v1758_v49 }
 0x68f   : > { %v1760_v51 = vsub.f32 1.5, %v1759_v50 }
 0x690   : > { %v5421_v52 = vpop.eup %5420 }
 0x691   : > { %v1761_v53 = vmul.f32 %v5419_v46, %v1760_v51  ;;  %v1767_v54 = vmul.f32 %v5421_v52, %v1755_v47  ;;  %vm1773_vm9 = vweird.f32 %v5421_v52 }
 0x692   : > { %vm1774_vm11 = vmor %vm1772_vm10, %vm1773_vm9 }
 0x693   : > { %v1765_v56 = vsel %vm1764_vm8, %v5419_v46, %v1761_v53  ;;  %v1768_v57 = vmul.f32 %v5421_v52, %v1767_v54 }
 0x694   : > { %v1776_v59 = vmul.f32 %v1765_v56, %v1742_v33 }
 0x695   : > { %v1769_v12 = vmul.f32 0.5, %v1768_v57 }
 0x696   : > { %v1781_v60 = vmul.f32 %v5414_v55, %v1776_v59 }
 0x697   : > { %v1770_v61 = vsub.f32 1.5, %v1769_v12 }
 0x698   : > { %v1786_v62 = vadd.f32 %v5415_v58, %v1781_v60 }
 0x699   : > { %v1771_v63 = vmul.f32 %v5421_v52, %v1770_v61 }
 0x69a   : > { %1788 = vst.msk [vmem:[#allocation2] sm:$0xff] %vm1325_vm1, %v1786_v62 }
 0x69b   : > { %v1775_v14 = vsel %vm1774_vm11, %v5421_v52, %v1771_v63 }
 0x69c   : > { %v1777_v0 = vmul.f32 %v1775_v14, %v1743_v38 }
 0x69e   : > { %v1782_v1 = vmul.f32 %v5414_v55, %v1777_v0 }
 0x6a0   : > { %v1787_v2 = vadd.f32 %v5415_v58, %v1782_v1 }
 0x6a2   : > { %1789 = vst.msk [vmem:[#allocation2 + $0x8] sm:$0xff] %vm1325_vm1, %v1787_v2 }
 0x6a3 PF: > { %p1790_p5 = scmp.eq.s32.totalorder %s5791_s30, 1 }
 0x6a5   : > { %p1791_p6 = pnand %p1790_p5, %p1715_p3 }
 0x6a6   : > { %s7702_s20 = sld [smem:[#allocation26_spill]] (!%p1791_p6) }
 0x6a7   : > { %1794 = sbr.rel (%p1791_p6) target bundleno = 6387 (0x18f3), region = 147  ;;  %s7703_s28 = sld [smem:[#allocation30_spill]] (!%p1791_p6) }
 0x6a8   : > { %s7704_s19 = sld [smem:[#allocation27_spill]] (!%p1791_p6) }
 0x6a9   : > { %s7705_s18 = sld [smem:[#allocation34_spill]] (!%p1791_p6) }
 0x6aa   : > { %s7706_s7 = sld [smem:[#allocation31_spill]] (!%p1791_p6) }
 0x6ab   : > { %s7707_s17 = sld [smem:[#allocation32_spill]] (!%p1791_p6) }
 0x6ac   : > { %v5320_v3 = vld [vmem:[%s7702_s20 + $0x8] sm:$0xff]  ;;  %v1837_v4 = vlaneseq  ;;  %v5319_v6 = vld [vmem:[%s7702_s20] sm:$0xff]  ;;  %v5809_v28 = vmov -10000.0   ;;  %vm1865_vm13 = vcmask 64512   ;;  %v5810_v45 = vmov 0  }
 0x6ad   : > { %v1835_v5 = vld [vmem:[%s7703_s28] sm:$0xff]  ;;  %1827 = vmatpush.bf16.msra.mxu0 %v5320_v3  ;;  %v1796_v8 = vld [vmem:[#allocation2 + $0x8] sm:$0xff]  ;;  %vm1900_vm15 = vcmask 1041409   ;;  %vm2130_vm0 = vcmask 1042434   ;;  %vm2132_vm2 = vcmask 1043459   ;;  %vm2134_vm3 = vcmask 1044484  }
 0x6ae   : > { %v1795_v7 = vld [vmem:[#allocation2] sm:$0xff]  ;;  %v6211_v9 = vshrl.u32 %v1837_v4, 7  ;;  %4778 = vmatpush.msra.mxu1 %v1835_v5  ;;  %v1912_v11 = vperm.slane %v1835_v5, 1  ;;  %v1926_v13 = vperm.slane %v1835_v5, 3  ;;  %v1947_v15 = vperm.slane %v1835_v5, 6  ;;  %s7708_s28 = sld [smem:[#allocation33_spill]] }
 0x6af   : > { %v1797_v10 = vpack.c.bf16 %v1796_v8, %v1795_v7  ;;  %v5449_v16 = vld [vmem:[%s7704_s19] ss:$0 sm:$0xff]  ;;  %v1919_v24 = vperm.slane %v1835_v5, 2  ;;  %v1940_v25 = vperm.slane %v1835_v5, 5  ;;  %v6228_v27 = vand.u32 127, %v1837_v4 }
 0x6b0   : > { %5424 = vset.pattern.permute.xlu2 %v6211_v9  ;;  %5422 = vset.pattern.permute.xlu0 %v6211_v9  ;;  %v1905_v41 = vperm.slane %v1835_v5, 0  ;;  %v1933_v42 = vperm.slane %v1835_v5, 4  ;;  %v6237_v43 = vperm.slane %v1835_v5, 7  ;;  %v6242_v44 = vld [vmem:[%s7705_s18] sm:$0x3]  ;;  %vm2136_vm4 = vcmask 1045509  }
 0x6b1   : > { %5423 = vset.pattern.permute.xlu1 %v6211_v9  ;;  %1828 = vmatpush.bf16.msra.mxu0 %v5319_v6  ;;  %vm1839_vm12 = vcmp.eq.s32.totalorder %v6228_v27, 6  ;;  %vm1890_vm14 = vcmp.eq.s32.totalorder %v6242_v44, 1  ;;  %vm2140_vm5 = vcmask 1047559   ;;  %vm2347_vm6 = vcmp.eq.s32.totalorder %v6242_v44, 2 }
 0x6b2   : > { %v6231_v29 = vsel %vm1839_vm12, 0.0, %v5809_v28  ;;  %v1891_v46 = vsel %vm1890_vm14, 1, %v5810_v45 }
 0x6b3   : > { %v1843_v30 = vperm.slane %v6231_v29, 0  ;;  %v1842_v32 = vrot.slane %v6231_v29, 1 }
 0x6b4   : > { %5257 = vmatmul.msk.bf16.vlgmr.msra.gmra.mxu0 %vm1325_vm1, %v1797_v10  ;;  %vm2138_vm1 = vcmask 1046534  }
 0x6b5   : > { %v1847_v31 = vadd.f32 %v1843_v30, %v1835_v5  ;;  %v1844_v35 = vperm.slane %v1842_v32, 0 }
 0x6b7   : > { %v1848_v37 = vadd.f32 %v1844_v35, %v1835_v5 }
 0x6b8   : > { %1917 = vperm.xlu2 %5424, %v1912_v11  }
 0x6c0   : > { %1931 = vperm.xlu2 %5424, %v1926_v13  }
 0x6c8   : > { %1952 = vperm.xlu2 %5424, %v1947_v15  }
 0x712   : > { %v6252_v57 = vpop.permute.xlu2 %1917 }
 0x71a   : > { %v6254_v58 = vpop.permute.xlu2 %1931 }
 0x722   : > { %v6256_v59 = vpop.permute.xlu2 %1952 }
 0x731   : > { %v1830_v17 = vpop.f32.mrf.mxu0 }
 0x732   : > { %v6220_v18 = vadd.f32 %v5449_v16, %v1830_v17 }
 0x734   : > { %v1849_v19 = vperm.slane %v6220_v18, 0  ;;  %v1985_v26 = vperm.slane %v6220_v18, 1 }
 0x736   : > { %1854 = vperm.xlu0 %5422, %v1849_v19  }
 0x739   : > { %v1832_v20 = vpop.f32.mrf.mxu0 }
 0x73a   : > { %v6223_v21 = vadd.f32 %v5449_v16, %v1832_v20 }
 0x73c   : > { %v1992_v22 = vperm.slane %v6223_v21, 1  ;;  %v1856_v23 = vperm.slane %v6223_v21, 0 }
 0x73e   : > { %1997 = vperm.xlu2 %5424, %v1992_v22   ;;  %1861 = vperm.xlu0 %5422, %v1856_v23  }
 0x746   : > { %1924 = vperm.xlu0 %5422, %v1919_v24   ;;  %5427 = vset.pattern.permute.xlu2 %v5810_v45 }
 0x74e   : > { %1945 = vperm.xlu0 %5422, %v1940_v25  }
 0x756   : > { %1990 = vperm.xlu0 %5422, %v1985_v26  }
 0x75e   : > { %5425 = vset.pattern.permute.xlu0 %v5810_v45 }
 0x75f   : > { %1893 = vperm.xlu0 %5425, %v1891_v46  }
 0x798   : > { %v6260_v60 = vpop.permute.xlu2 %1997 }
 0x7a8   : > { %v1855_v33 = vpop.permute.xlu0 %1854 }
 0x7a9   : > { %v1863_v34 = vadd.f32 %v1855_v33, %v1847_v31 }
 0x7ab   : > { %v1866_v36 = vsel %vm1865_vm13, %v1863_v34, -inf }
 0x7ac   : > { %1867 = vmax.xlane.f32.xlu1 %v1866_v36 }
 0x7b0   : > { %v1862_v38 = vpop.permute.xlu0 %1861 }
 0x7b1   : > { %v1864_v39 = vadd.f32 %v1862_v38, %v1848_v37 }
 0x7b3   : > { %v1869_v40 = vsel %vm1865_vm13, %v1864_v39, -inf }
 0x7b4   : > { %1870 = vmax.xlane.f32.xlu1 %v1869_v40 }
 0x7b8   : > { %v6258_v12 = vpop.permute.xlu0 %1924 }
 0x7c0   : > { %v6262_v61 = vpop.permute.xlu0 %1945 }
 0x7c8   : > { %v1991_v0 = vpop.permute.xlu0 %1990 }
 0x7c9   : > { %v2003_v4 = vperm.slane %v1991_v0, 2  ;;  %v2002_v5 = vperm.slane %v1991_v0, 1  ;;  %v2001_v10 = vperm.slane %v1991_v0, 0  ;;  %v2005_v28 = vperm.slane %v1991_v0, 4 }
 0x7ca   : > { %v2007_v30 = vperm.slane %v1991_v0, 6  ;;  %v2004_v31 = vperm.slane %v1991_v0, 3  ;;  %v2008_v40 = vperm.slane %v1991_v0, 7 }
 0x7cd   : > { %1910 = vperm.xlu1 %5423, %v1905_v41   ;;  %v2010_v41 = vperm.slane %v6260_v60, 1 }
 0x7d5   : > { %1938 = vperm.xlu1 %5423, %v1933_v42   ;;  %v2006_v42 = vperm.slane %v1991_v0, 5 }
 0x7dd   : > { %1959 = vperm.xlu1 %5423, %v6237_v43  }
 0x7e5   : > { %5426 = vset.pattern.permute.xlu1 %v5810_v45 }
 0x81f   : > { %v1868_v47 = vpop.xlane.xlu1 %1867 }
 0x820   : > { %v1872_v48 = vsub.f32 %v1863_v34, %v1868_v47 }
 0x822   : > { %v1874_v49 = vmul.f32 1.442695, %v1872_v48 }
 0x824   : > { %5450 = vpow2.f32 %v1874_v49 }
 0x827   : > { %v1871_v50 = vpop.xlane.xlu1 %1870 }
 0x828   : > { %v1873_v51 = vsub.f32 %v1864_v39, %v1871_v50 }
 0x82a   : > { %v5451_v52 = vpop.eup %5450  ;;  %v1876_v53 = vmul.f32 1.442695, %v1873_v51 }
 0x82b   : > { %v1878_v54 = vsel %vm1865_vm13, %v5451_v52, 0.0  ;;  %v2011_v52 = vperm.slane %v6260_v60, 2 }
 0x82c   : > { %5452 = vpow2.f32 %v1876_v53  ;;  %1879 = vadd.xlane.f32.xlu2 %v1878_v54  ;;  %v2013_v53 = vperm.slane %v6260_v60, 4  ;;  %v2009_v54 = vperm.slane %v6260_v60, 0 }
 0x832   : > { %v5453_v55 = vpop.eup %5452 }
 0x833   : > { %v1881_v56 = vsel %vm1865_vm13, %v5453_v55, 0.0 }
 0x834   : > { %1882 = vadd.xlane.f32.xlu2 %v1881_v56 }
 0x83f   : > { %v6264_v63 = vpop.permute.xlu1 %1910 }
 0x847   : > { %v6269_v11 = vpop.permute.xlu1 %1938 }
 0x84f   : > { %v6292_v35 = vpop.permute.xlu1 %1959 }
 0x89f   : > { %v1880_v62 = vpop.xlane.xlu2 %1879 }
 0x8a0   : > { %5454 = vlog2.f32 %v1880_v62 }
 0x8a6   : > { %v5455_v14 = vpop.eup %5454 }
 0x8a7   : > { %v1885_v1 = vmul.f32 0.6931472, %v5455_v14  ;;  %v1883_v2 = vpop.xlane.xlu2 %1882 }
 0x8a8   : > { %5456 = vlog2.f32 %v1883_v2  ;;  %v2014_v2 = vperm.slane %v6260_v60, 5 }
 0x8a9   : > { %v1888_v3 = vadd.f32 %v1885_v1, %v1868_v47 }
 0x8ab   : > { %v1971_v6 = vadd.f32 %v6258_v12, %v1888_v3  ;;  %v1970_v7 = vadd.f32 %v6252_v57, %v1888_v3  ;;  %v1969_v8 = vadd.f32 %v6264_v63, %v1888_v3  ;;  %v1973_v22 = vadd.f32 %v6269_v11, %v1888_v3 }
 0x8ac   : > { %v1975_v23 = vadd.f32 %v6256_v59, %v1888_v3  ;;  %v1972_v24 = vadd.f32 %v6254_v58, %v1888_v3  ;;  %v1898_v25 = vperm.slane %v1888_v3, %v6228_v27  ;;  %v1976_v37 = vadd.f32 %v6292_v35, %v1888_v3 }
 0x8ad   : > { %v6271_v13 = vadd.f32 %v2003_v4, %v1971_v6  ;;  %v6273_v15 = vadd.f32 %v2002_v5, %v1970_v7  ;;  %v6275_v16 = vadd.f32 %v2001_v10, %v1969_v8  ;;  %v6288_v33 = vadd.f32 %v2005_v28, %v1973_v22 }
 0x8ae   : > { %v5457_v17 = vpop.eup %5456  ;;  %v6290_v34 = vadd.f32 %v2007_v30, %v1975_v23  ;;  %v6294_v36 = vadd.f32 %v2004_v31, %v1972_v24  ;;  %v1974_v39 = vadd.f32 %v6262_v61, %v1888_v3  ;;  %v6303_v46 = vadd.f32 %v2008_v40, %v1976_v37 }
 0x8af   : > { %v1887_v19 = vmul.f32 0.6931472, %v5457_v17  ;;  %2072 = vperm.xlu2 %5427, %v6271_v13   ;;  %2069 = vperm.xlu0 %5425, %v6273_v15   ;;  %v2016_v3 = vperm.slane %v6260_v60, 7  ;;  %v2012_v4 = vperm.slane %v6260_v60, 3  ;;  %v2015_v10 = vperm.slane %v6260_v60, 6 }
 0x8b0   : > { %2066 = vperm.xlu1 %5426, %v6275_v16   ;;  %v6307_v48 = vadd.f32 %v2006_v42, %v1974_v39 }
 0x8b1   : > { %v1889_v20 = vadd.f32 %v1887_v19, %v1871_v50  ;;  %v6347_v19 = vpop.permute.xlu0 %1893 }
 0x8b2   : > { %vm1895_vm7 = vcmp.eq.s32.totalorder %v6347_v19, 1 }
 0x8b3   : > { %v1899_v26 = vperm.slane %v1889_v20, %v6228_v27  ;;  %v1978_v38 = vadd.f32 %v6252_v57, %v1889_v20  ;;  %v1979_v49 = vadd.f32 %v6258_v12, %v1889_v20  ;;  %v1981_v50 = vadd.f32 %v6269_v11, %v1889_v20 }
 0x8b4   : > { %v1977_v51 = vadd.f32 %v6264_v63, %v1889_v20  ;;  %v1982_v14 = vadd.f32 %v6262_v61, %v1889_v20  ;;  %v1984_v0 = vadd.f32 %v6292_v35, %v1889_v20  ;;  %v1980_v1 = vadd.f32 %v6254_v58, %v1889_v20 }
 0x8b5   : > { %v6286_v32 = vsel %vm1900_vm15, %v1899_v26, %v1898_v25  ;;  %v6305_v47 = vadd.f32 %v2010_v41, %v1978_v38  ;;  %v6318_v55 = vadd.f32 %v2011_v52, %v1979_v49  ;;  %v6320_v56 = vadd.f32 %v2013_v53, %v1981_v50 }
 0x8b6   : > { %v6322_v62 = vadd.f32 %v2009_v54, %v1977_v51  ;;  %v6333_v5 = vadd.f32 %v2014_v2, %v1982_v14  ;;  %v6335_v6 = vadd.f32 %v2016_v3, %v1984_v0  ;;  %v6337_v7 = vadd.f32 %v2012_v4, %v1980_v1 }
 0x8b7   : > { %2078 = vperm.xlu2 %5427, %v6288_v33   ;;  %2084 = vperm.xlu0 %5425, %v6290_v34   ;;  %v1983_v8 = vadd.f32 %v6256_v59, %v1889_v20 }
 0x8b8   : > { %2075 = vperm.xlu1 %5426, %v6294_v36  }
 0x8b9   : > { %v6344_v17 = vadd.f32 %v2015_v10, %v1983_v8 }
 0x8bf   : > { %2087 = vperm.xlu2 %5427, %v6303_v46   ;;  %2093 = vperm.xlu0 %5425, %v6305_v47  }
 0x8c0   : > { %2081 = vperm.xlu1 %5426, %v6307_v48  }
 0x8c7   : > { %2096 = vperm.xlu2 %5427, %v6318_v55   ;;  %2102 = vperm.xlu0 %5425, %v6320_v56  }
 0x8c8   : > { %2090 = vperm.xlu1 %5426, %v6322_v62  }
 0x8cf   : > { %2105 = vperm.xlu2 %5427, %v6333_v5   ;;  %2111 = vperm.xlu0 %5425, %v6335_v6  }
 0x8d0   : > { %2099 = vperm.xlu1 %5426, %v6337_v7  }
 0x8d8   : > { %2108 = vperm.xlu1 %5426, %v6344_v17  }
 0x909   : > { %v2073_v22 = vpop.permute.xlu2 %2072 }
 0x90a   : > { %v2115_v37 = vperm.slane %v2073_v22, %v6228_v27 }
 0x911   : > { %v2079_v25 = vpop.permute.xlu2 %2078 }
 0x912   : > { %v2117_v40 = vperm.slane %v2079_v25, %v6228_v27 }
 0x919   : > { %v2088_v41 = vpop.permute.xlu2 %2087 }
 0x91a   : > { %v2120_v52 = vperm.slane %v2088_v41, %v6228_v27 }
 0x921   : > { %v2070_v23 = vpop.permute.xlu0 %2069  ;;  %v2097_v3 = vpop.permute.xlu2 %2096 }
 0x922   : > { %v2067_v24 = vpop.permute.xlu1 %2066  ;;  %v2114_v28 = vperm.slane %v2070_v23, %v6228_v27 }
 0x923   : > { %v2113_v26 = vperm.slane %v2067_v24, %v6228_v27  ;;  %v2123_v24 = vperm.slane %v2097_v3, %v6228_v27 }
 0x925   : > { %v2129_v20 = vsel %vm1900_vm15, %v2114_v28, %v2113_v26 }
 0x926   : > { %v2131_v38 = vsel %vm2130_vm0, %v2115_v37, %v2129_v20 }
 0x929   : > { %v2085_v31 = vpop.permute.xlu0 %2084 }
 0x92a   : > { %v2076_v30 = vpop.permute.xlu1 %2075  ;;  %v2119_v50 = vperm.slane %v2085_v31, %v6228_v27 }
 0x92b   : > { %v2116_v60 = vperm.slane %v2076_v30, %v6228_v27  ;;  %v2106_v30 = vpop.permute.xlu2 %2105 }
 0x92c   : > { %v2126_v37 = vperm.slane %v2106_v30, %v6228_v27 }
 0x92d   : > { %v2133_v39 = vsel %vm2132_vm2, %v2116_v60, %v2131_v38 }
 0x92e   : > { %v2135_v51 = vsel %vm2134_vm3, %v2117_v40, %v2133_v39 }
 0x931   : > { %v2094_v53 = vpop.permute.xlu0 %2093 }
 0x932   : > { %v2082_v42 = vpop.permute.xlu1 %2081  ;;  %v2122_v10 = vperm.slane %v2094_v53, %v6228_v27 }
 0x933   : > { %v2118_v49 = vperm.slane %v2082_v42, %v6228_v27 }
 0x935   : > { %v2137_v54 = vsel %vm2136_vm4, %v2118_v49, %v2135_v51 }
 0x936   : > { %v2139_v14 = vsel %vm2138_vm1, %v2119_v50, %v2137_v54 }
 0x937   : > { %v2141_v0 = vsel %vm2140_vm5, %v2120_v52, %v2139_v14 }
 0x938   : > { %v2151_v1 = vsel %vm1865_vm13, %v2141_v0, -inf }
 0x939   : > { %2152 = vmax.xlane.f32.xlu2 %v2151_v1  ;;  %v2103_v8 = vpop.permute.xlu0 %2102 }
 0x93a   : > { %v2091_v2 = vpop.permute.xlu1 %2090  ;;  %v2125_v31 = vperm.slane %v2103_v8, %v6228_v27 }
 0x93b   : > { %v2121_v4 = vperm.slane %v2091_v2, %v6228_v27 }
 0x93d   : > { %v2142_v22 = vsel %vm1900_vm15, %v2122_v10, %v2121_v4 }
 0x93e   : > { %v2143_v26 = vsel %vm2130_vm0, %v2123_v24, %v2142_v22 }
 0x941   : > { %v2112_v20 = vpop.permute.xlu0 %2111 }
 0x942   : > { %v2100_v23 = vpop.permute.xlu1 %2099  ;;  %v2128_v40 = vperm.slane %v2112_v20, %v6228_v27 }
 0x943   : > { %v2124_v25 = vperm.slane %v2100_v23, %v6228_v27 }
 0x945   : > { %v2144_v28 = vsel %vm2132_vm2, %v2124_v25, %v2143_v26 }
 0x946   : > { %v2145_v60 = vsel %vm2134_vm3, %v2125_v31, %v2144_v28 }
 0x947   : > { %v2146_v41 = vsel %vm2136_vm4, %v2126_v37, %v2145_v60 }
 0x94a   : > { %v2109_v38 = vpop.permute.xlu1 %2108 }
 0x94b   : > { %v2127_v39 = vperm.slane %v2109_v38, %v6228_v27 }
 0x94d   : > { %v2147_v42 = vsel %vm2138_vm1, %v2127_v39, %v2146_v41 }
 0x94e   : > { %v2148_v49 = vsel %vm2140_vm5, %v2128_v40, %v2147_v42 }
 0x94f   : > { %v2154_v50 = vsel %vm1865_vm13, %v2148_v49, -inf }
 0x950   : > { %2155 = vmax.xlane.f32.xlu1 %v2154_v50 }
 0x9ac   : > { %v6381_v51 = vpop.xlane.xlu2 %2152 }
 0x9ad   : > { %v2164_v52 = vperm.slane %v6381_v51, 5  ;;  %v2159_v53 = vperm.slane %v6381_v51, 0  ;;  %v2165_v54 = vperm.slane %v6381_v51, 6  ;;  %v2160_v2 = vperm.slane %v6381_v51, 1 }
 0x9ae   : > { %v2161_v23 = vperm.slane %v6381_v51, 2  ;;  %v2162_v26 = vperm.slane %v6381_v51, 3  ;;  %v2163_v39 = vperm.slane %v6381_v51, 4 }
 0x9af   : > { %v2196_v14 = vsub.f32 %v6307_v48, %v2164_v52  ;;  %v2191_v0 = vsub.f32 %v6275_v16, %v2159_v53  ;;  %v2197_v1 = vsub.f32 %v6290_v34, %v2165_v54  ;;  %v2192_v10 = vsub.f32 %v6273_v15, %v2160_v2 }
 0x9b0   : > { %v2193_v16 = vsub.f32 %v6271_v13, %v2161_v23  ;;  %v2194_v20 = vsub.f32 %v6294_v36, %v2162_v26 }
 0x9b1   : > { %v2217_v3 = vmul.f32 1.442695, %v2196_v14  ;;  %v2207_v4 = vmul.f32 1.442695, %v2191_v0  ;;  %v2219_v8 = vmul.f32 1.442695, %v2197_v1 }
 0x9b2   : > { %v2209_v22 = vmul.f32 1.442695, %v2192_v10  ;;  %v2211_v34 = vmul.f32 1.442695, %v2193_v16  ;;  %v2213_v42 = vmul.f32 1.442695, %v2194_v20 }
 0x9b3   : > { %5458 = vpow2.f32 %v2217_v3  ;;  %v2166_v14 = vperm.slane %v6381_v51, 7  ;;  %v2376_v20 = vperm.slane %v6220_v18, 2 }
 0x9b4   : > { %5460 = vpow2.f32 %v2207_v4 }
 0x9b5   : > { %5462 = vpow2.f32 %v2219_v8 }
 0x9b6   : > { %5464 = vpow2.f32 %v2209_v22 }
 0x9b7   : > { %5466 = vpow2.f32 %v2211_v34 }
 0x9b9   : > { %v5459_v24 = vpop.eup %5458 }
 0x9ba   : > { %v5461_v25 = vpop.eup %5460  ;;  %2271 = vperm.xlu2 %5427, %v5459_v24  }
 0x9bb   : > { %v5463_v48 = vpop.eup %5462  ;;  %2256 = vperm.xlu0 %5425, %v5461_v25  }
 0x9bc   : > { %2274 = vperm.xlu1 %5426, %v5463_v48   ;;  %v5465_v28 = vpop.eup %5464 }
 0x9bd   : > { %v5467_v49 = vpop.eup %5466 }
 0x9c3   : > { %2259 = vperm.xlu0 %5425, %v5465_v28   ;;  %v6394_v30 = vpop.xlane.xlu1 %2155 }
 0x9c4   : > { %v2170_v15 = vperm.slane %v6394_v30, 3  ;;  %v2169_v31 = vperm.slane %v6394_v30, 2  ;;  %v2173_v13 = vperm.slane %v6394_v30, 6  ;;  %v2172_v38 = vperm.slane %v6394_v30, 5 }
 0x9c5   : > { %v2168_v22 = vperm.slane %v6394_v30, 1  ;;  %v2171_v25 = vperm.slane %v6394_v30, 4  ;;  %v2174_v26 = vperm.slane %v6394_v30, 7 }
 0x9c6   : > { %v2202_v60 = vsub.f32 %v6337_v7, %v2170_v15  ;;  %v2201_v37 = vsub.f32 %v6318_v55, %v2169_v31  ;;  %v2205_v50 = vsub.f32 %v6344_v17, %v2173_v13  ;;  %v2204_v36 = vsub.f32 %v6333_v5, %v2172_v38 }
 0x9c7   : > { %v2195_v55 = vsub.f32 %v6288_v33, %v2163_v39  ;;  %v2198_v17 = vsub.f32 %v6303_v46, %v2166_v14  ;;  %v2167_v33 = vperm.slane %v6394_v30, 0  ;;  %v2200_v46 = vsub.f32 %v6305_v47, %v2168_v22 }
 0x9c8   : > { %v2229_v40 = vmul.f32 1.442695, %v2202_v60  ;;  %v2227_v41 = vmul.f32 1.442695, %v2201_v37  ;;  %v2235_v7 = vmul.f32 1.442695, %v2205_v50  ;;  %v2203_v16 = vsub.f32 %v6320_v56, %v2171_v25 }
 0x9c9   : > { %v2233_v52 = vmul.f32 1.442695, %v2204_v36  ;;  %v2215_v54 = vmul.f32 1.442695, %v2195_v55  ;;  %v2221_v2 = vmul.f32 1.442695, %v2198_v17  ;;  %v2199_v8 = vsub.f32 %v6322_v62, %v2167_v33 }
 0x9ca   : > { %5468 = vpow2.f32 %v2229_v40  ;;  %v2225_v24 = vmul.f32 1.442695, %v2200_v46  ;;  %v2231_v34 = vmul.f32 1.442695, %v2203_v16  ;;  %v2206_v28 = vsub.f32 %v6335_v6, %v2174_v26 }
 0x9cb   : > { %2262 = vperm.xlu0 %5425, %v5467_v49   ;;  %5470 = vpow2.f32 %v2227_v41  ;;  %v2223_v10 = vmul.f32 1.442695, %v2199_v8  ;;  %v2383_v56 = vperm.slane %v6223_v21, 2  ;;  %v2348_v22 = vsel %vm2347_vm6, 1, %v5810_v45 }
 0x9cc   : > { %5472 = vpow2.f32 %v2213_v42  ;;  %v2237_v15 = vmul.f32 1.442695, %v2206_v28 }
 0x9cd   : > { %5474 = vpow2.f32 %v2235_v7 }
 0x9ce   : > { %5476 = vpow2.f32 %v2233_v52 }
 0x9cf   : > { %5478 = vpow2.f32 %v2215_v54 }
 0x9d0   : > { %v5469_v53 = vpop.eup %5468  ;;  %5480 = vpow2.f32 %v2221_v2 }
 0x9d1   : > { %v5471_v0 = vpop.eup %5470  ;;  %2289 = vperm.xlu1 %5426, %v5469_v53   ;;  %5482 = vpow2.f32 %v2223_v10 }
 0x9d2   : > { %v5473_v1 = vpop.eup %5472  ;;  %2286 = vperm.xlu2 %5427, %v5471_v0   ;;  %5484 = vpow2.f32 %v2225_v24 }
 0x9d3   : > { %2265 = vperm.xlu0 %5425, %v5473_v1   ;;  %v5475_v5 = vpop.eup %5474  ;;  %5486 = vpow2.f32 %v2231_v34 }
 0x9d4   : > { %v5477_v3 = vpop.eup %5476  ;;  %5488 = vpow2.f32 %v2237_v15 }
 0x9d5   : > { %v5479_v4 = vpop.eup %5478 }
 0x9d6   : > { %v5481_v23 = vpop.eup %5480 }
 0x9d7   : > { %v5483_v48 = vpop.eup %5482 }
 0x9d8   : > { %v5485_v62 = vpop.eup %5484 }
 0x9d9   : > { %2298 = vperm.xlu1 %5426, %v5475_v5   ;;  %v5487_v31 = vpop.eup %5486 }
 0x9da   : > { %2295 = vperm.xlu2 %5427, %v5477_v3   ;;  %v5489_v47 = vpop.eup %5488 }
 0x9db   : > { %2268 = vperm.xlu0 %5425, %v5479_v4  }
 0x9e3   : > { %2277 = vperm.xlu0 %5425, %v5481_v23  }
 0x9eb   : > { %2280 = vperm.xlu0 %5425, %v5483_v48  }
 0x9f3   : > { %2283 = vperm.xlu0 %5425, %v5485_v62  }
 0x9fb   : > { %2292 = vperm.xlu0 %5425, %v5487_v31  }
 0xa03   : > { %2301 = vperm.xlu0 %5425, %v5489_v47  }
 0xa0b   : > { %5428 = vset.pattern.permute.xlu0 %v6211_v9 }
 0xa13   : > { %2381 = vperm.xlu0 %5428, %v2376_v20  }
 0xa14   : > { %v2272_v36 = vpop.permute.xlu2 %2271 }
 0xa15   : > { %v2308_v53 = vperm.slane %v2272_v36, %v6228_v27 }
 0xa1b   : > { %2388 = vperm.xlu0 %5428, %v2383_v56  }
 0xa23   : > { %5429 = vset.pattern.permute.xlu0 %v5810_v45 }
 0xa24   : > { %2350 = vperm.xlu0 %5429, %v2348_v22  }
 0xa2c   : > { %v2287_v4 = vpop.permute.xlu2 %2286 }
 0xa2d   : > { %v2257_v60 = vpop.permute.xlu0 %2256  ;;  %v2313_v25 = vperm.slane %v2287_v4, %v6228_v27 }
 0xa2e   : > { %v2303_v40 = vperm.slane %v2257_v60, %v6228_v27  ;;  %v2275_v54 = vpop.permute.xlu1 %2274 }
 0xa2f   : > { %v2309_v0 = vperm.slane %v2275_v54, %v6228_v27 }
 0xa34   : > { %v2296_v44 = vpop.permute.xlu2 %2295 }
 0xa35   : > { %v2260_v37 = vpop.permute.xlu0 %2259  ;;  %v2316_v15 = vperm.slane %v2296_v44, %v6228_v27 }
 0xa36   : > { %v2304_v38 = vperm.slane %v2260_v37, %v6228_v27 }
 0xa38   : > { %v2319_v49 = vsel %vm1900_vm15, %v2304_v38, %v2303_v40 }
 0xa3d   : > { %v2263_v13 = vpop.permute.xlu0 %2262 }
 0xa3e   : > { %v2305_v39 = vperm.slane %v2263_v13, %v6228_v27 }
 0xa40   : > { %v2320_v55 = vsel %vm2130_vm0, %v2305_v39, %v2319_v49 }
 0xa43   : > { %v2290_v23 = vpop.permute.xlu1 %2289 }
 0xa44   : > { %v2314_v34 = vperm.slane %v2290_v23, %v6228_v27 }
 0xa45   : > { %v2266_v6 = vpop.permute.xlu0 %2265 }
 0xa46   : > { %v2306_v41 = vperm.slane %v2266_v6, %v6228_v27 }
 0xa48   : > { %v2321_v7 = vsel %vm2132_vm2, %v2306_v41, %v2320_v55 }
 0xa4b   : > { %v2299_v31 = vpop.permute.xlu1 %2298 }
 0xa4c   : > { %v2317_v20 = vperm.slane %v2299_v31, %v6228_v27 }
 0xa4d   : > { %v2269_v42 = vpop.permute.xlu0 %2268 }
 0xa4e   : > { %v2307_v50 = vperm.slane %v2269_v42, %v6228_v27 }
 0xa50   : > { %v2322_v52 = vsel %vm2134_vm3, %v2307_v50, %v2321_v7 }
 0xa51   : > { %v2323_v14 = vsel %vm2136_vm4, %v2308_v53, %v2322_v52 }
 0xa52   : > { %v2324_v5 = vsel %vm2138_vm1, %v2309_v0, %v2323_v14 }
 0xa55   : > { %v2278_v1 = vpop.permute.xlu0 %2277 }
 0xa56   : > { %v2310_v17 = vperm.slane %v2278_v1, %v6228_v27 }
 0xa58   : > { %v2325_v2 = vsel %vm2140_vm5, %v2310_v17, %v2324_v5 }
 0xa59   : > { %v2335_v33 = vsel %vm1865_vm13, %v2325_v2, 0.0 }
 0xa5a   : > { %2336 = vadd.xlane.f32.xlu2 %v2335_v33 }
 0xa5d   : > { %v2281_v3 = vpop.permute.xlu0 %2280 }
 0xa5e   : > { %v2311_v46 = vperm.slane %v2281_v3, %v6228_v27 }
 0xa65   : > { %v2284_v8 = vpop.permute.xlu0 %2283 }
 0xa66   : > { %v2312_v10 = vperm.slane %v2284_v8, %v6228_v27 }
 0xa68   : > { %v2326_v24 = vsel %vm1900_vm15, %v2312_v10, %v2311_v46 }
 0xa69   : > { %v2327_v48 = vsel %vm2130_vm0, %v2313_v25, %v2326_v24 }
 0xa6a   : > { %v2328_v62 = vsel %vm2132_vm2, %v2314_v34, %v2327_v48 }
 0xa6d   : > { %v2293_v16 = vpop.permute.xlu0 %2292 }
 0xa6e   : > { %v2315_v26 = vperm.slane %v2293_v16, %v6228_v27 }
 0xa70   : > { %v2329_v28 = vsel %vm2134_vm3, %v2315_v26, %v2328_v62 }
 0xa71   : > { %v2330_v47 = vsel %vm2136_vm4, %v2316_v15, %v2329_v28 }
 0xa72   : > { %v2331_v37 = vsel %vm2138_vm1, %v2317_v20, %v2330_v47 }
 0xa75   : > { %v2302_v56 = vpop.permute.xlu0 %2301 }
 0xa76   : > { %v2318_v60 = vperm.slane %v2302_v56, %v6228_v27 }
 0xa78   : > { %v2332_v13 = vsel %vm2140_vm5, %v2318_v60, %v2331_v37  ;;  %v1903_v37 = vsel %vm1895_vm7, %v6286_v32, %v6231_v29 }
 0xa79   : > { %v2338_v6 = vsel %vm1865_vm13, %v2332_v13, 0.0 }
 0xa7a   : > { %2339 = vadd.xlane.f32.xlu1 %v2338_v6 }
 0xa85   : > { %v2382_v40 = vpop.permute.xlu0 %2381 }
 0xa86   : > { %v2394_v49 = vperm.slane %v2382_v40, 2  ;;  %v2393_v50 = vperm.slane %v2382_v40, 1  ;;  %v2392_v52 = vperm.slane %v2382_v40, 0  ;;  %v2398_v17 = vperm.slane %v2382_v40, 6 }
 0xa87   : > { %v2397_v5 = vperm.slane %v2382_v40, 5  ;;  %v2395_v2 = vperm.slane %v2382_v40, 3  ;;  %v2396_v10 = vperm.slane %v2382_v40, 4  ;;  %v2399_v25 = vperm.slane %v2382_v40, 7 }
 0xa8d   : > { %v2389_v23 = vpop.permute.xlu0 %2388 }
 0xa8e   : > { %v2402_v62 = vperm.slane %v2389_v23, 2  ;;  %v2401_v15 = vperm.slane %v2389_v23, 1  ;;  %v2400_v31 = vperm.slane %v2389_v23, 0  ;;  %v2404_v40 = vperm.slane %v2389_v23, 4 }
 0xa96   : > { %v2351_v26 = vpop.permute.xlu0 %2350 }
 0xa97   : > { %vm2352_vm8 = vcmp.eq.s32.totalorder %v2351_v26, 1 }
 0xacd   : > { %v2337_v38 = vpop.xlane.xlu2 %2336 }
 0xace   : > { %5490 = vlog2.f32 %v2337_v38 }
 0xad4   : > { %v5491_v39 = vpop.eup %5490 }
 0xad5   : > { %v2342_v41 = vmul.f32 0.6931472, %v5491_v39 }
 0xad7   : > { %v2345_v42 = vadd.f32 %v2342_v41, %v6381_v51  ;;  %v2403_v41 = vperm.slane %v2389_v23, 3 }
 0xad9   : > { %v2362_v36 = vadd.f32 %v2345_v42, %v6258_v12  ;;  %v2361_v55 = vadd.f32 %v2345_v42, %v6252_v57  ;;  %v2360_v7 = vadd.f32 %v2345_v42, %v6264_v63  ;;  %v2366_v51 = vadd.f32 %v2345_v42, %v6256_v59 }
 0xada   : > { %v2365_v0 = vadd.f32 %v2345_v42, %v6262_v61  ;;  %v2363_v1 = vadd.f32 %v2345_v42, %v6254_v58  ;;  %v2364_v8 = vadd.f32 %v2345_v42, %v6269_v11  ;;  %v2367_v24 = vadd.f32 %v2345_v42, %v6292_v35 }
 0xadb   : > { %v6459_v53 = vadd.f32 %v2394_v49, %v2362_v36  ;;  %v6461_v54 = vadd.f32 %v2393_v50, %v2361_v55  ;;  %v6463_v14 = vadd.f32 %v2392_v52, %v2360_v7  ;;  %v6471_v33 = vadd.f32 %v2398_v17, %v2366_v51 }
 0xadc   : > { %v6473_v3 = vadd.f32 %v2397_v5, %v2365_v0  ;;  %v6475_v4 = vadd.f32 %v2395_v2, %v2363_v1  ;;  %v6481_v22 = vadd.f32 %v2396_v10, %v2364_v8  ;;  %v6485_v16 = vadd.f32 %v2399_v25, %v2367_v24 }
 0xadd   : > { %2463 = vperm.xlu1 %5426, %v6459_v53   ;;  %2460 = vperm.xlu2 %5427, %v6461_v54   ;;  %v2355_v28 = vperm.slane %v2345_v42, %v6228_v27  ;;  %v2405_v42 = vperm.slane %v2389_v23, 5  ;;  %v2407_v52 = vperm.slane %v2389_v23, 7  ;;  %v2406_v51 = vperm.slane %v2389_v23, 6 }
 0xade   : > { %2457 = vperm.xlu0 %5429, %v6463_v14  }
 0xae5   : > { %2475 = vperm.xlu1 %5426, %v6471_v33   ;;  %2472 = vperm.xlu2 %5427, %v6473_v3  }
 0xae6   : > { %2466 = vperm.xlu0 %5429, %v6475_v4  }
 0xaed   : > { %v2340_v46 = vpop.xlane.xlu1 %2339 }
 0xaee   : > { %5492 = vlog2.f32 %v2340_v46  ;;  %2469 = vperm.xlu0 %5429, %v6481_v22  }
 0xaf4   : > { %v5493_v48 = vpop.eup %5492 }
 0xaf5   : > { %v2344_v34 = vmul.f32 0.6931472, %v5493_v48 }
 0xaf6   : > { %2478 = vperm.xlu0 %5429, %v6485_v16  }
 0xaf7   : > { %v2346_v44 = vadd.f32 %v2344_v34, %v6394_v30 }
 0xaf9   : > { %v2356_v47 = vperm.slane %v2346_v44, %v6228_v27  ;;  %v2370_v20 = vadd.f32 %v2346_v44, %v6258_v12  ;;  %v2369_v56 = vadd.f32 %v2346_v44, %v6252_v57  ;;  %v2368_v60 = vadd.f32 %v2346_v44, %v6264_v63 }
 0xafa   : > { %v2372_v39 = vadd.f32 %v2346_v44, %v6269_v11  ;;  %v2371_v29 = vadd.f32 %v2346_v44, %v6254_v58  ;;  %v2373_v32 = vadd.f32 %v2346_v44, %v6262_v61  ;;  %v2375_v55 = vadd.f32 %v2346_v44, %v6292_v35 }
 0xafb   : > { %v2357_v19 = vsel %vm1900_vm15, %v2356_v47, %v2355_v28  ;;  %v6498_v30 = vadd.f32 %v2402_v62, %v2370_v20  ;;  %v6500_v13 = vadd.f32 %v2401_v15, %v2369_v56  ;;  %v6502_v6 = vadd.f32 %v2400_v31, %v2368_v60 }
 0xafc   : > { %v6504_v38 = vsel %vm2352_vm8, %v2357_v19, %v1903_v37  ;;  %v6512_v49 = vadd.f32 %v2404_v40, %v2372_v39  ;;  %v6514_v50 = vadd.f32 %v2403_v41, %v2371_v29  ;;  %v6516_v36 = vadd.f32 %v2405_v42, %v2373_v32 }
 0xafd   : > { %2484 = vperm.xlu1 %5426, %v6500_v13   ;;  %2481 = vperm.xlu2 %5427, %v6502_v6   ;;  %v2374_v7 = vadd.f32 %v2346_v44, %v6256_v59  ;;  %v6523_v0 = vadd.f32 %v2407_v52, %v2375_v55 }
 0xafe   : > { %2487 = vperm.xlu0 %5429, %v6498_v30  }
 0xaff   : > { %v6525_v1 = vadd.f32 %v2406_v51, %v2374_v7 }
 0xb05   : > { %2493 = vperm.xlu1 %5426, %v6512_v49   ;;  %2490 = vperm.xlu2 %5427, %v6514_v50  }
 0xb06   : > { %2496 = vperm.xlu0 %5429, %v6516_v36  }
 0xb0d   : > { %2502 = vperm.xlu1 %5426, %v6523_v0   ;;  %2499 = vperm.xlu2 %5427, %v6525_v1  }
 0xb37   : > { %v2461_v5 = vpop.permute.xlu2 %2460 }
 0xb38   : > { %v2505_v46 = vperm.slane %v2461_v5, %v6228_v27 }
 0xb3f   : > { %v2473_v48 = vpop.permute.xlu2 %2472 }
 0xb40   : > { %v2509_v15 = vperm.slane %v2473_v48, %v6228_v27 }
 0xb4f   : > { %v2464_v8 = vpop.permute.xlu1 %2463 }
 0xb50   : > { %v2458_v17 = vpop.permute.xlu0 %2457  ;;  %v2506_v24 = vperm.slane %v2464_v8, %v6228_v27 }
 0xb51   : > { %v2504_v10 = vperm.slane %v2458_v17, %v6228_v27 }
 0xb53   : > { %v2520_v23 = vsel %vm1900_vm15, %v2505_v46, %v2504_v10 }
 0xb54   : > { %v2521_v44 = vsel %vm2130_vm0, %v2506_v24, %v2520_v23 }
 0xb57   : > { %v2476_v31 = vpop.permute.xlu1 %2475  ;;  %v2482_v56 = vpop.permute.xlu2 %2481 }
 0xb58   : > { %v2467_v2 = vpop.permute.xlu0 %2466  ;;  %v2510_v20 = vperm.slane %v2476_v31, %v6228_v27  ;;  %v2512_v42 = vperm.slane %v2482_v56, %v6228_v27 }
 0xb59   : > { %v2507_v25 = vperm.slane %v2467_v2, %v6228_v27 }
 0xb5b   : > { %v2522_v62 = vsel %vm2132_vm2, %v2507_v25, %v2521_v44 }
 0xb5f   : > { %v2491_v55 = vpop.permute.xlu2 %2490 }
 0xb60   : > { %v2470_v34 = vpop.permute.xlu0 %2469  ;;  %v2515_v5 = vperm.slane %v2491_v55, %v6228_v27 }
 0xb61   : > { %v2508_v26 = vperm.slane %v2470_v34, %v6228_v27 }
 0xb63   : > { %v2523_v28 = vsel %vm2134_vm3, %v2508_v26, %v2522_v62 }
 0xb64   : > { %v2524_v47 = vsel %vm2136_vm4, %v2509_v15, %v2523_v28 }
 0xb65   : > { %v2525_v19 = vsel %vm2138_vm1, %v2510_v20, %v2524_v47 }
 0xb67   : > { %v2500_v23 = vpop.permute.xlu2 %2499 }
 0xb68   : > { %v2479_v60 = vpop.permute.xlu0 %2478  ;;  %v2518_v48 = vperm.slane %v2500_v23, %v6228_v27 }
 0xb69   : > { %v2511_v37 = vperm.slane %v2479_v60, %v6228_v27 }
 0xb6b   : > { %v2526_v39 = vsel %vm2140_vm5, %v2511_v37, %v2525_v19 }
 0xb6c   : > { %v2536_v29 = vsel %vm1865_vm13, %v2526_v39, -inf }
 0xb6d   : > { %2537 = vmax.xlane.f32.xlu0 %v2536_v29 }
 0xb6f   : > { %v2485_v32 = vpop.permute.xlu1 %2484 }
 0xb70   : > { %v2513_v40 = vperm.slane %v2485_v32, %v6228_v27  ;;  %v2488_v41 = vpop.permute.xlu0 %2487 }
 0xb71   : > { %v2514_v7 = vperm.slane %v2488_v41, %v6228_v27 }
 0xb72   : > { %v2527_v52 = vsel %vm1900_vm15, %v2513_v40, %v2512_v42 }
 0xb73   : > { %v2528_v51 = vsel %vm2130_vm0, %v2514_v7, %v2527_v52 }
 0xb74   : > { %v2529_v10 = vsel %vm2132_vm2, %v2515_v5, %v2528_v51 }
 0xb77   : > { %v2494_v17 = vpop.permute.xlu1 %2493 }
 0xb78   : > { %v2516_v2 = vperm.slane %v2494_v17, %v6228_v27  ;;  %v2497_v8 = vpop.permute.xlu0 %2496 }
 0xb79   : > { %v2517_v46 = vperm.slane %v2497_v8, %v6228_v27 }
 0xb7a   : > { %v2530_v24 = vsel %vm2134_vm3, %v2516_v2, %v2529_v10 }
 0xb7b   : > { %v2531_v25 = vsel %vm2136_vm4, %v2517_v46, %v2530_v24 }
 0xb7c   : > { %v2532_v44 = vsel %vm2138_vm1, %v2518_v48, %v2531_v25 }
 0xb7f   : > { %v2503_v34 = vpop.permute.xlu1 %2502 }
 0xb80   : > { %v2519_v26 = vperm.slane %v2503_v34, %v6228_v27 }
 0xb82   : > { %v2533_v62 = vsel %vm2140_vm5, %v2519_v26, %v2532_v44 }
 0xb83   : > { %v2539_v28 = vsel %vm1865_vm13, %v2533_v62, -inf }
 0xb84   : > { %2540 = vmax.xlane.f32.xlu2 %v2539_v28 }
 0xbe0   : > { %v6561_v15 = vpop.xlane.xlu0 %2537 }
 0xbe1   : > { %v2550_v31 = vperm.slane %v6561_v15, 6  ;;  %v2549_v47 = vperm.slane %v6561_v15, 5  ;;  %v2544_v20 = vperm.slane %v6561_v15, 0  ;;  %v2545_v19 = vperm.slane %v6561_v15, 1 }
 0xbe2   : > { %v2546_v55 = vperm.slane %v6561_v15, 2  ;;  %v2547_v52 = vperm.slane %v6561_v15, 3  ;;  %v2548_v48 = vperm.slane %v6561_v15, 4 }
 0xbe3   : > { %v2582_v56 = vsub.f32 %v6471_v33, %v2550_v31  ;;  %v2581_v60 = vsub.f32 %v6473_v3, %v2549_v47  ;;  %v2576_v37 = vsub.f32 %v6463_v14, %v2544_v20  ;;  %v2577_v40 = vsub.f32 %v6461_v54, %v2545_v19 }
 0xbe4   : > { %v2578_v14 = vsub.f32 %v6459_v53, %v2546_v55  ;;  %v2579_v2 = vsub.f32 %v6475_v4, %v2547_v52  ;;  %v2551_v20 = vperm.slane %v6561_v15, 7 }
 0xbe5   : > { %v2604_v39 = vmul.f32 1.442695, %v2582_v56  ;;  %v2602_v29 = vmul.f32 1.442695, %v2581_v60  ;;  %v2592_v32 = vmul.f32 1.442695, %v2576_v37 }
 0xbe6   : > { %v2594_v42 = vmul.f32 1.442695, %v2577_v40  ;;  %v2596_v3 = vmul.f32 1.442695, %v2578_v14  ;;  %v2598_v25 = vmul.f32 1.442695, %v2579_v2 }
 0xbe7   : > { %5494 = vpow2.f32 %v2604_v39  ;;  %v2761_v14 = vperm.slane %v6220_v18, 3 }
 0xbe8   : > { %5496 = vpow2.f32 %v2602_v29 }
 0xbe9   : > { %5498 = vpow2.f32 %v2592_v32 }
 0xbea   : > { %5500 = vpow2.f32 %v2594_v42 }
 0xbeb   : > { %5502 = vpow2.f32 %v2596_v3 }
 0xbed   : > { %v5495_v41 = vpop.eup %5494 }
 0xbee   : > { %v5497_v7 = vpop.eup %5496  ;;  %2659 = vperm.xlu2 %5427, %v5495_v41  }
 0xbef   : > { %v5499_v33 = vpop.eup %5498  ;;  %2656 = vperm.xlu0 %5429, %v5497_v7  }
 0xbf0   : > { %2641 = vperm.xlu1 %5426, %v5499_v33   ;;  %v5501_v51 = vpop.eup %5500 }
 0xbf1   : > { %v5503_v26 = vpop.eup %5502 }
 0xbf7   : > { %v6574_v17 = vpop.xlane.xlu2 %2540 }
 0xbf8   : > { %2644 = vperm.xlu1 %5426, %v5501_v51   ;;  %v2555_v54 = vperm.slane %v6574_v17, 3  ;;  %v2553_v5 = vperm.slane %v6574_v17, 1  ;;  %v2558_v53 = vperm.slane %v6574_v17, 6  ;;  %v2556_v46 = vperm.slane %v6574_v17, 4 }
 0xbf9   : > { %v2559_v62 = vperm.slane %v6574_v17, 7  ;;  %v2552_v39 = vperm.slane %v6574_v17, 0  ;;  %v2554_v41 = vperm.slane %v6574_v17, 2  ;;  %v2557_v7 = vperm.slane %v6574_v17, 5 }
 0xbfa   : > { %v2587_v8 = vsub.f32 %v6514_v50, %v2555_v54  ;;  %v2585_v10 = vsub.f32 %v6500_v13, %v2553_v5  ;;  %v2590_v34 = vsub.f32 %v6525_v1, %v2558_v53  ;;  %v2588_v4 = vsub.f32 %v6512_v49, %v2556_v46 }
 0xbfb   : > { %v2580_v13 = vsub.f32 %v6481_v22, %v2548_v48  ;;  %v2591_v49 = vsub.f32 %v6523_v0, %v2559_v62  ;;  %v2583_v22 = vsub.f32 %v6485_v16, %v2551_v20  ;;  %v2584_v32 = vsub.f32 %v6502_v6, %v2552_v39  ;;  %v6615_v62 = vld [vmem:[%s7705_s18] sm:$0x3] }
 0xbfc   : > { %v2614_v24 = vmul.f32 1.442695, %v2587_v8  ;;  %v2610_v23 = vmul.f32 1.442695, %v2585_v10  ;;  %v2620_v50 = vmul.f32 1.442695, %v2590_v34  ;;  %v2586_v42 = vsub.f32 %v6498_v30, %v2554_v41 }
 0xbfd   : > { %v2616_v44 = vmul.f32 1.442695, %v2588_v4  ;;  %v2600_v47 = vmul.f32 1.442695, %v2580_v13  ;;  %v2622_v56 = vmul.f32 1.442695, %v2591_v49  ;;  %v2589_v6 = vsub.f32 %v6516_v36, %v2557_v7 }
 0xbfe   : > { %5504 = vpow2.f32 %v2614_v24  ;;  %v2606_v19 = vmul.f32 1.442695, %v2583_v22  ;;  %v2608_v0 = vmul.f32 1.442695, %v2584_v32  ;;  %v2612_v55 = vmul.f32 1.442695, %v2586_v42 }
 0xbff   : > { %5506 = vpow2.f32 %v2610_v23  ;;  %v2618_v3 = vmul.f32 1.442695, %v2589_v6  ;;  %v2768_v51 = vperm.slane %v6223_v21, 3  ;;  %vm2732_vm9 = vcmp.eq.s32.totalorder %v6615_v62, 3 }
 0xc00   : > { %2647 = vperm.xlu1 %5426, %v5503_v26   ;;  %5508 = vpow2.f32 %v2598_v25  ;;  %vm3117_vm11 = vcmp.eq.s32.totalorder %v6615_v62, 4 }
 0xc01   : > { %5510 = vpow2.f32 %v2620_v50 }
 0xc02   : > { %5512 = vpow2.f32 %v2616_v44 }
 0xc03   : > { %5514 = vpow2.f32 %v2600_v47  ;;  %v2733_v47 = vsel %vm2732_vm9, 1, %v5810_v45 }
 0xc04   : > { %v5505_v28 = vpop.eup %5504  ;;  %5516 = vpow2.f32 %v2622_v56 }
 0xc05   : > { %v5507_v31 = vpop.eup %5506  ;;  %2674 = vperm.xlu2 %5427, %v5505_v28   ;;  %5518 = vpow2.f32 %v2606_v19 }
 0xc06   : > { %2668 = vperm.xlu0 %5429, %v5507_v31   ;;  %v5509_v1 = vpop.eup %5508  ;;  %5520 = vpow2.f32 %v2608_v0 }
 0xc07   : > { %v5511_v60 = vpop.eup %5510  ;;  %5522 = vpow2.f32 %v2612_v55 }
 0xc08   : > { %2650 = vperm.xlu1 %5426, %v5509_v1   ;;  %v5513_v37 = vpop.eup %5512  ;;  %5524 = vpow2.f32 %v2618_v3 }
 0xc09   : > { %v5515_v29 = vpop.eup %5514 }
 0xc0a   : > { %v5517_v40 = vpop.eup %5516 }
 0xc0b   : > { %v5519_v16 = vpop.eup %5518 }
 0xc0c   : > { %v5521_v33 = vpop.eup %5520 }
 0xc0d   : > { %2683 = vperm.xlu2 %5427, %v5511_v60   ;;  %v5523_v52 = vpop.eup %5522 }
 0xc0e   : > { %2677 = vperm.xlu0 %5429, %v5513_v37   ;;  %v5525_v30 = vpop.eup %5524 }
 0xc10   : > { %2653 = vperm.xlu1 %5426, %v5515_v29  }
 0xc16   : > { %2686 = vperm.xlu0 %5429, %v5517_v40  }
 0xc18   : > { %2662 = vperm.xlu1 %5426, %v5519_v16  }
 0xc1e   : > { %5430 = vset.pattern.permute.xlu0 %v6211_v9 }
 0xc20   : > { %2665 = vperm.xlu1 %5426, %v5521_v33  }
 0xc26   : > { %2766 = vperm.xlu0 %5430, %v2761_v14  }
 0xc28   : > { %2671 = vperm.xlu1 %5426, %v5523_v52  }
 0xc2e   : > { %2773 = vperm.xlu0 %5430, %v2768_v51  }
 0xc30   : > { %2680 = vperm.xlu1 %5426, %v5525_v30  }
 0xc36   : > { %5431 = vset.pattern.permute.xlu0 %v5810_v45 }
 0xc37   : > { %2735 = vperm.xlu0 %5431, %v2733_v47  }
 0xc48   : > { %v2660_v13 = vpop.permute.xlu2 %2659 }
 0xc49   : > { %v2694_v28 = vperm.slane %v2660_v13, %v6228_v27 }
 0xc5f   : > { %v2675_v37 = vpop.permute.xlu2 %2674 }
 0xc60   : > { %v2699_v16 = vperm.slane %v2675_v37, %v6228_v27 }
 0xc61   : > { %v2657_v48 = vpop.permute.xlu0 %2656 }
 0xc62   : > { %v2642_v54 = vpop.permute.xlu1 %2641  ;;  %v2693_v50 = vperm.slane %v2657_v48, %v6228_v27 }
 0xc63   : > { %v2688_v53 = vperm.slane %v2642_v54, %v6228_v27 }
 0xc67   : > { %v2684_v42 = vpop.permute.xlu2 %2683 }
 0xc68   : > { %v2702_v3 = vperm.slane %v2684_v42, %v6228_v27 }
 0xc6a   : > { %v2645_v5 = vpop.permute.xlu1 %2644 }
 0xc6b   : > { %v2689_v36 = vperm.slane %v2645_v5, %v6228_v27 }
 0xc6d   : > { %v2704_v23 = vsel %vm1900_vm15, %v2689_v36, %v2688_v53 }
 0xc72   : > { %v2648_v2 = vpop.permute.xlu1 %2647 }
 0xc73   : > { %v2690_v10 = vperm.slane %v2648_v2, %v6228_v27 }
 0xc75   : > { %v2705_v34 = vsel %vm2130_vm0, %v2690_v10, %v2704_v23 }
 0xc78   : > { %v2669_v22 = vpop.permute.xlu0 %2668 }
 0xc79   : > { %v2697_v32 = vperm.slane %v2669_v22, %v6228_v27 }
 0xc7a   : > { %v2651_v8 = vpop.permute.xlu1 %2650 }
 0xc7b   : > { %v2691_v46 = vperm.slane %v2651_v8, %v6228_v27 }
 0xc7d   : > { %v2706_v26 = vsel %vm2132_vm2, %v2691_v46, %v2705_v34 }
 0xc80   : > { %v2678_v19 = vpop.permute.xlu0 %2677 }
 0xc81   : > { %v2700_v7 = vperm.slane %v2678_v19, %v6228_v27 }
 0xc82   : > { %v2654_v24 = vpop.permute.xlu1 %2653 }
 0xc83   : > { %v2692_v25 = vperm.slane %v2654_v24, %v6228_v27 }
 0xc85   : > { %v2707_v4 = vsel %vm2134_vm3, %v2692_v25, %v2706_v26 }
 0xc86   : > { %v2708_v44 = vsel %vm2136_vm4, %v2693_v50, %v2707_v4 }
 0xc87   : > { %v2709_v1 = vsel %vm2138_vm1, %v2694_v28, %v2708_v44 }
 0xc88   : > { %v2687_v33 = vpop.permute.xlu0 %2686 }
 0xc89   : > { %v2703_v51 = vperm.slane %v2687_v33, %v6228_v27 }
 0xc8a   : > { %v2663_v31 = vpop.permute.xlu1 %2662 }
 0xc8b   : > { %v2695_v20 = vperm.slane %v2663_v31, %v6228_v27 }
 0xc8d   : > { %v2710_v49 = vsel %vm2140_vm5, %v2695_v20, %v2709_v1 }
 0xc8e   : > { %v2720_v56 = vsel %vm1865_vm13, %v2710_v49, 0.0 }
 0xc8f   : > { %2721 = vadd.xlane.f32.xlu1 %v2720_v56 }
 0xc92   : > { %v2666_v60 = vpop.permute.xlu1 %2665 }
 0xc93   : > { %v2696_v39 = vperm.slane %v2666_v60, %v6228_v27 }
 0xc95   : > { %v2711_v0 = vsel %vm1900_vm15, %v2697_v32, %v2696_v39 }
 0xc98   : > { %v2767_v10 = vpop.permute.xlu0 %2766 }
 0xc99   : > { %v2779_v24 = vperm.slane %v2767_v10, 2  ;;  %v2778_v23 = vperm.slane %v2767_v10, 1  ;;  %v2777_v26 = vperm.slane %v2767_v10, 0  ;;  %v2783_v31 = vperm.slane %v2767_v10, 6 }
 0xc9a   : > { %v2672_v29 = vpop.permute.xlu1 %2671  ;;  %v2782_v47 = vperm.slane %v2767_v10, 5  ;;  %v2780_v20 = vperm.slane %v2767_v10, 3  ;;  %v2781_v19 = vperm.slane %v2767_v10, 4 }
 0xc9b   : > { %v2698_v40 = vperm.slane %v2672_v29, %v6228_v27 }
 0xc9d   : > { %v2712_v41 = vsel %vm2130_vm0, %v2698_v40, %v2711_v0 }
 0xc9e   : > { %v2713_v55 = vsel %vm2132_vm2, %v2699_v16, %v2712_v41  ;;  %v2784_v16 = vperm.slane %v2767_v10, 7 }
 0xc9f   : > { %v2714_v52 = vsel %vm2134_vm3, %v2700_v7, %v2713_v55 }
 0xca0   : > { %v2774_v56 = vpop.permute.xlu0 %2773 }
 0xca1   : > { %v2786_v42 = vperm.slane %v2774_v56, 1  ;;  %v2785_v55 = vperm.slane %v2774_v56, 0  ;;  %v2788_v10 = vperm.slane %v2774_v56, 3 }
 0xca2   : > { %v2681_v6 = vpop.permute.xlu1 %2680 }
 0xca3   : > { %v2701_v14 = vperm.slane %v2681_v6, %v6228_v27 }
 0xca5   : > { %v2715_v30 = vsel %vm2136_vm4, %v2701_v14, %v2714_v52 }
 0xca6   : > { %v2716_v54 = vsel %vm2138_vm1, %v2702_v3, %v2715_v30 }
 0xca7   : > { %v2717_v5 = vsel %vm2140_vm5, %v2703_v51, %v2716_v54 }
 0xca8   : > { %v2723_v2 = vsel %vm1865_vm13, %v2717_v5, 0.0 }
 0xca9   : > { %2724 = vadd.xlane.f32.xlu2 %v2723_v2  ;;  %v2736_v40 = vpop.permute.xlu0 %2735 }
 0xcaa   : > { %vm2737_vm10 = vcmp.eq.s32.totalorder %v2736_v40, 1 }
 0xd02   : > { %v2722_v8 = vpop.xlane.xlu1 %2721 }
 0xd03   : > { %5526 = vlog2.f32 %v2722_v8  ;;  %v2787_v8 = vperm.slane %v2774_v56, 2 }
 0xd09   : > { %v5527_v36 = vpop.eup %5526 }
 0xd0a   : > { %v2727_v53 = vmul.f32 0.6931472, %v5527_v36  ;;  %v2789_v36 = vperm.slane %v2774_v56, 4 }
 0xd0c   : > { %v2730_v46 = vadd.f32 %v2727_v53, %v6561_v15 }
 0xd0e   : > { %v2747_v25 = vadd.f32 %v2730_v46, %v6258_v12  ;;  %v2746_v48 = vadd.f32 %v2730_v46, %v6252_v57  ;;  %v2745_v34 = vadd.f32 %v2730_v46, %v6264_v63  ;;  %v2751_v15 = vadd.f32 %v2730_v46, %v6256_v59 }
 0xd0f   : > { %v2750_v44 = vadd.f32 %v2730_v46, %v6262_v61  ;;  %v2748_v28 = vadd.f32 %v2730_v46, %v6254_v58  ;;  %v2749_v37 = vadd.f32 %v2730_v46, %v6269_v11  ;;  %v2752_v0 = vadd.f32 %v2730_v46, %v6292_v35 }
 0xd10   : > { %v6644_v4 = vadd.f32 %v2779_v24, %v2747_v25  ;;  %v6646_v13 = vadd.f32 %v2778_v23, %v2746_v48  ;;  %v6648_v50 = vadd.f32 %v2777_v26, %v2745_v34  ;;  %v6656_v1 = vadd.f32 %v2783_v31, %v2751_v15 }
 0xd11   : > { %v6658_v49 = vadd.f32 %v2782_v47, %v2750_v44  ;;  %v6660_v22 = vadd.f32 %v2780_v20, %v2748_v28  ;;  %v6666_v39 = vadd.f32 %v2781_v19, %v2749_v37  ;;  %v2740_v7 = vperm.slane %v2730_v46, %v6228_v27 }
 0xd12   : > { %2848 = vperm.xlu2 %5427, %v6644_v4   ;;  %2845 = vperm.xlu1 %5426, %v6646_v13   ;;  %v6675_v3 = vadd.f32 %v2784_v16, %v2752_v0  ;;  %v2790_v48 = vperm.slane %v2774_v56, 5  ;;  %v2792_v34 = vperm.slane %v2774_v56, 7  ;;  %v2791_v26 = vperm.slane %v2774_v56, 6 }
 0xd13   : > { %2842 = vperm.xlu0 %5431, %v6648_v50  }
 0xd1a   : > { %2860 = vperm.xlu2 %5427, %v6656_v1   ;;  %2857 = vperm.xlu1 %5426, %v6658_v49  }
 0xd1b   : > { %2851 = vperm.xlu0 %5431, %v6660_v22  }
 0xd1c   : > { %v2725_v60 = vpop.xlane.xlu2 %2724 }
 0xd1d   : > { %5528 = vlog2.f32 %v2725_v60 }
 0xd23   : > { %v5529_v29 = vpop.eup %5528  ;;  %2854 = vperm.xlu0 %5431, %v6666_v39  }
 0xd24   : > { %v2729_v32 = vmul.f32 0.6931472, %v5529_v29 }
 0xd26   : > { %v2731_v41 = vadd.f32 %v2729_v32, %v6574_v17 }
 0xd28   : > { %v2741_v33 = vperm.slane %v2731_v41, %v6228_v27  ;;  %v2754_v6 = vadd.f32 %v2731_v41, %v6252_v57  ;;  %v2753_v14 = vadd.f32 %v2731_v41, %v6264_v63  ;;  %v2755_v54 = vadd.f32 %v2731_v41, %v6258_v12 }
 0xd29   : > { %v2757_v5 = vadd.f32 %v2731_v41, %v6269_v11  ;;  %v2756_v2 = vadd.f32 %v2731_v41, %v6254_v58  ;;  %v2758_v24 = vadd.f32 %v2731_v41, %v6262_v61  ;;  %v2760_v23 = vadd.f32 %v2731_v41, %v6292_v35 }
 0xd2a   : > { %v2742_v52 = vsel %vm1900_vm15, %v2741_v33, %v2740_v7  ;;  %v6678_v51 = vadd.f32 %v2786_v42, %v2754_v6  ;;  %v6680_v30 = vadd.f32 %v2785_v55, %v2753_v14  ;;  %v6691_v53 = vadd.f32 %v2787_v8, %v2755_v54 }
 0xd2b   : > { %v6683_v17 = vsel %vm2737_vm10, %v2742_v52, %v6504_v38  ;;  %2863 = vperm.xlu0 %5431, %v6675_v3   ;;  %v6693_v46 = vadd.f32 %v2789_v36, %v2757_v5  ;;  %v6695_v38 = vadd.f32 %v2788_v10, %v2756_v2  ;;  %v2759_v25 = vadd.f32 %v2731_v41, %v6256_v59 }
 0xd2c   : > { %2869 = vperm.xlu2 %5427, %v6678_v51   ;;  %2866 = vperm.xlu1 %5426, %v6680_v30   ;;  %v6703_v15 = vadd.f32 %v2790_v48, %v2758_v24  ;;  %v6705_v44 = vadd.f32 %v2792_v34, %v2760_v23 }
 0xd2d   : > { %v6707_v28 = vadd.f32 %v2791_v26, %v2759_v25 }
 0xd33   : > { %2872 = vperm.xlu0 %5431, %v6691_v53  }
 0xd34   : > { %2878 = vperm.xlu2 %5427, %v6693_v46   ;;  %2875 = vperm.xlu1 %5426, %v6695_v38  }
 0xd3b   : > { %2881 = vperm.xlu0 %5431, %v6703_v15  }
 0xd3c   : > { %2887 = vperm.xlu2 %5427, %v6705_v44   ;;  %2884 = vperm.xlu1 %5426, %v6707_v28  }
 0xd6c   : > { %v2849_v47 = vpop.permute.xlu2 %2848 }
 0xd6d   : > { %v2891_v40 = vperm.slane %v2849_v47, %v6228_v27 }
 0xd74   : > { %v2861_v19 = vpop.permute.xlu2 %2860 }
 0xd75   : > { %v2895_v52 = vperm.slane %v2861_v19, %v6228_v27 }
 0xd84   : > { %v2846_v20 = vpop.permute.xlu1 %2845 }
 0xd85   : > { %v2843_v31 = vpop.permute.xlu0 %2842  ;;  %v2890_v37 = vperm.slane %v2846_v20, %v6228_v27 }
 0xd86   : > { %v2889_v56 = vperm.slane %v2843_v31, %v6228_v27  ;;  %v2870_v7 = vpop.permute.xlu2 %2869 }
 0xd87   : > { %v2898_v48 = vperm.slane %v2870_v7, %v6228_v27 }
 0xd88   : > { %v2905_v29 = vsel %vm1900_vm15, %v2890_v37, %v2889_v56 }
 0xd89   : > { %v2906_v42 = vsel %vm2130_vm0, %v2891_v40, %v2905_v29 }
 0xd8c   : > { %v2858_v41 = vpop.permute.xlu1 %2857 }
 0xd8d   : > { %v2852_v60 = vpop.permute.xlu0 %2851  ;;  %v2894_v6 = vperm.slane %v2858_v41, %v6228_v27 }
 0xd8e   : > { %v2892_v32 = vperm.slane %v2852_v60, %v6228_v27  ;;  %v2879_v24 = vpop.permute.xlu2 %2878 }
 0xd8f   : > { %v2901_v37 = vperm.slane %v2879_v24, %v6228_v27 }
 0xd90   : > { %v2907_v55 = vsel %vm2132_vm2, %v2892_v32, %v2906_v42 }
 0xd95   : > { %v2855_v0 = vpop.permute.xlu0 %2854 }
 0xd96   : > { %v2893_v16 = vperm.slane %v2855_v0, %v6228_v27  ;;  %v2888_v56 = vpop.permute.xlu2 %2887 }
 0xd97   : > { %v2904_v41 = vperm.slane %v2888_v56, %v6228_v27 }
 0xd98   : > { %v2908_v33 = vsel %vm2134_vm3, %v2893_v16, %v2907_v55 }
 0xd99   : > { %v2909_v14 = vsel %vm2136_vm4, %v2894_v6, %v2908_v33 }
 0xd9a   : > { %v2910_v8 = vsel %vm2138_vm1, %v2895_v52, %v2909_v14 }
 0xd9d   : > { %v2864_v54 = vpop.permute.xlu0 %2863 }
 0xd9e   : > { %v2896_v5 = vperm.slane %v2864_v54, %v6228_v27  ;;  %v2867_v2 = vpop.permute.xlu1 %2866 }
 0xd9f   : > { %v2897_v23 = vperm.slane %v2867_v2, %v6228_v27 }
 0xda0   : > { %v2911_v36 = vsel %vm2140_vm5, %v2896_v5, %v2910_v8 }
 0xda1   : > { %v2921_v10 = vsel %vm1865_vm13, %v2911_v36, -inf  ;;  %v2912_v31 = vsel %vm1900_vm15, %v2898_v48, %v2897_v23 }
 0xda2   : > { %2922 = vmax.xlane.f32.xlu0 %v2921_v10 }
 0xda5   : > { %v2873_v25 = vpop.permute.xlu0 %2872 }
 0xda6   : > { %v2899_v34 = vperm.slane %v2873_v25, %v6228_v27  ;;  %v2876_v26 = vpop.permute.xlu1 %2875 }
 0xda7   : > { %v2900_v47 = vperm.slane %v2876_v26, %v6228_v27 }
 0xda8   : > { %v2913_v20 = vsel %vm2130_vm0, %v2899_v34, %v2912_v31 }
 0xda9   : > { %v2914_v60 = vsel %vm2132_vm2, %v2900_v47, %v2913_v20 }
 0xdaa   : > { %v2915_v0 = vsel %vm2134_vm3, %v2901_v37, %v2914_v60 }
 0xdad   : > { %v2882_v19 = vpop.permute.xlu0 %2881 }
 0xdae   : > { %v2902_v29 = vperm.slane %v2882_v19, %v6228_v27  ;;  %v2885_v32 = vpop.permute.xlu1 %2884 }
 0xdaf   : > { %v2903_v40 = vperm.slane %v2885_v32, %v6228_v27 }
 0xdb0   : > { %v2916_v16 = vsel %vm2136_vm4, %v2902_v29, %v2915_v0 }
 0xdb1   : > { %v2917_v42 = vsel %vm2138_vm1, %v2903_v40, %v2916_v16 }
 0xdb2   : > { %v2918_v55 = vsel %vm2140_vm5, %v2904_v41, %v2917_v42 }
 0xdb3   : > { %v2924_v7 = vsel %vm1865_vm13, %v2918_v55, -inf }
 0xdb4   : > { %2925 = vmax.xlane.f32.xlu1 %v2924_v7 }
 0xe15   : > { %v6744_v33 = vpop.xlane.xlu0 %2922 }
 0xe16   : > { %v2935_v6 = vperm.slane %v6744_v33, 6  ;;  %v2934_v14 = vperm.slane %v6744_v33, 5  ;;  %v2929_v52 = vperm.slane %v6744_v33, 0  ;;  %v2930_v8 = vperm.slane %v6744_v33, 1 }
 0xe17   : > { %v2931_v25 = vperm.slane %v6744_v33, 2  ;;  %v2932_v37 = vperm.slane %v6744_v33, 3 }
 0xe18   : > { %v2967_v54 = vsub.f32 %v6656_v1, %v2935_v6  ;;  %v2966_v5 = vsub.f32 %v6658_v49, %v2934_v14  ;;  %v2961_v2 = vsub.f32 %v6648_v50, %v2929_v52  ;;  %v2962_v23 = vsub.f32 %v6646_v13, %v2930_v8 }
 0xe19   : > { %v2963_v50 = vsub.f32 %v6644_v4, %v2931_v25  ;;  %v2964_v4 = vsub.f32 %v6660_v22, %v2932_v37 }
 0xe1a   : > { %v2989_v36 = vmul.f32 1.442695, %v2967_v54  ;;  %v2987_v10 = vmul.f32 1.442695, %v2966_v5  ;;  %v2977_v24 = vmul.f32 1.442695, %v2961_v2 }
 0xe1b   : > { %v2979_v34 = vmul.f32 1.442695, %v2962_v23  ;;  %v2981_v20 = vmul.f32 1.442695, %v2963_v50  ;;  %v2983_v0 = vmul.f32 1.442695, %v2964_v4 }
 0xe1c   : > { %5530 = vpow2.f32 %v2989_v36 }
 0xe1d   : > { %5532 = vpow2.f32 %v2987_v10 }
 0xe1e   : > { %5534 = vpow2.f32 %v2977_v24 }
 0xe1f   : > { %5536 = vpow2.f32 %v2979_v34 }
 0xe20   : > { %5538 = vpow2.f32 %v2981_v20 }
 0xe22   : > { %v5531_v48 = vpop.eup %5530 }
 0xe23   : > { %v5533_v26 = vpop.eup %5532  ;;  %3044 = vperm.xlu1 %5426, %v5531_v48  }
 0xe24   : > { %v5535_v1 = vpop.eup %5534  ;;  %3041 = vperm.xlu0 %5431, %v5533_v26  }
 0xe25   : > { %3026 = vperm.xlu2 %5427, %v5535_v1   ;;  %v5537_v19 = vpop.eup %5536 }
 0xe26   : > { %v5539_v41 = vpop.eup %5538 }
 0xe27   : > { %v6756_v49 = vpop.xlane.xlu1 %2925 }
 0xe28   : > { %v2942_v31 = vperm.slane %v6756_v49, 5  ;;  %v2938_v47 = vperm.slane %v6756_v49, 1  ;;  %v2940_v56 = vperm.slane %v6756_v49, 3  ;;  %v2943_v16 = vperm.slane %v6756_v49, 6 }
 0xe29   : > { %v2937_v8 = vperm.slane %v6756_v49, 0  ;;  %v2939_v24 = vperm.slane %v6756_v49, 2  ;;  %v2941_v48 = vperm.slane %v6756_v49, 4  ;;  %v2944_v50 = vperm.slane %v6756_v49, 7 }
 0xe2a   : > { %v2974_v13 = vsub.f32 %v6703_v15, %v2942_v31  ;;  %v2970_v60 = vsub.f32 %v6678_v51, %v2938_v47  ;;  %v2972_v40 = vsub.f32 %v6695_v38, %v2940_v56  ;;  %v2933_v15 = vperm.slane %v6744_v33, 4 }
 0xe2b   : > { %v2975_v22 = vsub.f32 %v6707_v28, %v2943_v16  ;;  %v2936_v38 = vperm.slane %v6744_v33, 7  ;;  %v2969_v28 = vsub.f32 %v6680_v30, %v2937_v8  ;;  %v2971_v25 = vsub.f32 %v6691_v53, %v2939_v24 }
 0xe2c   : > { %v3003_v29 = vmul.f32 1.442695, %v2974_v13  ;;  %v2995_v32 = vmul.f32 1.442695, %v2970_v60  ;;  %v2999_v51 = vmul.f32 1.442695, %v2972_v40  ;;  %v2965_v7 = vsub.f32 %v6666_v39, %v2933_v15 }
 0xe2d   : > { %3029 = vperm.xlu2 %5427, %v5537_v19   ;;  %v3005_v14 = vmul.f32 1.442695, %v2975_v22  ;;  %v2968_v5 = vsub.f32 %v6675_v3, %v2936_v38  ;;  %v2993_v10 = vmul.f32 1.442695, %v2969_v28  ;;  %v2997_v3 = vmul.f32 1.442695, %v2971_v25 }
 0xe2e   : > { %5540 = vpow2.f32 %v3003_v29  ;;  %v2985_v6 = vmul.f32 1.442695, %v2965_v7  ;;  %v2973_v26 = vsub.f32 %v6693_v46, %v2941_v48  ;;  %v2976_v31 = vsub.f32 %v6705_v44, %v2944_v50 }
 0xe2f   : > { %5542 = vpow2.f32 %v2995_v32  ;;  %v2991_v2 = vmul.f32 1.442695, %v2968_v5  ;;  %v3118_v13 = vsel %vm3117_vm11, 1, %v5810_v45  ;;  %v3146_v60 = vperm.slane %v6220_v18, 4 }
 0xe30   : > { %5544 = vpow2.f32 %v2983_v0  ;;  %v3001_v1 = vmul.f32 1.442695, %v2973_v26  ;;  %v3007_v47 = vmul.f32 1.442695, %v2976_v31  ;;  %v3153_v44 = vperm.slane %v6223_v21, 4 }
 0xe31   : > { %5546 = vpow2.f32 %v2999_v51 }
 0xe32   : > { %5548 = vpow2.f32 %v2985_v6 }
 0xe33   : > { %5550 = vpow2.f32 %v3005_v14 }
 0xe34   : > { %v5541_v42 = vpop.eup %5540  ;;  %5552 = vpow2.f32 %v2991_v2 }
 0xe35   : > { %v5543_v55 = vpop.eup %5542  ;;  %3032 = vperm.xlu2 %5427, %v5539_v41   ;;  %3065 = vperm.xlu1 %5426, %v5541_v42   ;;  %5554 = vpow2.f32 %v2993_v10 }
 0xe36   : > { %3053 = vperm.xlu0 %5431, %v5543_v55   ;;  %v5545_v52 = vpop.eup %5544  ;;  %5556 = vpow2.f32 %v2997_v3 }
 0xe37   : > { %v5547_v54 = vpop.eup %5546  ;;  %5558 = vpow2.f32 %v3001_v1 }
 0xe38   : > { %v5549_v36 = vpop.eup %5548  ;;  %5560 = vpow2.f32 %v3007_v47 }
 0xe39   : > { %v5551_v39 = vpop.eup %5550 }
 0xe3a   : > { %v5553_v23 = vpop.eup %5552 }
 0xe3b   : > { %v5555_v34 = vpop.eup %5554 }
 0xe3c   : > { %v5557_v30 = vpop.eup %5556 }
 0xe3d   : > { %3035 = vperm.xlu2 %5427, %v5545_v52   ;;  %v5559_v20 = vpop.eup %5558 }
 0xe3e   : > { %3059 = vperm.xlu0 %5431, %v5547_v54   ;;  %v5561_v53 = vpop.eup %5560 }
 0xe45   : > { %3038 = vperm.xlu2 %5427, %v5549_v36  }
 0xe46   : > { %3068 = vperm.xlu0 %5431, %v5551_v39  }
 0xe4d   : > { %3047 = vperm.xlu2 %5427, %v5553_v23  }
 0xe55   : > { %3050 = vperm.xlu2 %5427, %v5555_v34  }
 0xe5d   : > { %3056 = vperm.xlu2 %5427, %v5557_v30  }
 0xe65   : > { %3062 = vperm.xlu2 %5427, %v5559_v20  }
 0xe6d   : > { %3071 = vperm.xlu2 %5427, %v5561_v53  }
 0xe75   : > { %3120 = vperm.xlu2 %5427, %v3118_v13  }
 0xe7d   : > { %5432 = vset.pattern.permute.xlu2 %v6211_v9 }
 0xe7f   : > { %v3027_v46 = vpop.permute.xlu2 %3026 }
 0xe80   : > { %v3073_v32 = vperm.slane %v3027_v46, %v6228_v27 }
 0xe85   : > { %3151 = vperm.xlu2 %5432, %v3146_v60  }
 0xe87   : > { %v3030_v37 = vpop.permute.xlu2 %3029 }
 0xe88   : > { %v3074_v29 = vperm.slane %v3030_v37, %v6228_v27 }
 0xe8a   : > { %v3089_v0 = vsel %vm1900_vm15, %v3074_v29, %v3073_v32 }
 0xe8d   : > { %3158 = vperm.xlu2 %5432, %v3153_v44  }
 0xe8f   : > { %v3033_v56 = vpop.permute.xlu2 %3032 }
 0xe90   : > { %v3075_v62 = vperm.slane %v3033_v56, %v6228_v27 }
 0xe92   : > { %v3090_v41 = vsel %vm2130_vm0, %v3075_v62, %v3089_v0 }
 0xe95   : > { %5433 = vset.pattern.permute.xlu2 %v5810_v45  ;;  %v3045_v55 = vpop.permute.xlu1 %3044 }
 0xe96   : > { %v3042_v51 = vpop.permute.xlu0 %3041  ;;  %v3079_v6 = vperm.slane %v3045_v55, %v6228_v27 }
 0xe97   : > { %v3036_v19 = vpop.permute.xlu2 %3035  ;;  %v3078_v7 = vperm.slane %v3042_v51, %v6228_v27 }
 0xe98   : > { %v3076_v4 = vperm.slane %v3036_v19, %v6228_v27 }
 0xe9a   : > { %v3091_v16 = vsel %vm2132_vm2, %v3076_v4, %v3090_v41 }
 0xe9f   : > { %v3039_v40 = vpop.permute.xlu2 %3038 }
 0xea0   : > { %v3077_v15 = vperm.slane %v3039_v40, %v6228_v27 }
 0xea2   : > { %v3092_v42 = vsel %vm2134_vm3, %v3077_v15, %v3091_v16 }
 0xea3   : > { %v3093_v22 = vsel %vm2136_vm4, %v3078_v7, %v3092_v42 }
 0xea4   : > { %v3094_v52 = vsel %vm2138_vm1, %v3079_v6, %v3093_v22 }
 0xea7   : > { %v3048_v38 = vpop.permute.xlu2 %3047  ;;  %v3066_v26 = vpop.permute.xlu1 %3065 }
 0xea8   : > { %v3080_v14 = vperm.slane %v3048_v38, %v6228_v27  ;;  %v3054_v8 = vpop.permute.xlu0 %3053  ;;  %v3086_v30 = vperm.slane %v3066_v26, %v6228_v27 }
 0xea9   : > { %v3082_v24 = vperm.slane %v3054_v8, %v6228_v27 }
 0xeaa   : > { %v3095_v54 = vsel %vm2140_vm5, %v3080_v14, %v3094_v52 }
 0xeab   : > { %v3105_v5 = vsel %vm1865_vm13, %v3095_v54, 0.0 }
 0xeac   : > { %3106 = vadd.xlane.f32.xlu1 %v3105_v5 }
 0xeaf   : > { %v3051_v2 = vpop.permute.xlu2 %3050 }
 0xeb0   : > { %v3081_v39 = vperm.slane %v3051_v2, %v6228_v27  ;;  %v3060_v28 = vpop.permute.xlu0 %3059 }
 0xeb1   : > { %v3084_v48 = vperm.slane %v3060_v28, %v6228_v27 }
 0xeb2   : > { %v3096_v23 = vsel %vm1900_vm15, %v3082_v24, %v3081_v39 }
 0xeb7   : > { %v3057_v36 = vpop.permute.xlu2 %3056 }
 0xeb8   : > { %v3083_v10 = vperm.slane %v3057_v36, %v6228_v27  ;;  %v3069_v31 = vpop.permute.xlu0 %3068 }
 0xeb9   : > { %v3087_v20 = vperm.slane %v3069_v31, %v6228_v27 }
 0xeba   : > { %v3097_v25 = vsel %vm2130_vm0, %v3083_v10, %v3096_v23 }
 0xebb   : > { %v3098_v1 = vsel %vm2132_vm2, %v3084_v48, %v3097_v25 }
 0xebf   : > { %v3063_v3 = vpop.permute.xlu2 %3062 }
 0xec0   : > { %v3085_v34 = vperm.slane %v3063_v3, %v6228_v27 }
 0xec2   : > { %v3099_v50 = vsel %vm2134_vm3, %v3085_v34, %v3098_v1 }
 0xec3   : > { %v3100_v47 = vsel %vm2136_vm4, %v3086_v30, %v3099_v50 }
 0xec4   : > { %v3101_v46 = vsel %vm2138_vm1, %v3087_v20, %v3100_v47 }
 0xec7   : > { %v3072_v53 = vpop.permute.xlu2 %3071 }
 0xec8   : > { %v3088_v13 = vperm.slane %v3072_v53, %v6228_v27 }
 0xeca   : > { %v3102_v60 = vsel %vm2140_vm5, %v3088_v13, %v3101_v46 }
 0xecb   : > { %v3108_v37 = vsel %vm1865_vm13, %v3102_v60, 0.0 }
 0xecc   : > { %3109 = vadd.xlane.f32.xlu0 %v3108_v37 }
 0xecf   : > { %v3121_v44 = vpop.permute.xlu2 %3120 }
 0xed0   : > { %vm3122_vm12 = vcmp.eq.s32.totalorder %v3121_v44, 1 }
 0xedf   : > { %v3152_v29 = vpop.permute.xlu2 %3151 }
 0xee0   : > { %v3166_v4 = vperm.slane %v3152_v29, 4  ;;  %v3164_v40 = vperm.slane %v3152_v29, 2  ;;  %v3162_v51 = vperm.slane %v3152_v29, 0  ;;  %v3169_v22 = vperm.slane %v3152_v29, 7 }
 0xee1   : > { %v3163_v6 = vperm.slane %v3152_v29, 1  ;;  %v3165_v54 = vperm.slane %v3152_v29, 3  ;;  %v3167_v36 = vperm.slane %v3152_v29, 5  ;;  %v3168_v1 = vperm.slane %v3152_v29, 6 }
 0xee7   : > { %v3159_v24 = vpop.permute.xlu2 %3158 }
 0xee8   : > { %v3172_v48 = vperm.slane %v3159_v24, 2  ;;  %v3170_v26 = vperm.slane %v3159_v24, 0  ;;  %v3175_v37 = vperm.slane %v3159_v24, 5 }
 0xf1f   : > { %v3107_v56 = vpop.xlane.xlu1 %3106 }
 0xf20   : > { %5562 = vlog2.f32 %v3107_v56  ;;  %v3173_v56 = vperm.slane %v3159_v24, 3 }
 0xf26   : > { %v5563_v19 = vpop.eup %5562 }
 0xf27   : > { %v3112_v62 = vmul.f32 0.6931472, %v5563_v19  ;;  %v3171_v19 = vperm.slane %v3159_v24, 1 }
 0xf29   : > { %v3115_v32 = vadd.f32 %v3112_v62, %v6744_v33 }
 0xf2b   : > { %v3134_v0 = vadd.f32 %v3115_v32, %v6269_v11  ;;  %v3132_v15 = vadd.f32 %v3115_v32, %v6258_v12  ;;  %v3130_v41 = vadd.f32 %v3115_v32, %v6264_v63  ;;  %v3137_v33 = vadd.f32 %v3115_v32, %v6292_v35 }
 0xf2c   : > { %v3131_v7 = vadd.f32 %v3115_v32, %v6252_v57  ;;  %v3133_v52 = vadd.f32 %v3115_v32, %v6254_v58  ;;  %v3135_v8 = vadd.f32 %v3115_v32, %v6262_v61  ;;  %v3136_v25 = vadd.f32 %v3115_v32, %v6256_v59 }
 0xf2d   : > { %v6822_v16 = vadd.f32 %v3166_v4, %v3134_v0  ;;  %v6824_v42 = vadd.f32 %v3164_v40, %v3132_v15  ;;  %v6826_v55 = vadd.f32 %v3162_v51, %v3130_v41  ;;  %v6833_v38 = vadd.f32 %v3169_v22, %v3137_v33 }
 0xf2e   : > { %v6835_v14 = vadd.f32 %v3163_v6, %v3131_v7  ;;  %v6840_v5 = vadd.f32 %v3165_v54, %v3133_v52  ;;  %v6844_v28 = vadd.f32 %v3167_v36, %v3135_v8  ;;  %v6855_v31 = vadd.f32 %v3168_v1, %v3136_v25 }
 0xf2f   : > { %3239 = vperm.xlu0 %5431, %v6822_v16   ;;  %3233 = vperm.xlu1 %5426, %v6824_v42   ;;  %v3176_v4 = vperm.slane %v3159_v24, 6  ;;  %v3174_v40 = vperm.slane %v3159_v24, 4  ;;  %v3177_v51 = vperm.slane %v3159_v24, 7 }
 0xf30   : > { %3227 = vperm.xlu2 %5433, %v6826_v55  }
 0xf37   : > { %3248 = vperm.xlu1 %5426, %v6833_v38  }
 0xf38   : > { %3230 = vperm.xlu2 %5433, %v6835_v14  }
 0xf3f   : > { %v3110_v2 = vpop.xlane.xlu0 %3109 }
 0xf40   : > { %5564 = vlog2.f32 %v3110_v2  ;;  %3236 = vperm.xlu2 %5433, %v6840_v5  }
 0xf46   : > { %v5565_v39 = vpop.eup %5564 }
 0xf47   : > { %v3114_v10 = vmul.f32 0.6931472, %v5565_v39 }
 0xf48   : > { %3242 = vperm.xlu2 %5433, %v6844_v28  }
 0xf49   : > { %v3116_v23 = vadd.f32 %v3114_v10, %v6756_v49  ;;  %v3125_v49 = vperm.slane %v3115_v32, %v6228_v27 }
 0xf4b   : > { %v3140_v3 = vadd.f32 %v3116_v23, %v6258_v12  ;;  %v3138_v34 = vadd.f32 %v3116_v23, %v6264_v63  ;;  %v3126_v47 = vperm.slane %v3116_v23, %v6228_v27  ;;  %v3143_v20 = vadd.f32 %v3116_v23, %v6262_v61 }
 0xf4c   : > { %v3141_v53 = vadd.f32 %v3116_v23, %v6254_v58  ;;  %v3139_v46 = vadd.f32 %v3116_v23, %v6252_v57  ;;  %v3144_v44 = vadd.f32 %v3116_v23, %v6256_v59  ;;  %v3145_v41 = vadd.f32 %v3116_v23, %v6292_v35 }
 0xf4d   : > { %v6851_v50 = vadd.f32 %v3172_v48, %v3140_v3  ;;  %v6853_v30 = vadd.f32 %v3170_v26, %v3138_v34  ;;  %v3127_v13 = vsel %vm1900_vm15, %v3126_v47, %v3125_v49  ;;  %v6869_v29 = vadd.f32 %v3175_v37, %v3143_v20 }
 0xf4e   : > { %v6867_v60 = vsel %vm3122_vm12, %v3127_v13, %v6683_v17  ;;  %v6871_v62 = vadd.f32 %v3173_v56, %v3141_v53  ;;  %v6873_v32 = vadd.f32 %v3171_v19, %v3139_v46  ;;  %v3142_v17 = vadd.f32 %v3116_v23, %v6269_v11 }
 0xf4f   : > { %3257 = vperm.xlu1 %5426, %v6851_v50   ;;  %3251 = vperm.xlu0 %5431, %v6853_v30   ;;  %v6880_v0 = vadd.f32 %v3176_v4, %v3144_v44  ;;  %v6887_v33 = vadd.f32 %v3177_v51, %v3145_v41 }
 0xf50   : > { %3245 = vperm.xlu2 %5433, %v6855_v31   ;;  %v6882_v15 = vadd.f32 %v3174_v40, %v3142_v17 }
 0xf57   : > { %3266 = vperm.xlu1 %5426, %v6869_v29   ;;  %3260 = vperm.xlu0 %5431, %v6871_v62  }
 0xf58   : > { %3254 = vperm.xlu2 %5433, %v6873_v32  }
 0xf5f   : > { %3269 = vperm.xlu0 %5431, %v6880_v0  }
 0xf60   : > { %3263 = vperm.xlu2 %5433, %v6882_v15  }
 0xf68   : > { %3272 = vperm.xlu2 %5433, %v6887_v33  }
 0xf8a   : > { %v3228_v7 = vpop.permute.xlu2 %3227 }
 0xf8b   : > { %v3274_v54 = vperm.slane %v3228_v7, %v6228_v27 }
 0xf92   : > { %v3231_v22 = vpop.permute.xlu2 %3230 }
 0xf93   : > { %v3275_v52 = vperm.slane %v3231_v22, %v6228_v27 }
 0xf95   : > { %v3290_v39 = vsel %vm1900_vm15, %v3275_v52, %v3274_v54 }
 0xf9a   : > { %v3237_v6 = vpop.permute.xlu2 %3236 }
 0xf9b   : > { %v3277_v10 = vperm.slane %v3237_v6, %v6228_v27 }
 0xfa1   : > { %v3234_v2 = vpop.permute.xlu1 %3233  ;;  %v3240_v24 = vpop.permute.xlu0 %3239 }
 0xfa2   : > { %v3276_v8 = vperm.slane %v3234_v2, %v6228_v27  ;;  %v3243_v36 = vpop.permute.xlu2 %3242  ;;  %v3278_v3 = vperm.slane %v3240_v24, %v6228_v27 }
 0xfa3   : > { %v3279_v26 = vperm.slane %v3243_v36, %v6228_v27 }
 0xfa4   : > { %v3291_v23 = vsel %vm2130_vm0, %v3276_v8, %v3290_v39 }
 0xfa5   : > { %v3292_v25 = vsel %vm2132_vm2, %v3277_v10, %v3291_v23 }
 0xfa6   : > { %v3293_v34 = vsel %vm2134_vm3, %v3278_v3, %v3292_v25 }
 0xfa7   : > { %v3294_v20 = vsel %vm2136_vm4, %v3279_v26, %v3293_v34 }
 0xfa9   : > { %v3249_v48 = vpop.permute.xlu1 %3248 }
 0xfaa   : > { %v3281_v1 = vperm.slane %v3249_v48, %v6228_v27  ;;  %v3246_v49 = vpop.permute.xlu2 %3245 }
 0xfab   : > { %v3280_v47 = vperm.slane %v3246_v49, %v6228_v27 }
 0xfad   : > { %v3295_v53 = vsel %vm2138_vm1, %v3280_v47, %v3294_v20 }
 0xfae   : > { %v3296_v13 = vsel %vm2140_vm5, %v3281_v1, %v3295_v53 }
 0xfaf   : > { %v3306_v46 = vsel %vm1865_vm13, %v3296_v13, -inf }
 0xfb0   : > { %3307 = vmax.xlane.f32.xlu1 %v3306_v46 }
 0xfb2   : > { %v3255_v37 = vpop.permute.xlu2 %3254 }
 0xfb3   : > { %v3283_v4 = vperm.slane %v3255_v37, %v6228_v27 }
 0xfba   : > { %v3264_v17 = vpop.permute.xlu2 %3263 }
 0xfbb   : > { %v3286_v52 = vperm.slane %v3264_v17, %v6228_v27 }
 0xfc1   : > { %v3252_v56 = vpop.permute.xlu0 %3251  ;;  %v3258_v19 = vpop.permute.xlu1 %3257 }
 0xfc2   : > { %v3282_v44 = vperm.slane %v3252_v56, %v6228_v27  ;;  %v3284_v40 = vperm.slane %v3258_v19, %v6228_v27  ;;  %v3273_v2 = vpop.permute.xlu2 %3272 }
 0xfc3   : > { %v3289_v24 = vperm.slane %v3273_v2, %v6228_v27 }
 0xfc4   : > { %v3297_v41 = vsel %vm1900_vm15, %v3283_v4, %v3282_v44 }
 0xfc5   : > { %v3298_v22 = vsel %vm2130_vm0, %v3284_v40, %v3297_v41 }
 0xfc9   : > { %v3261_v51 = vpop.permute.xlu0 %3260  ;;  %v3267_v54 = vpop.permute.xlu1 %3266 }
 0xfca   : > { %v3285_v7 = vperm.slane %v3261_v51, %v6228_v27  ;;  %v3287_v36 = vperm.slane %v3267_v54, %v6228_v27 }
 0xfcc   : > { %v3299_v6 = vsel %vm2132_vm2, %v3285_v7, %v3298_v22 }
 0xfcd   : > { %v3300_v8 = vsel %vm2134_vm3, %v3286_v52, %v3299_v6 }
 0xfce   : > { %v3301_v23 = vsel %vm2136_vm4, %v3287_v36, %v3300_v8 }
 0xfd1   : > { %v3270_v39 = vpop.permute.xlu0 %3269 }
 0xfd2   : > { %v3288_v10 = vperm.slane %v3270_v39, %v6228_v27 }
 0xfd4   : > { %v3302_v25 = vsel %vm2138_vm1, %v3288_v10, %v3301_v23 }
 0xfd5   : > { %v3303_v3 = vsel %vm2140_vm5, %v3289_v24, %v3302_v25 }
 0xfd6   : > { %v3309_v48 = vsel %vm1865_vm13, %v3303_v3, -inf }
 0xfd7   : > { %3310 = vmax.xlane.f32.xlu0 %v3309_v48 }
0x1023   : > { %v6922_v34 = vpop.xlane.xlu1 %3307 }
0x1024   : > { %v3314_v26 = vperm.slane %v6922_v34, 0  ;;  %v3320_v1 = vperm.slane %v6922_v34, 6  ;;  %v3319_v49 = vperm.slane %v6922_v34, 5  ;;  %v3315_v47 = vperm.slane %v6922_v34, 1 }
0x1025   : > { %v3316_v44 = vperm.slane %v6922_v34, 2  ;;  %v3318_v7 = vperm.slane %v6922_v34, 4 }
0x1026   : > { %v3346_v20 = vsub.f32 %v6826_v55, %v3314_v26  ;;  %v3352_v53 = vsub.f32 %v6855_v31, %v3320_v1  ;;  %v3351_v13 = vsub.f32 %v6844_v28, %v3319_v49  ;;  %v3347_v56 = vsub.f32 %v6835_v14, %v3315_v47 }
0x1027   : > { %v3348_v55 = vsub.f32 %v6824_v42, %v3316_v44  ;;  %v3317_v28 = vperm.slane %v6922_v34, 3  ;;  %v3350_v52 = vsub.f32 %v6822_v16, %v3318_v7  ;;  %v3321_v42 = vperm.slane %v6922_v34, 7 }
0x1028   : > { %v3362_v46 = vmul.f32 1.442695, %v3346_v20  ;;  %v3374_v37 = vmul.f32 1.442695, %v3352_v53  ;;  %v3372_v19 = vmul.f32 1.442695, %v3351_v13 }
0x1029   : > { %v3364_v17 = vmul.f32 1.442695, %v3347_v56  ;;  %v3366_v31 = vmul.f32 1.442695, %v3348_v55  ;;  %v3349_v51 = vsub.f32 %v6840_v5, %v3317_v28  ;;  %v3370_v54 = vmul.f32 1.442695, %v3350_v52 }
0x102a   : > { %5566 = vpow2.f32 %v3362_v46  ;;  %v3353_v8 = vsub.f32 %v6833_v38, %v3321_v42 }
0x102b   : > { %5568 = vpow2.f32 %v3374_v37  ;;  %v3368_v22 = vmul.f32 1.442695, %v3349_v51 }
0x102c   : > { %5570 = vpow2.f32 %v3372_v19  ;;  %v3376_v39 = vmul.f32 1.442695, %v3353_v8 }
0x102d   : > { %5572 = vpow2.f32 %v3364_v17 }
0x102e   : > { %5574 = vpow2.f32 %v3366_v31 }
0x102f   : > { %5576 = vpow2.f32 %v3368_v22  ;;  %v3538_v22 = vperm.slane %v6223_v21, 5 }
0x1030   : > { %v5567_v4 = vpop.eup %5566  ;;  %5578 = vpow2.f32 %v3370_v54 }
0x1031   : > { %v5569_v40 = vpop.eup %5568  ;;  %3411 = vperm.xlu2 %5433, %v5567_v4   ;;  %5580 = vpow2.f32 %v3376_v39 }
0x1032   : > { %v5571_v41 = vpop.eup %5570  ;;  %3429 = vperm.xlu0 %5431, %v5569_v40  }
0x1033   : > { %3426 = vperm.xlu1 %5426, %v5571_v41   ;;  %v5573_v14 = vpop.eup %5572 }
0x1034   : > { %v5575_v6 = vpop.eup %5574 }
0x1035   : > { %v5577_v2 = vpop.eup %5576 }
0x1036   : > { %v5579_v48 = vpop.eup %5578 }
0x1039   : > { %3414 = vperm.xlu2 %5433, %v5573_v14   ;;  %v6961_v14 = vld [vmem:[%s7705_s18] sm:$0x3] }
0x103a   : > { %vm3502_vm14 = vcmp.eq.s32.totalorder %v6961_v14, 5  ;;  %vm3887_vm7 = vcmp.eq.s32.totalorder %v6961_v14, 6 }
0x1041   : > { %3417 = vperm.xlu2 %5433, %v5575_v6  }
0x1049   : > { %3420 = vperm.xlu2 %5433, %v5577_v2  }
0x104a   : > { %v6940_v36 = vpop.xlane.xlu0 %3310 }
0x104b   : > { %v3324_v5 = vperm.slane %v6940_v36, 2  ;;  %v3325_v10 = vperm.slane %v6940_v36, 3  ;;  %v3328_v24 = vperm.slane %v6940_v36, 6  ;;  %v3327_v16 = vperm.slane %v6940_v36, 5 }
0x104c   : > { %v3322_v25 = vperm.slane %v6940_v36, 0  ;;  %v3323_v13 = vperm.slane %v6940_v36, 1  ;;  %v3326_v56 = vperm.slane %v6940_v36, 4  ;;  %v3329_v4 = vperm.slane %v6940_v36, 7 }
0x104d   : > { %v3356_v23 = vsub.f32 %v6851_v50, %v3324_v5  ;;  %v3357_v3 = vsub.f32 %v6871_v62, %v3325_v10  ;;  %v3360_v1 = vsub.f32 %v6880_v0, %v3328_v24  ;;  %v3359_v49 = vsub.f32 %v6869_v29, %v3327_v16  ;;  %v5581_v50 = vpop.eup %5580 }
0x104e   : > { %v3354_v47 = vsub.f32 %v6853_v30, %v3322_v25  ;;  %v3355_v0 = vsub.f32 %v6873_v32, %v3323_v13  ;;  %v3358_v17 = vsub.f32 %v6882_v15, %v3326_v56  ;;  %v3361_v32 = vsub.f32 %v6887_v33, %v3329_v4 }
0x104f   : > { %v3382_v38 = vmul.f32 1.442695, %v3356_v23  ;;  %v3384_v26 = vmul.f32 1.442695, %v3357_v3  ;;  %v3390_v20 = vmul.f32 1.442695, %v3360_v1 }
0x1050   : > { %v3388_v53 = vmul.f32 1.442695, %v3359_v49  ;;  %v3378_v46 = vmul.f32 1.442695, %v3354_v47  ;;  %v3380_v30 = vmul.f32 1.442695, %v3355_v0 }
0x1051   : > { %3423 = vperm.xlu2 %5433, %v5579_v48   ;;  %5582 = vpow2.f32 %v3382_v38  ;;  %v3386_v40 = vmul.f32 1.442695, %v3358_v17  ;;  %v3392_v55 = vmul.f32 1.442695, %v3361_v32  ;;  %v3503_v15 = vsel %vm3502_vm14, 1, %v5810_v45 }
0x1052   : > { %5584 = vpow2.f32 %v3384_v26  ;;  %v3531_v33 = vperm.slane %v6220_v18, 5 }
0x1053   : > { %5586 = vpow2.f32 %v3390_v20 }
0x1054   : > { %5588 = vpow2.f32 %v3388_v53 }
0x1055   : > { %5590 = vpow2.f32 %v3378_v46 }
0x1056   : > { %5592 = vpow2.f32 %v3380_v30 }
0x1057   : > { %v5583_v62 = vpop.eup %5582  ;;  %5594 = vpow2.f32 %v3386_v40 }
0x1058   : > { %v5585_v37 = vpop.eup %5584  ;;  %3441 = vperm.xlu0 %5431, %v5583_v62   ;;  %5596 = vpow2.f32 %v3392_v55 }
0x1059   : > { %3432 = vperm.xlu2 %5433, %v5581_v50   ;;  %3444 = vperm.xlu1 %5426, %v5585_v37   ;;  %v5587_v29 = vpop.eup %5586 }
0x105a   : > { %v5589_v19 = vpop.eup %5588 }
0x105b   : > { %v5591_v44 = vpop.eup %5590 }
0x105c   : > { %v5593_v41 = vpop.eup %5592 }
0x105d   : > { %v5595_v28 = vpop.eup %5594 }
0x105e   : > { %v5597_v31 = vpop.eup %5596 }
0x1060   : > { %3450 = vperm.xlu0 %5431, %v5589_v19  }
0x1061   : > { %3453 = vperm.xlu1 %5426, %v5587_v29   ;;  %3435 = vperm.xlu2 %5433, %v5591_v44  }
0x1069   : > { %3438 = vperm.xlu2 %5433, %v5593_v41  }
0x1071   : > { %3447 = vperm.xlu2 %5433, %v5595_v28  }
0x1079   : > { %3456 = vperm.xlu2 %5433, %v5597_v31  }
0x1081   : > { %3505 = vperm.xlu2 %5433, %v3503_v15  }
0x1089   : > { %5434 = vset.pattern.permute.xlu2 %v6211_v9 }
0x108b   : > { %v3412_v51 = vpop.permute.xlu2 %3411 }
0x108c   : > { %v3458_v2 = vperm.slane %v3412_v51, %v6228_v27 }
0x1091   : > { %3536 = vperm.xlu2 %5434, %v3531_v33  }
0x1093   : > { %v3415_v7 = vpop.permute.xlu2 %3414 }
0x1094   : > { %v3459_v42 = vperm.slane %v3415_v7, %v6228_v27 }
0x1096   : > { %v3474_v39 = vsel %vm1900_vm15, %v3459_v42, %v3458_v2 }
0x1099   : > { %3543 = vperm.xlu2 %5434, %v3538_v22  }
0x109b   : > { %v3418_v6 = vpop.permute.xlu2 %3417 }
0x109c   : > { %v3460_v54 = vperm.slane %v3418_v6, %v6228_v27 }
0x109e   : > { %v3475_v24 = vsel %vm2130_vm0, %v3460_v54, %v3474_v39 }
0x10a1   : > { %5435 = vset.pattern.permute.xlu2 %v5810_v45 }
0x10a3   : > { %v3421_v52 = vpop.permute.xlu2 %3420 }
0x10a4   : > { %v3461_v8 = vperm.slane %v3421_v52, %v6228_v27  ;;  %v3430_v38 = vpop.permute.xlu0 %3429 }
0x10a5   : > { %v3427_v16 = vpop.permute.xlu1 %3426  ;;  %v3464_v26 = vperm.slane %v3430_v38, %v6228_v27 }
0x10a6   : > { %v3476_v23 = vsel %vm2132_vm2, %v3461_v8, %v3475_v24  ;;  %v3463_v3 = vperm.slane %v3427_v16, %v6228_v27 }
0x10ab   : > { %v3424_v5 = vpop.permute.xlu2 %3423 }
0x10ac   : > { %v3462_v10 = vperm.slane %v3424_v5, %v6228_v27 }
0x10ae   : > { %v3477_v25 = vsel %vm2134_vm3, %v3462_v10, %v3476_v23 }
0x10af   : > { %v3478_v48 = vsel %vm2136_vm4, %v3463_v3, %v3477_v25 }
0x10b0   : > { %v3479_v47 = vsel %vm2138_vm1, %v3464_v26, %v3478_v48 }
0x10b3   : > { %v3433_v1 = vpop.permute.xlu2 %3432 }
0x10b4   : > { %v3465_v49 = vperm.slane %v3433_v1, %v6228_v27 }
0x10b6   : > { %v3480_v20 = vsel %vm2140_vm5, %v3465_v49, %v3479_v47 }
0x10b7   : > { %v3490_v53 = vsel %vm1865_vm13, %v3480_v20, 0.0 }
0x10b8   : > { %3491 = vadd.xlane.f32.xlu0 %v3490_v53 }
0x10bb   : > { %v3436_v50 = vpop.permute.xlu2 %3435 }
0x10bc   : > { %v3466_v37 = vperm.slane %v3436_v50, %v6228_v27 }
0x10c3   : > { %v3439_v13 = vpop.permute.xlu2 %3438 }
0x10c4   : > { %v3467_v46 = vperm.slane %v3439_v13, %v6228_v27 }
0x10c6   : > { %v3481_v30 = vsel %vm1900_vm15, %v3467_v46, %v3466_v37 }
0x10ca   : > { %v3442_v62 = vpop.permute.xlu0 %3441 }
0x10cb   : > { %v3445_v0 = vpop.permute.xlu1 %3444  ;;  %v3468_v29 = vperm.slane %v3442_v62, %v6228_v27  ;;  %v3448_v56 = vpop.permute.xlu2 %3447 }
0x10cc   : > { %v3469_v19 = vperm.slane %v3445_v0, %v6228_v27  ;;  %v3470_v4 = vperm.slane %v3448_v56, %v6228_v27 }
0x10cd   : > { %v3482_v44 = vsel %vm2130_vm0, %v3468_v29, %v3481_v30 }
0x10ce   : > { %v3483_v17 = vsel %vm2132_vm2, %v3469_v19, %v3482_v44 }
0x10cf   : > { %v3484_v28 = vsel %vm2134_vm3, %v3470_v4, %v3483_v17 }
0x10d2   : > { %v3451_v40 = vpop.permute.xlu0 %3450 }
0x10d3   : > { %v3454_v41 = vpop.permute.xlu1 %3453  ;;  %v3471_v32 = vperm.slane %v3451_v40, %v6228_v27  ;;  %v3457_v55 = vpop.permute.xlu2 %3456 }
0x10d4   : > { %v3472_v31 = vperm.slane %v3454_v41, %v6228_v27  ;;  %v3473_v15 = vperm.slane %v3457_v55, %v6228_v27 }
0x10d5   : > { %v3485_v51 = vsel %vm2136_vm4, %v3471_v32, %v3484_v28 }
0x10d6   : > { %v3486_v33 = vsel %vm2138_vm1, %v3472_v31, %v3485_v51 }
0x10d7   : > { %v3487_v7 = vsel %vm2140_vm5, %v3473_v15, %v3486_v33 }
0x10d8   : > { %v3493_v22 = vsel %vm1865_vm13, %v3487_v7, 0.0 }
0x10d9   : > { %3494 = vadd.xlane.f32.xlu1 %v3493_v22 }
0x10db   : > { %v3506_v6 = vpop.permute.xlu2 %3505 }
0x10dc   : > { %vm3507_vm6 = vcmp.eq.s32.totalorder %v3506_v6, 1 }
0x10eb   : > { %v3537_v54 = vpop.permute.xlu2 %3536 }
0x10ec   : > { %v3551_v5 = vperm.slane %v3537_v54, 4  ;;  %v3549_v39 = vperm.slane %v3537_v54, 2  ;;  %v3547_v23 = vperm.slane %v3537_v54, 0  ;;  %v3554_v26 = vperm.slane %v3537_v54, 7 }
0x10ed   : > { %v3548_v1 = vperm.slane %v3537_v54, 1  ;;  %v3550_v53 = vperm.slane %v3537_v54, 3  ;;  %v3552_v62 = vperm.slane %v3537_v54, 5  ;;  %v3553_v44 = vperm.slane %v3537_v54, 6 }
0x10f3   : > { %v3544_v56 = vpop.permute.xlu2 %3543 }
0x10f4   : > { %v3557_v4 = vperm.slane %v3544_v56, 2  ;;  %v3556_v41 = vperm.slane %v3544_v56, 1  ;;  %v3559_v54 = vperm.slane %v3544_v56, 4 }
0x112b   : > { %v3492_v52 = vpop.xlane.xlu0 %3491 }
0x112c   : > { %5598 = vlog2.f32 %v3492_v52  ;;  %v3555_v52 = vperm.slane %v3544_v56, 0 }
0x1132   : > { %v5599_v42 = vpop.eup %5598 }
0x1133   : > { %v3497_v2 = vmul.f32 0.6931472, %v5599_v42  ;;  %v3560_v42 = vperm.slane %v3544_v56, 5 }
0x1135   : > { %v3500_v8 = vadd.f32 %v3497_v2, %v6922_v34 }
0x1137   : > { %v3519_v10 = vadd.f32 %v3500_v8, %v6269_v11  ;;  %v3517_v24 = vadd.f32 %v3500_v8, %v6258_v12  ;;  %v3515_v16 = vadd.f32 %v3500_v8, %v6264_v63  ;;  %v3522_v34 = vadd.f32 %v3500_v8, %v6292_v35 }
0x1138   : > { %v3516_v48 = vadd.f32 %v3500_v8, %v6252_v57  ;;  %v3518_v20 = vadd.f32 %v3500_v8, %v6254_v58  ;;  %v3520_v46 = vadd.f32 %v3500_v8, %v6262_v61  ;;  %v3521_v19 = vadd.f32 %v3500_v8, %v6256_v59 }
0x1139   : > { %v7005_v25 = vadd.f32 %v3551_v5, %v3519_v10  ;;  %v7007_v3 = vadd.f32 %v3549_v39, %v3517_v24  ;;  %v7009_v38 = vadd.f32 %v3547_v23, %v3515_v16  ;;  %v7016_v49 = vadd.f32 %v3554_v26, %v3522_v34 }
0x113a   : > { %v7018_v47 = vadd.f32 %v3548_v1, %v3516_v48  ;;  %v7023_v50 = vadd.f32 %v3550_v53, %v3518_v20  ;;  %v7027_v37 = vadd.f32 %v3552_v62, %v3520_v46  ;;  %v7034_v32 = vadd.f32 %v3553_v44, %v3521_v19 }
0x113b   : > { %3624 = vperm.xlu1 %5426, %v7005_v25   ;;  %3618 = vperm.xlu0 %5431, %v7007_v3   ;;  %v3558_v39 = vperm.slane %v3544_v56, 3  ;;  %v3562_v10 = vperm.slane %v3544_v56, 7  ;;  %v3561_v34 = vperm.slane %v3544_v56, 6 }
0x113c   : > { %3612 = vperm.xlu2 %5435, %v7009_v38  }
0x1143   : > { %3633 = vperm.xlu0 %5431, %v7016_v49  }
0x1144   : > { %3615 = vperm.xlu2 %5435, %v7018_v47  }
0x114c   : > { %3621 = vperm.xlu2 %5435, %v7023_v50   ;;  %v3495_v13 = vpop.xlane.xlu1 %3494 }
0x114d   : > { %5600 = vlog2.f32 %v3495_v13 }
0x1153   : > { %v5601_v0 = vpop.eup %5600 }
0x1154   : > { %v3499_v29 = vmul.f32 0.6931472, %v5601_v0  ;;  %3627 = vperm.xlu2 %5435, %v7027_v37  }
0x1156   : > { %v3501_v30 = vadd.f32 %v3499_v29, %v6940_v36  ;;  %v3510_v36 = vperm.slane %v3500_v8, %v6228_v27 }
0x1158   : > { %v3525_v17 = vadd.f32 %v3501_v30, %v6258_v12  ;;  %v3524_v40 = vadd.f32 %v3501_v30, %v6252_v57  ;;  %v3511_v31 = vperm.slane %v3501_v30, %v6228_v27  ;;  %v3523_v15 = vadd.f32 %v3501_v30, %v6264_v63 }
0x1159   : > { %v3528_v51 = vadd.f32 %v3501_v30, %v6262_v61  ;;  %v3527_v7 = vadd.f32 %v3501_v30, %v6269_v11  ;;  %v3526_v6 = vadd.f32 %v3501_v30, %v6254_v58  ;;  %v3529_v23 = vadd.f32 %v3501_v30, %v6256_v59 }
0x115a   : > { %v7036_v55 = vadd.f32 %v3557_v4, %v3525_v17  ;;  %v7038_v28 = vadd.f32 %v3556_v41, %v3524_v40  ;;  %v3512_v33 = vsel %vm1900_vm15, %v3511_v31, %v3510_v36  ;;  %v7052_v2 = vadd.f32 %v3555_v52, %v3523_v15 }
0x115b   : > { %v7050_v22 = vsel %vm3507_vm6, %v3512_v33, %v6867_v60  ;;  %v7054_v8 = vadd.f32 %v3560_v42, %v3528_v51  ;;  %v7056_v5 = vadd.f32 %v3559_v54, %v3527_v7  ;;  %v3530_v60 = vadd.f32 %v3501_v30, %v6292_v35 }
0x115c   : > { %3630 = vperm.xlu2 %5435, %v7034_v32   ;;  %3642 = vperm.xlu1 %5426, %v7036_v55   ;;  %v7063_v24 = vadd.f32 %v3558_v39, %v3526_v6  ;;  %v7070_v48 = vadd.f32 %v3561_v34, %v3529_v23 }
0x115d   : > { %3639 = vperm.xlu0 %5431, %v7038_v28   ;;  %v7065_v16 = vadd.f32 %v3562_v10, %v3530_v60 }
0x1164   : > { %3636 = vperm.xlu2 %5435, %v7052_v2   ;;  %3651 = vperm.xlu1 %5426, %v7054_v8  }
0x1165   : > { %3648 = vperm.xlu0 %5431, %v7056_v5  }
0x116c   : > { %3645 = vperm.xlu2 %5435, %v7063_v24  }
0x116d   : > { %3657 = vperm.xlu0 %5431, %v7065_v16  }
0x1174   : > { %3654 = vperm.xlu2 %5435, %v7070_v48  }
0x1196   : > { %v3613_v26 = vpop.permute.xlu2 %3612 }
0x1197   : > { %v3659_v13 = vperm.slane %v3613_v26, %v6228_v27 }
0x119e   : > { %v3616_v1 = vpop.permute.xlu2 %3615 }
0x119f   : > { %v3660_v53 = vperm.slane %v3616_v1, %v6228_v27 }
0x11a1   : > { %v3675_v29 = vsel %vm1900_vm15, %v3660_v53, %v3659_v13 }
0x11a6   : > { %v3622_v20 = vpop.permute.xlu2 %3621 }
0x11a7   : > { %v3662_v30 = vperm.slane %v3622_v20, %v6228_v27 }
0x11ad   : > { %v3619_v46 = vpop.permute.xlu0 %3618  ;;  %v3625_v56 = vpop.permute.xlu1 %3624 }
0x11ae   : > { %v3661_v62 = vperm.slane %v3619_v46, %v6228_v27  ;;  %v3628_v0 = vpop.permute.xlu2 %3627  ;;  %v3663_v17 = vperm.slane %v3625_v56, %v6228_v27 }
0x11af   : > { %v3664_v41 = vperm.slane %v3628_v0, %v6228_v27 }
0x11b0   : > { %v3676_v19 = vsel %vm2130_vm0, %v3661_v62, %v3675_v29 }
0x11b1   : > { %v3677_v44 = vsel %vm2132_vm2, %v3662_v30, %v3676_v19 }
0x11b2   : > { %v3678_v4 = vsel %vm2134_vm3, %v3663_v17, %v3677_v44 }
0x11b3   : > { %v3679_v51 = vsel %vm2136_vm4, %v3664_v41, %v3678_v4 }
0x11b5   : > { %v3634_v40 = vpop.permute.xlu0 %3633 }
0x11b6   : > { %v3666_v36 = vperm.slane %v3634_v40, %v6228_v27  ;;  %v3631_v31 = vpop.permute.xlu2 %3630 }
0x11b7   : > { %v3665_v15 = vperm.slane %v3631_v31, %v6228_v27 }
0x11b9   : > { %v3680_v33 = vsel %vm2138_vm1, %v3665_v15, %v3679_v51 }
0x11ba   : > { %v3681_v7 = vsel %vm2140_vm5, %v3666_v36, %v3680_v33 }
0x11bb   : > { %v3691_v52 = vsel %vm1865_vm13, %v3681_v7, -inf }
0x11bc   : > { %3692 = vmax.xlane.f32.xlu1 %v3691_v52 }
0x11be   : > { %v3637_v42 = vpop.permute.xlu2 %3636 }
0x11bf   : > { %v3667_v39 = vperm.slane %v3637_v42, %v6228_v27 }
0x11c6   : > { %v3646_v10 = vpop.permute.xlu2 %3645 }
0x11c7   : > { %v3670_v53 = vperm.slane %v3646_v10, %v6228_v27 }
0x11ce   : > { %v3643_v54 = vpop.permute.xlu1 %3642  ;;  %v3655_v29 = vpop.permute.xlu2 %3654 }
0x11cf   : > { %v3640_v6 = vpop.permute.xlu0 %3639  ;;  %v3669_v23 = vperm.slane %v3643_v54, %v6228_v27  ;;  %v3673_v56 = vperm.slane %v3655_v29, %v6228_v27 }
0x11d0   : > { %v3668_v60 = vperm.slane %v3640_v6, %v6228_v27 }
0x11d2   : > { %v3682_v34 = vsel %vm1900_vm15, %v3668_v60, %v3667_v39 }
0x11d3   : > { %v3683_v26 = vsel %vm2130_vm0, %v3669_v23, %v3682_v34 }
0x11d4   : > { %v3684_v62 = vsel %vm2132_vm2, %v3670_v53, %v3683_v26 }
0x11d6   : > { %v3652_v1 = vpop.permute.xlu1 %3651 }
0x11d7   : > { %v3649_v20 = vpop.permute.xlu0 %3648  ;;  %v3672_v46 = vperm.slane %v3652_v1, %v6228_v27 }
0x11d8   : > { %v3671_v13 = vperm.slane %v3649_v20, %v6228_v27 }
0x11da   : > { %v3685_v0 = vsel %vm2134_vm3, %v3671_v13, %v3684_v62 }
0x11db   : > { %v3686_v30 = vsel %vm2136_vm4, %v3672_v46, %v3685_v0 }
0x11dc   : > { %v3687_v17 = vsel %vm2138_vm1, %v3673_v56, %v3686_v30 }
0x11df   : > { %v3658_v19 = vpop.permute.xlu0 %3657 }
0x11e0   : > { %v3674_v44 = vperm.slane %v3658_v19, %v6228_v27 }
0x11e2   : > { %v3688_v4 = vsel %vm2140_vm5, %v3674_v44, %v3687_v17 }
0x11e3   : > { %v3694_v40 = vsel %vm1865_vm13, %v3688_v4, -inf }
0x11e4   : > { %3695 = vmax.xlane.f32.xlu2 %v3694_v40 }
0x122f   : > { %v7105_v41 = vpop.xlane.xlu1 %3692 }
0x1230   : > { %v3699_v36 = vperm.slane %v7105_v41, 0  ;;  %v3704_v31 = vperm.slane %v7105_v41, 5  ;;  %v3705_v15 = vperm.slane %v7105_v41, 6  ;;  %v3700_v51 = vperm.slane %v7105_v41, 1 }
0x1231   : > { %v3701_v39 = vperm.slane %v7105_v41, 2  ;;  %v3703_v20 = vperm.slane %v7105_v41, 4 }
0x1232   : > { %v3731_v33 = vsub.f32 %v7009_v38, %v3699_v36  ;;  %v3736_v7 = vsub.f32 %v7027_v37, %v3704_v31  ;;  %v3737_v52 = vsub.f32 %v7034_v32, %v3705_v15  ;;  %v3732_v6 = vsub.f32 %v7018_v47, %v3700_v51 }
0x1233   : > { %v3733_v38 = vsub.f32 %v7007_v3, %v3701_v39  ;;  %v3702_v37 = vperm.slane %v7105_v41, 3  ;;  %v3735_v46 = vsub.f32 %v7005_v25, %v3703_v20  ;;  %v3706_v3 = vperm.slane %v7105_v41, 7 }
0x1234   : > { %v3747_v42 = vmul.f32 1.442695, %v3731_v33  ;;  %v3757_v54 = vmul.f32 1.442695, %v3736_v7  ;;  %v3759_v60 = vmul.f32 1.442695, %v3737_v52 }
0x1235   : > { %v3749_v10 = vmul.f32 1.442695, %v3732_v6  ;;  %v3751_v32 = vmul.f32 1.442695, %v3733_v38  ;;  %v3734_v1 = vsub.f32 %v7023_v50, %v3702_v37  ;;  %v3755_v62 = vmul.f32 1.442695, %v3735_v46 }
0x1236   : > { %5602 = vpow2.f32 %v3747_v42  ;;  %v3738_v29 = vsub.f32 %v7016_v49, %v3706_v3 }
0x1237   : > { %5604 = vpow2.f32 %v3757_v54  ;;  %v3753_v53 = vmul.f32 1.442695, %v3734_v1  ;;  %v3923_v1 = vperm.slane %v6223_v21, 6 }
0x1238   : > { %5606 = vpow2.f32 %v3759_v60  ;;  %v3761_v19 = vmul.f32 1.442695, %v3738_v29 }
0x1239   : > { %5608 = vpow2.f32 %v3749_v10 }
0x123a   : > { %5610 = vpow2.f32 %v3751_v32 }
0x123b   : > { %5612 = vpow2.f32 %v3753_v53 }
0x123c   : > { %v5603_v23 = vpop.eup %5602  ;;  %5614 = vpow2.f32 %v3755_v62 }
0x123d   : > { %v5605_v34 = vpop.eup %5604  ;;  %3796 = vperm.xlu0 %5431, %v5603_v23   ;;  %5616 = vpow2.f32 %v3761_v19 }
0x123e   : > { %v5607_v26 = vpop.eup %5606  ;;  %3811 = vperm.xlu1 %5426, %v5605_v34  }
0x123f   : > { %3814 = vperm.xlu2 %5435, %v5607_v26   ;;  %v5609_v47 = vpop.eup %5608 }
0x1240   : > { %v5611_v13 = vpop.eup %5610 }
0x1241   : > { %v5613_v0 = vpop.eup %5612 }
0x1242   : > { %v5615_v49 = vpop.eup %5614 }
0x1245   : > { %3799 = vperm.xlu0 %5431, %v5609_v47  }
0x124d   : > { %3802 = vperm.xlu0 %5431, %v5611_v13  }
0x1255   : > { %3805 = vperm.xlu0 %5431, %v5613_v0  }
0x1257   : > { %v7123_v30 = vpop.xlane.xlu2 %3695 }
0x1258   : > { %v3709_v50 = vperm.slane %v7123_v30, 2  ;;  %v3710_v56 = vperm.slane %v7123_v30, 3  ;;  %v3707_v44 = vperm.slane %v7123_v30, 0  ;;  %v3712_v25 = vperm.slane %v7123_v30, 5 }
0x1259   : > { %v3713_v40 = vperm.slane %v7123_v30, 6  ;;  %v3714_v34 = vperm.slane %v7123_v30, 7 }
0x125a   : > { %v3741_v17 = vsub.f32 %v7036_v55, %v3709_v50  ;;  %v3742_v4 = vsub.f32 %v7063_v24, %v3710_v56  ;;  %v3739_v31 = vsub.f32 %v7052_v2, %v3707_v44  ;;  %v3744_v51 = vsub.f32 %v7054_v8, %v3712_v25  ;;  %v5617_v24 = vpop.eup %5616 }
0x125b   : > { %v3745_v33 = vsub.f32 %v7070_v48, %v3713_v40  ;;  %v3708_v55 = vperm.slane %v7123_v30, 1  ;;  %v3711_v8 = vperm.slane %v7123_v30, 4 }
0x125c   : > { %v3767_v36 = vmul.f32 1.442695, %v3741_v17  ;;  %v3769_v15 = vmul.f32 1.442695, %v3742_v4  ;;  %v3763_v7 = vmul.f32 1.442695, %v3739_v31 }
0x125d   : > { %3808 = vperm.xlu0 %5431, %v5615_v49   ;;  %v3773_v52 = vmul.f32 1.442695, %v3744_v51  ;;  %v3775_v42 = vmul.f32 1.442695, %v3745_v33  ;;  %v3740_v2 = vsub.f32 %v7038_v28, %v3708_v55  ;;  %v3743_v23 = vsub.f32 %v7056_v5, %v3711_v8 }
0x125e   : > { %5618 = vpow2.f32 %v3767_v36  ;;  %v3746_v28 = vsub.f32 %v7065_v16, %v3714_v34  ;;  %v3916_v5 = vperm.slane %v6220_v18, 6 }
0x125f   : > { %5620 = vpow2.f32 %v3769_v15  ;;  %v3765_v48 = vmul.f32 1.442695, %v3740_v2  ;;  %v3771_v26 = vmul.f32 1.442695, %v3743_v23 }
0x1260   : > { %5622 = vpow2.f32 %v3763_v7  ;;  %v3777_v37 = vmul.f32 1.442695, %v3746_v28 }
0x1261   : > { %5624 = vpow2.f32 %v3773_v52 }
0x1262   : > { %5626 = vpow2.f32 %v3775_v42 }
0x1263   : > { %5628 = vpow2.f32 %v3765_v48 }
0x1264   : > { %v5619_v54 = vpop.eup %5618  ;;  %5630 = vpow2.f32 %v3771_v26 }
0x1265   : > { %v5621_v6 = vpop.eup %5620  ;;  %3817 = vperm.xlu0 %5431, %v5617_v24   ;;  %3826 = vperm.xlu1 %5426, %v5619_v54   ;;  %5632 = vpow2.f32 %v3777_v37  ;;  %v3888_v54 = vsel %vm3887_vm7, 1, %v5810_v45 }
0x1266   : > { %3829 = vperm.xlu2 %5435, %v5621_v6   ;;  %v5623_v60 = vpop.eup %5622 }
0x1267   : > { %v5625_v39 = vpop.eup %5624 }
0x1268   : > { %v5627_v10 = vpop.eup %5626 }
0x1269   : > { %v5629_v38 = vpop.eup %5628 }
0x126a   : > { %v5631_v32 = vpop.eup %5630 }
0x126b   : > { %v5633_v47 = vpop.eup %5632 }
0x126d   : > { %3820 = vperm.xlu0 %5431, %v5623_v60   ;;  %3835 = vperm.xlu1 %5426, %v5625_v39  }
0x126e   : > { %3838 = vperm.xlu2 %5435, %v5627_v10  }
0x1275   : > { %3823 = vperm.xlu0 %5431, %v5629_v38  }
0x127d   : > { %3832 = vperm.xlu0 %5431, %v5631_v32  }
0x1285   : > { %3841 = vperm.xlu0 %5431, %v5633_v47  }
0x128d   : > { %5436 = vset.pattern.permute.xlu0 %v6211_v9 }
0x1295   : > { %3921 = vperm.xlu0 %5436, %v3916_v5  }
0x1299   : > { %v3815_v4 = vpop.permute.xlu2 %3814 }
0x129a   : > { %v3849_v36 = vperm.slane %v3815_v4, %v6228_v27 }
0x129d   : > { %3928 = vperm.xlu0 %5436, %v3923_v1  }
0x12a5   : > { %5437 = vset.pattern.permute.xlu0 %v5810_v45 }
0x12a6   : > { %3890 = vperm.xlu0 %5437, %v3888_v54  }
0x12af   : > { %v3797_v20 = vpop.permute.xlu0 %3796 }
0x12b0   : > { %v3843_v62 = vperm.slane %v3797_v20, %v6228_v27  ;;  %v3812_v19 = vpop.permute.xlu1 %3811 }
0x12b1   : > { %v3848_v40 = vperm.slane %v3812_v19, %v6228_v27 }
0x12b7   : > { %v3800_v53 = vpop.permute.xlu0 %3799 }
0x12b8   : > { %v3844_v46 = vperm.slane %v3800_v53, %v6228_v27 }
0x12ba   : > { %v3859_v50 = vsel %vm1900_vm15, %v3844_v46, %v3843_v62 }
0x12bf   : > { %v3803_v16 = vpop.permute.xlu0 %3802 }
0x12c0   : > { %v3845_v3 = vperm.slane %v3803_v16, %v6228_v27  ;;  %v3830_v6 = vpop.permute.xlu2 %3829 }
0x12c1   : > { %v3854_v10 = vperm.slane %v3830_v6, %v6228_v27 }
0x12c2   : > { %v3860_v44 = vsel %vm2130_vm0, %v3845_v3, %v3859_v50 }
0x12c7   : > { %v3806_v13 = vpop.permute.xlu0 %3805 }
0x12c8   : > { %v3846_v0 = vperm.slane %v3806_v13, %v6228_v27  ;;  %v3839_v38 = vpop.permute.xlu2 %3838 }
0x12c9   : > { %v3857_v32 = vperm.slane %v3839_v38, %v6228_v27 }
0x12ca   : > { %v3861_v25 = vsel %vm2132_vm2, %v3846_v0, %v3860_v44 }
0x12cf   : > { %v3809_v29 = vpop.permute.xlu0 %3808 }
0x12d0   : > { %v3847_v56 = vperm.slane %v3809_v29, %v6228_v27 }
0x12d2   : > { %v3862_v17 = vsel %vm2134_vm3, %v3847_v56, %v3861_v25 }
0x12d3   : > { %v3863_v49 = vsel %vm2136_vm4, %v3848_v40, %v3862_v17 }
0x12d4   : > { %v3864_v51 = vsel %vm2138_vm1, %v3849_v36, %v3863_v49 }
0x12d7   : > { %v3818_v31 = vpop.permute.xlu0 %3817  ;;  %v3827_v52 = vpop.permute.xlu1 %3826 }
0x12d8   : > { %v3850_v15 = vperm.slane %v3818_v31, %v6228_v27  ;;  %v3853_v48 = vperm.slane %v3827_v52, %v6228_v27 }
0x12da   : > { %v3865_v33 = vsel %vm2140_vm5, %v3850_v15, %v3864_v51 }
0x12db   : > { %v3875_v7 = vsel %vm1865_vm13, %v3865_v33, 0.0 }
0x12dc   : > { %3876 = vadd.xlane.f32.xlu1 %v3875_v7 }
0x12df   : > { %v3821_v55 = vpop.permute.xlu0 %3820  ;;  %v3836_v14 = vpop.permute.xlu1 %3835 }
0x12e0   : > { %v3851_v2 = vperm.slane %v3821_v55, %v6228_v27  ;;  %v3856_v28 = vperm.slane %v3836_v14, %v6228_v27 }
0x12e7   : > { %v3824_v24 = vpop.permute.xlu0 %3823 }
0x12e8   : > { %v3852_v42 = vperm.slane %v3824_v24, %v6228_v27 }
0x12ea   : > { %v3866_v8 = vsel %vm1900_vm15, %v3852_v42, %v3851_v2 }
0x12eb   : > { %v3867_v60 = vsel %vm2130_vm0, %v3853_v48, %v3866_v8 }
0x12ec   : > { %v3868_v34 = vsel %vm2132_vm2, %v3854_v10, %v3867_v60 }
0x12ef   : > { %v3833_v39 = vpop.permute.xlu0 %3832 }
0x12f0   : > { %v3855_v23 = vperm.slane %v3833_v39, %v6228_v27 }
0x12f2   : > { %v3869_v26 = vsel %vm2134_vm3, %v3855_v23, %v3868_v34 }
0x12f3   : > { %v3870_v37 = vsel %vm2136_vm4, %v3856_v28, %v3869_v26 }
0x12f4   : > { %v3871_v1 = vsel %vm2138_vm1, %v3857_v32, %v3870_v37 }
0x12f7   : > { %v3842_v47 = vpop.permute.xlu0 %3841 }
0x12f8   : > { %v3858_v5 = vperm.slane %v3842_v47, %v6228_v27 }
0x12fa   : > { %v3872_v20 = vsel %vm2140_vm5, %v3858_v5, %v3871_v1 }
0x12fb   : > { %v3878_v53 = vsel %vm1865_vm13, %v3872_v20, 0.0 }
0x12fc   : > { %3879 = vadd.xlane.f32.xlu2 %v3878_v53 }
0x1307   : > { %v3922_v46 = vpop.permute.xlu0 %3921 }
0x1308   : > { %v3933_v0 = vperm.slane %v3922_v46, 1  ;;  %v3932_v29 = vperm.slane %v3922_v46, 0  ;;  %v3934_v44 = vperm.slane %v3922_v46, 2  ;;  %v3937_v36 = vperm.slane %v3922_v46, 5 }
0x1309   : > { %v3935_v31 = vperm.slane %v3922_v46, 3  ;;  %v3939_v15 = vperm.slane %v3922_v46, 7  ;;  %v3936_v52 = vperm.slane %v3922_v46, 4  ;;  %v3938_v2 = vperm.slane %v3922_v46, 6 }
0x130f   : > { %v3929_v42 = vpop.permute.xlu0 %3928 }
0x1310   : > { %v3942_v23 = vperm.slane %v3929_v42, 2  ;;  %v3941_v34 = vperm.slane %v3929_v42, 1  ;;  %v3940_v26 = vperm.slane %v3929_v42, 0  ;;  %v3945_v46 = vperm.slane %v3929_v42, 5 }
0x1318   : > { %v3891_v39 = vpop.permute.xlu0 %3890 }
0x1319   : > { %vm3892_vm8 = vcmp.eq.s32.totalorder %v3891_v39, 1 }
0x134f   : > { %v3877_v16 = vpop.xlane.xlu1 %3876 }
0x1350   : > { %5634 = vlog2.f32 %v3877_v16 }
0x1356   : > { %v5635_v13 = vpop.eup %5634 }
0x1357   : > { %v3882_v3 = vmul.f32 0.6931472, %v5635_v13 }
0x1359   : > { %v3885_v62 = vadd.f32 %v3882_v3, %v7105_v41  ;;  %v3944_v3 = vperm.slane %v3929_v42, 4 }
0x135b   : > { %v3901_v50 = vadd.f32 %v3885_v62, %v6252_v57  ;;  %v3900_v56 = vadd.f32 %v3885_v62, %v6264_v63  ;;  %v3902_v19 = vadd.f32 %v3885_v62, %v6258_v12  ;;  %v3905_v41 = vadd.f32 %v3885_v62, %v6262_v61 }
0x135c   : > { %v3903_v40 = vadd.f32 %v3885_v62, %v6254_v58  ;;  %v3907_v49 = vadd.f32 %v3885_v62, %v6292_v35  ;;  %v3904_v55 = vadd.f32 %v3885_v62, %v6269_v11  ;;  %v3906_v6 = vadd.f32 %v3885_v62, %v6256_v59 }
0x135d   : > { %v7183_v25 = vadd.f32 %v3933_v0, %v3901_v50  ;;  %v7185_v17 = vadd.f32 %v3932_v29, %v3900_v56  ;;  %v7187_v4 = vadd.f32 %v3934_v44, %v3902_v19  ;;  %v7195_v51 = vadd.f32 %v3937_v36, %v3905_v41 }
0x135e   : > { %v7197_v33 = vadd.f32 %v3935_v31, %v3903_v40  ;;  %v7199_v7 = vadd.f32 %v3939_v15, %v3907_v49  ;;  %v7205_v24 = vadd.f32 %v3936_v52, %v3904_v55  ;;  %v7209_v8 = vadd.f32 %v3938_v2, %v3906_v6 }
0x135f   : > { %4000 = vperm.xlu1 %5426, %v7183_v25   ;;  %3997 = vperm.xlu0 %5437, %v7185_v17   ;;  %v3895_v14 = vperm.slane %v3885_v62, %v6228_v27  ;;  %v3943_v62 = vperm.slane %v3929_v42, 3  ;;  %v3947_v19 = vperm.slane %v3929_v42, 7  ;;  %v3946_v44 = vperm.slane %v3929_v42, 6 }
0x1360   : > { %4003 = vperm.xlu2 %5435, %v7187_v4  }
0x1367   : > { %4012 = vperm.xlu1 %5426, %v7195_v51   ;;  %4006 = vperm.xlu0 %5437, %v7197_v33  }
0x1368   : > { %4018 = vperm.xlu2 %5435, %v7199_v7  }
0x136f   : > { %4009 = vperm.xlu0 %5437, %v7205_v24   ;;  %v3880_v54 = vpop.xlane.xlu2 %3879 }
0x1370   : > { %5636 = vlog2.f32 %v3880_v54 }
0x1376   : > { %v5637_v48 = vpop.eup %5636 }
0x1377   : > { %v3884_v60 = vmul.f32 0.6931472, %v5637_v48  ;;  %4015 = vperm.xlu0 %5437, %v7209_v8  }
0x1379   : > { %v3886_v10 = vadd.f32 %v3884_v60, %v7123_v30 }
0x137b   : > { %v3896_v38 = vperm.slane %v3886_v10, %v6228_v27  ;;  %v3910_v28 = vadd.f32 %v3886_v10, %v6258_v12  ;;  %v3909_v37 = vadd.f32 %v3886_v10, %v6252_v57  ;;  %v3908_v32 = vadd.f32 %v3886_v10, %v6264_v63 }
0x137c   : > { %v3913_v53 = vadd.f32 %v3886_v10, %v6262_v61  ;;  %v3912_v16 = vadd.f32 %v3886_v10, %v6269_v11  ;;  %v3911_v13 = vadd.f32 %v3886_v10, %v6254_v58  ;;  %v3915_v50 = vadd.f32 %v3886_v10, %v6292_v35 }
0x137d   : > { %v3897_v47 = vsel %vm1900_vm15, %v3896_v38, %v3895_v14  ;;  %v7219_v5 = vadd.f32 %v3942_v23, %v3910_v28  ;;  %v7221_v1 = vadd.f32 %v3941_v34, %v3909_v37  ;;  %v7223_v30 = vadd.f32 %v3940_v26, %v3908_v32 }
0x137e   : > { %v7226_v20 = vsel %vm3892_vm8, %v3897_v47, %v7050_v22  ;;  %v7234_v0 = vadd.f32 %v3945_v46, %v3913_v53  ;;  %v7236_v29 = vadd.f32 %v3944_v3, %v3912_v16  ;;  %v7238_v22 = vadd.f32 %v3943_v62, %v3911_v13 }
0x137f   : > { %4027 = vperm.xlu2 %5435, %v7219_v5   ;;  %4024 = vperm.xlu0 %5437, %v7221_v1   ;;  %v3914_v56 = vadd.f32 %v3886_v10, %v6256_v59  ;;  %v7245_v41 = vadd.f32 %v3947_v19, %v3915_v50 }
0x1380   : > { %4021 = vperm.xlu1 %5426, %v7223_v30  }
0x1381   : > { %v7247_v40 = vadd.f32 %v3946_v44, %v3914_v56 }
0x1387   : > { %4036 = vperm.xlu2 %5435, %v7234_v0   ;;  %4033 = vperm.xlu0 %5437, %v7236_v29  }
0x1388   : > { %4030 = vperm.xlu1 %5426, %v7238_v22  }
0x138f   : > { %4042 = vperm.xlu0 %5437, %v7245_v41  }
0x1390   : > { %4039 = vperm.xlu1 %5426, %v7247_v40  }
0x13ba   : > { %v4004_v15 = vpop.permute.xlu2 %4003 }
0x13bb   : > { %v4046_v2 = vperm.slane %v4004_v15, %v6228_v27 }
0x13c2   : > { %v4019_v23 = vpop.permute.xlu2 %4018 }
0x13c3   : > { %v4051_v28 = vperm.slane %v4019_v23, %v6228_v27 }
0x13d1   : > { %v3998_v49 = vpop.permute.xlu0 %3997  ;;  %v4001_v31 = vpop.permute.xlu1 %4000 }
0x13d2   : > { %v4045_v55 = vperm.slane %v4001_v31, %v6228_v27  ;;  %v4044_v52 = vperm.slane %v3998_v49, %v6228_v27 }
0x13d4   : > { %v4060_v6 = vsel %vm1900_vm15, %v4045_v55, %v4044_v52 }
0x13d5   : > { %v4061_v39 = vsel %vm2130_vm0, %v4046_v2, %v4060_v6 }
0x13d9   : > { %v4007_v36 = vpop.permute.xlu0 %4006  ;;  %v4013_v60 = vpop.permute.xlu1 %4012 }
0x13da   : > { %v4047_v42 = vperm.slane %v4007_v36, %v6228_v27  ;;  %v4049_v34 = vperm.slane %v4013_v60, %v6228_v27  ;;  %v4028_v46 = vpop.permute.xlu2 %4027 }
0x13db   : > { %v4054_v44 = vperm.slane %v4028_v46, %v6228_v27 }
0x13dc   : > { %v4062_v10 = vsel %vm2132_vm2, %v4047_v42, %v4061_v39 }
0x13e1   : > { %v4010_v54 = vpop.permute.xlu0 %4009 }
0x13e2   : > { %v4048_v48 = vperm.slane %v4010_v54, %v6228_v27  ;;  %v4037_v55 = vpop.permute.xlu2 %4036 }
0x13e3   : > { %v4057_v6 = vperm.slane %v4037_v55, %v6228_v27 }
0x13e4   : > { %v4063_v14 = vsel %vm2134_vm3, %v4048_v48, %v4062_v10 }
0x13e5   : > { %v4064_v37 = vsel %vm2136_vm4, %v4049_v34, %v4063_v14 }
0x13e9   : > { %v4016_v26 = vpop.permute.xlu0 %4015 }
0x13ea   : > { %v4050_v38 = vperm.slane %v4016_v26, %v6228_v27 }
0x13ec   : > { %v4065_v32 = vsel %vm2138_vm1, %v4050_v38, %v4064_v37 }
0x13ed   : > { %v4066_v47 = vsel %vm2140_vm5, %v4051_v28, %v4065_v32 }
0x13ee   : > { %v4076_v53 = vsel %vm1865_vm13, %v4066_v47, -inf }
0x13ef   : > { %4077 = vmax.xlane.f32.xlu2 %v4076_v53 }
0x13f1   : > { %v4025_v16 = vpop.permute.xlu0 %4024 }
0x13f2   : > { %v4022_v13 = vpop.permute.xlu1 %4021  ;;  %v4053_v3 = vperm.slane %v4025_v16, %v6228_v27 }
0x13f3   : > { %v4052_v62 = vperm.slane %v4022_v13, %v6228_v27 }
0x13f5   : > { %v4067_v56 = vsel %vm1900_vm15, %v4053_v3, %v4052_v62 }
0x13f6   : > { %v4068_v31 = vsel %vm2130_vm0, %v4054_v44, %v4067_v56 }
0x13f9   : > { %v4034_v50 = vpop.permute.xlu0 %4033 }
0x13fa   : > { %v4031_v19 = vpop.permute.xlu1 %4030  ;;  %v4056_v36 = vperm.slane %v4034_v50, %v6228_v27 }
0x13fb   : > { %v4055_v49 = vperm.slane %v4031_v19, %v6228_v27 }
0x13fd   : > { %v4069_v15 = vsel %vm2132_vm2, %v4055_v49, %v4068_v31 }
0x13fe   : > { %v4070_v52 = vsel %vm2134_vm3, %v4056_v36, %v4069_v15 }
0x13ff   : > { %v4071_v60 = vsel %vm2136_vm4, %v4057_v6, %v4070_v52 }
0x1401   : > { %v4043_v54 = vpop.permute.xlu0 %4042 }
0x1402   : > { %v4059_v42 = vperm.slane %v4043_v54, %v6228_v27  ;;  %v4040_v2 = vpop.permute.xlu1 %4039 }
0x1403   : > { %v4058_v48 = vperm.slane %v4040_v2, %v6228_v27 }
0x1405   : > { %v4072_v39 = vsel %vm2138_vm1, %v4058_v48, %v4071_v60 }
0x1406   : > { %v4073_v10 = vsel %vm2140_vm5, %v4059_v42, %v4072_v39 }
0x1407   : > { %v4079_v23 = vsel %vm1865_vm13, %v4073_v10, -inf }
0x1408   : > { %4080 = vmax.xlane.f32.xlu1 %v4079_v23 }
0x1462   : > { %v7283_v14 = vpop.xlane.xlu2 %4077 }
0x1463   : > { %v4084_v34 = vperm.slane %v7283_v14, 0  ;;  %v4089_v26 = vperm.slane %v7283_v14, 5  ;;  %v4091_v38 = vperm.slane %v7283_v14, 7  ;;  %v4085_v28 = vperm.slane %v7283_v14, 1 }
0x1464   : > { %v4086_v3 = vperm.slane %v7283_v14, 2  ;;  %v4088_v31 = vperm.slane %v7283_v14, 4  ;;  %v4090_v10 = vperm.slane %v7283_v14, 6 }
0x1465   : > { %v4116_v37 = vsub.f32 %v7185_v17, %v4084_v34  ;;  %v4121_v32 = vsub.f32 %v7195_v51, %v4089_v26  ;;  %v4123_v47 = vsub.f32 %v7199_v7, %v4091_v38  ;;  %v4117_v13 = vsub.f32 %v7183_v25, %v4085_v28 }
0x1466   : > { %v4118_v17 = vsub.f32 %v7187_v4, %v4086_v3  ;;  %v4087_v51 = vperm.slane %v7283_v14, 3  ;;  %v4120_v2 = vsub.f32 %v7205_v24, %v4088_v31  ;;  %v4122_v28 = vsub.f32 %v7209_v8, %v4090_v10  ;;  %v7316_v8 = vld [vmem:[%s7705_s18] sm:$0x3] }
0x1467   : > { %v4132_v53 = vmul.f32 1.442695, %v4116_v37  ;;  %v4142_v16 = vmul.f32 1.442695, %v4121_v32  ;;  %v4146_v46 = vmul.f32 1.442695, %v4123_v47 }
0x1468   : > { %v4134_v62 = vmul.f32 1.442695, %v4117_v13  ;;  %v4136_v7 = vmul.f32 1.442695, %v4118_v17  ;;  %v4119_v44 = vsub.f32 %v7197_v33, %v4087_v51  ;;  %v4144_v24 = vmul.f32 1.442695, %v4122_v28 }
0x1469   : > { %5638 = vpow2.f32 %v4132_v53  ;;  %vm4272_vm9 = vcmp.eq.s32.totalorder %v7316_v8, 7  ;;  %vm4657_vm6 = vcmp.eq.s32.totalorder %v7316_v8, 8 }
0x146a   : > { %5640 = vpow2.f32 %v4142_v16  ;;  %v4138_v15 = vmul.f32 1.442695, %v4119_v44 }
0x146b   : > { %5642 = vpow2.f32 %v4146_v46  ;;  %v4273_v46 = vsel %vm4272_vm9, 1, %v5810_v45 }
0x146c   : > { %5644 = vpow2.f32 %v4134_v62 }
0x146d   : > { %5646 = vpow2.f32 %v4136_v7  ;;  %v4301_v7 = vperm.slane %v6220_v18, 7 }
0x146e   : > { %5648 = vpow2.f32 %v4138_v15 }
0x146f   : > { %v5639_v50 = vpop.eup %5638 }
0x1470   : > { %v5641_v56 = vpop.eup %5640  ;;  %4181 = vperm.xlu0 %5437, %v5639_v50  }
0x1471   : > { %v5643_v19 = vpop.eup %5642  ;;  %4196 = vperm.xlu2 %5435, %v5641_v56  }
0x1472   : > { %4202 = vperm.xlu1 %5426, %v5643_v19   ;;  %v5645_v25 = vpop.eup %5644 }
0x1473   : > { %v5647_v54 = vpop.eup %5646 }
0x1474   : > { %v5649_v34 = vpop.eup %5648 }
0x1478   : > { %4184 = vperm.xlu0 %5437, %v5645_v25  }
0x147b   : > { %v7297_v49 = vpop.xlane.xlu1 %4080 }
0x147c   : > { %v4094_v36 = vperm.slane %v7297_v49, 2  ;;  %v4096_v4 = vperm.slane %v7297_v49, 4  ;;  %v4097_v55 = vperm.slane %v7297_v49, 5  ;;  %v4099_v6 = vperm.slane %v7297_v49, 7 }
0x147d   : > { %v4093_v53 = vperm.slane %v7297_v49, 1  ;;  %v4098_v19 = vperm.slane %v7297_v49, 6 }
0x147e   : > { %v4126_v52 = vsub.f32 %v7219_v5, %v4094_v36  ;;  %v4128_v42 = vsub.f32 %v7236_v29, %v4096_v4  ;;  %v4129_v60 = vsub.f32 %v7234_v0, %v4097_v55  ;;  %v4131_v39 = vsub.f32 %v7245_v41, %v4099_v6 }
0x147f   : > { %v4140_v5 = vmul.f32 1.442695, %v4120_v2  ;;  %v4092_v0 = vperm.slane %v7297_v49, 0  ;;  %v4125_v3 = vsub.f32 %v7221_v1, %v4093_v53  ;;  %v4130_v1 = vsub.f32 %v7247_v40, %v4098_v19 }
0x1480   : > { %v4152_v33 = vmul.f32 1.442695, %v4126_v52  ;;  %4187 = vperm.xlu0 %5437, %v5647_v54   ;;  %v4156_v48 = vmul.f32 1.442695, %v4128_v42  ;;  %v4158_v23 = vmul.f32 1.442695, %v4129_v60 }
0x1481   : > { %v4162_v26 = vmul.f32 1.442695, %v4131_v39  ;;  %v4124_v47 = vsub.f32 %v7223_v30, %v4092_v0  ;;  %v4095_v30 = vperm.slane %v7297_v49, 3  ;;  %v4150_v62 = vmul.f32 1.442695, %v4125_v3 }
0x1482   : > { %5650 = vpow2.f32 %v4152_v33  ;;  %v4160_v25 = vmul.f32 1.442695, %v4130_v1  ;;  %v4308_v36 = vperm.slane %v6223_v21, 7 }
0x1483   : > { %5652 = vpow2.f32 %v4156_v48  ;;  %v4148_v16 = vmul.f32 1.442695, %v4124_v47  ;;  %v4127_v56 = vsub.f32 %v7238_v22, %v4095_v30 }
0x1484   : > { %5654 = vpow2.f32 %v4140_v5 }
0x1485   : > { %5656 = vpow2.f32 %v4158_v23  ;;  %v4154_v17 = vmul.f32 1.442695, %v4127_v56 }
0x1486   : > { %5658 = vpow2.f32 %v4162_v26 }
0x1487   : > { %5660 = vpow2.f32 %v4144_v24 }
0x1488   : > { %v5651_v38 = vpop.eup %5650  ;;  %4190 = vperm.xlu0 %5437, %v5649_v34   ;;  %5662 = vpow2.f32 %v4148_v16 }
0x1489   : > { %v5653_v29 = vpop.eup %5652  ;;  %4211 = vperm.xlu2 %5435, %v5651_v38   ;;  %5664 = vpow2.f32 %v4150_v62 }
0x148a   : > { %4217 = vperm.xlu1 %5426, %v5653_v29   ;;  %v5655_v41 = vpop.eup %5654  ;;  %5666 = vpow2.f32 %v4154_v17 }
0x148b   : > { %v5657_v37 = vpop.eup %5656  ;;  %5668 = vpow2.f32 %v4160_v25 }
0x148c   : > { %v5659_v32 = vpop.eup %5658 }
0x148d   : > { %v5661_v13 = vpop.eup %5660 }
0x148e   : > { %v5663_v50 = vpop.eup %5662 }
0x148f   : > { %v5665_v51 = vpop.eup %5664 }
0x1490   : > { %4193 = vperm.xlu0 %5437, %v5655_v41   ;;  %v5667_v44 = vpop.eup %5666 }
0x1491   : > { %4220 = vperm.xlu2 %5435, %v5657_v37   ;;  %v5669_v22 = vpop.eup %5668 }
0x1492   : > { %4226 = vperm.xlu1 %5426, %v5659_v32  }
0x1498   : > { %4199 = vperm.xlu0 %5437, %v5661_v13  }
0x149a   : > { %4275 = vperm.xlu1 %5426, %v4273_v46  }
0x14a0   : > { %4205 = vperm.xlu0 %5437, %v5663_v50  }
0x14a2   : > { %5438 = vset.pattern.permute.xlu1 %v6211_v9 }
0x14a8   : > { %4208 = vperm.xlu0 %5437, %v5665_v51  }
0x14aa   : > { %4306 = vperm.xlu1 %5438, %v4301_v7  }
0x14b0   : > { %4214 = vperm.xlu0 %5437, %v5667_v44  }
0x14b2   : > { %4313 = vperm.xlu1 %5438, %v4308_v36  }
0x14b8   : > { %4223 = vperm.xlu0 %5437, %v5669_v22  }
0x14ba   : > { %5439 = vset.pattern.permute.xlu1 %v5810_v45 }
0x14cb   : > { %v4197_v48 = vpop.permute.xlu2 %4196 }
0x14cc   : > { %v4233_v23 = vperm.slane %v4197_v48, %v6228_v27 }
0x14e2   : > { %v4182_v31 = vpop.permute.xlu0 %4181 }
0x14e3   : > { %v4228_v6 = vperm.slane %v4182_v31, %v6228_v27  ;;  %v4212_v32 = vpop.permute.xlu2 %4211 }
0x14e4   : > { %v4203_v10 = vpop.permute.xlu1 %4202  ;;  %v4238_v3 = vperm.slane %v4212_v32, %v6228_v27 }
0x14e5   : > { %v4235_v38 = vperm.slane %v4203_v10, %v6228_v27 }
0x14ea   : > { %v4185_v15 = vpop.permute.xlu0 %4184 }
0x14eb   : > { %v4229_v52 = vperm.slane %v4185_v15, %v6228_v27  ;;  %v4221_v56 = vpop.permute.xlu2 %4220 }
0x14ec   : > { %v4241_v7 = vperm.slane %v4221_v56, %v6228_v27 }
0x14ed   : > { %v4244_v2 = vsel %vm1900_vm15, %v4229_v52, %v4228_v6 }
0x14f2   : > { %v4188_v4 = vpop.permute.xlu0 %4187 }
0x14f3   : > { %v4230_v54 = vperm.slane %v4188_v4, %v6228_v27 }
0x14f5   : > { %v4245_v60 = vsel %vm2130_vm0, %v4230_v54, %v4244_v2 }
0x14fa   : > { %v4191_v55 = vpop.permute.xlu0 %4190 }
0x14fb   : > { %v4231_v42 = vperm.slane %v4191_v55, %v6228_v27 }
0x14fc   : > { %v4218_v53 = vpop.permute.xlu1 %4217 }
0x14fd   : > { %v4246_v39 = vsel %vm2132_vm2, %v4231_v42, %v4245_v60  ;;  %v4240_v19 = vperm.slane %v4218_v53, %v6228_v27 }
0x1502   : > { %v4194_v40 = vpop.permute.xlu0 %4193 }
0x1503   : > { %v4232_v33 = vperm.slane %v4194_v40, %v6228_v27 }
0x1504   : > { %v4227_v17 = vpop.permute.xlu1 %4226 }
0x1505   : > { %v4247_v5 = vsel %vm2134_vm3, %v4232_v33, %v4246_v39  ;;  %v4243_v44 = vperm.slane %v4227_v17, %v6228_v27 }
0x1506   : > { %v4248_v29 = vsel %vm2136_vm4, %v4233_v23, %v4247_v5 }
0x150a   : > { %v4200_v34 = vpop.permute.xlu0 %4199 }
0x150b   : > { %v4234_v26 = vperm.slane %v4200_v34, %v6228_v27 }
0x150c   : > { %v4276_v4 = vpop.permute.xlu1 %4275 }
0x150d   : > { %v4249_v28 = vsel %vm2138_vm1, %v4234_v26, %v4248_v29  ;;  %vm4277_vm10 = vcmp.eq.s32.totalorder %v4276_v4, 1 }
0x150e   : > { %v4250_v24 = vsel %vm2140_vm5, %v4235_v38, %v4249_v28 }
0x150f   : > { %v4260_v0 = vsel %vm1865_vm13, %v4250_v24, 0.0 }
0x1510   : > { %4261 = vadd.xlane.f32.xlu2 %v4260_v0 }
0x1512   : > { %v4206_v41 = vpop.permute.xlu0 %4205 }
0x1513   : > { %v4236_v16 = vperm.slane %v4206_v41, %v6228_v27 }
0x151a   : > { %v4209_v37 = vpop.permute.xlu0 %4208 }
0x151b   : > { %v4237_v47 = vperm.slane %v4209_v37, %v6228_v27 }
0x151c   : > { %v7362_v40 = vpop.permute.xlu1 %4306 }
0x151d   : > { %v4251_v13 = vsel %vm1900_vm15, %v4237_v47, %v4236_v16  ;;  %v4319_v42 = vperm.slane %v7362_v40, 2  ;;  %v4317_v33 = vperm.slane %v7362_v40, 0  ;;  %v4321_v39 = vperm.slane %v7362_v40, 4 }
0x151e   : > { %v4252_v62 = vsel %vm2130_vm0, %v4238_v3, %v4251_v13  ;;  %v4318_v34 = vperm.slane %v7362_v40, 1  ;;  %v4320_v29 = vperm.slane %v7362_v40, 3  ;;  %v4322_v41 = vperm.slane %v7362_v40, 5 }
0x151f   : > { %v4324_v4 = vperm.slane %v7362_v40, 7 }
0x1522   : > { %v4215_v46 = vpop.permute.xlu0 %4214 }
0x1523   : > { %v4239_v30 = vperm.slane %v4215_v46, %v6228_v27  ;;  %v4323_v46 = vperm.slane %v7362_v40, 6  ;;  %v4691_v40 = vld [vmem:[%s7706_s7] sm:$0x3] }
0x1524   : > { %v4314_v53 = vpop.permute.xlu1 %4313 }
0x1525   : > { %v4253_v50 = vsel %vm2132_vm2, %v4239_v30, %v4252_v62  ;;  %v4326_v30 = vperm.slane %v4314_v53, 1 }
0x1526   : > { %v4254_v51 = vsel %vm2134_vm3, %v4240_v19, %v4253_v50  ;;  %v4325_v50 = vperm.slane %v4314_v53, 0 }
0x1527   : > { %v4255_v36 = vsel %vm2136_vm4, %v4241_v7, %v4254_v51 }
0x152a   : > { %v4224_v1 = vpop.permute.xlu0 %4223 }
0x152b   : > { %v4242_v25 = vperm.slane %v4224_v1, %v6228_v27 }
0x152d   : > { %v4256_v22 = vsel %vm2138_vm1, %v4242_v25, %v4255_v36  ;;  %v4329_v36 = vperm.slane %v4314_v53, 4 }
0x152e   : > { %v4257_v31 = vsel %vm2140_vm5, %v4243_v44, %v4256_v22  ;;  %v4327_v44 = vperm.slane %v4314_v53, 2  ;;  %v4328_v22 = vperm.slane %v4314_v53, 3 }
0x152f   : > { %v4263_v15 = vsel %vm1865_vm13, %v4257_v31, 0.0 }
0x1530   : > { %4264 = vadd.xlane.f32.xlu0 %v4263_v15 }
0x1583   : > { %v4262_v55 = vpop.xlane.xlu2 %4261 }
0x1584   : > { %5670 = vlog2.f32 %v4262_v55 }
0x158a   : > { %v5671_v52 = vpop.eup %5670 }
0x158b   : > { %v4267_v54 = vmul.f32 0.6931472, %v5671_v52  ;;  %v4331_v52 = vperm.slane %v4314_v53, 6 }
0x158d   : > { %v4270_v6 = vadd.f32 %v4267_v54, %v7283_v14 }
0x158f   : > { %v4287_v2 = vadd.f32 %v4270_v6, %v6258_v12  ;;  %v4285_v48 = vadd.f32 %v4270_v6, %v6264_v63  ;;  %v4289_v60 = vadd.f32 %v4270_v6, %v6269_v11  ;;  %v4286_v14 = vadd.f32 %v4270_v6, %v6252_v57 }
0x1590   : > { %v4288_v38 = vadd.f32 %v4270_v6, %v6254_v58  ;;  %v4290_v0 = vadd.f32 %v4270_v6, %v6262_v61  ;;  %v4291_v13 = vadd.f32 %v4270_v6, %v6256_v59 }
0x1591   : > { %v7371_v10 = vadd.f32 %v4319_v42, %v4287_v2  ;;  %v7373_v5 = vadd.f32 %v4317_v33, %v4285_v48  ;;  %v7375_v23 = vadd.f32 %v4321_v39, %v4289_v60  ;;  %v7382_v26 = vadd.f32 %v4318_v34, %v4286_v14 }
0x1592   : > { %v7387_v28 = vadd.f32 %v4320_v29, %v4288_v38  ;;  %v7392_v37 = vadd.f32 %v4322_v41, %v4290_v0  ;;  %v7400_v56 = vadd.f32 %v4323_v46, %v4291_v13  ;;  %v4692_v2 = vperm.slane %v4691_v40, 0 }
0x1593   : > { %4388 = vperm.xlu2 %5435, %v7371_v10   ;;  %4382 = vperm.xlu1 %5439, %v7373_v5  }
0x1594   : > { %4394 = vperm.xlu0 %5437, %v7375_v23  }
0x159b   : > { %4385 = vperm.xlu1 %5439, %v7382_v26  }
0x15a3   : > { %4391 = vperm.xlu1 %5439, %v7387_v28   ;;  %v4265_v24 = vpop.xlane.xlu0 %4264 }
0x15a4   : > { %5672 = vlog2.f32 %v4265_v24 }
0x15aa   : > { %v5673_v32 = vpop.eup %5672 }
0x15ab   : > { %v4269_v47 = vmul.f32 0.6931472, %v5673_v32  ;;  %4397 = vperm.xlu1 %5439, %v7392_v37  }
0x15ad   : > { %v4271_v16 = vadd.f32 %v4269_v47, %v7297_v49  ;;  %v4280_v49 = vperm.slane %v4270_v6, %v6228_v27  ;;  %v5811_v47 = vmov 0.0  }
0x15af   : > { %v4294_v3 = vadd.f32 %v4271_v16, %v6252_v57  ;;  %v4293_v62 = vadd.f32 %v4271_v16, %v6264_v63  ;;  %v4281_v51 = vperm.slane %v4271_v16, %v6228_v27  ;;  %v4295_v57 = vadd.f32 %v4271_v16, %v6258_v12 }
0x15b0   : > { %v4297_v63 = vadd.f32 %v4271_v16, %v6269_v11  ;;  %v4296_v1 = vadd.f32 %v4271_v16, %v6254_v58  ;;  %v4298_v58 = vadd.f32 %v4271_v16, %v6262_v61  ;;  %v4292_v12 = vadd.f32 %v4270_v6, %v6292_v35 }
0x15b1   : > { %v7402_v19 = vadd.f32 %v4326_v30, %v4294_v3  ;;  %v7404_v17 = vadd.f32 %v4325_v50, %v4293_v62  ;;  %v4282_v7 = vsel %vm1900_vm15, %v4281_v51, %v4280_v49  ;;  %v7418_v31 = vadd.f32 %v4327_v44, %v4295_v57 }
0x15b2   : > { %v7416_v25 = vsel %vm4277_vm10, %v4282_v7, %v7226_v20  ;;  %v7420_v15 = vadd.f32 %v4329_v36, %v4297_v63  ;;  %v7422_v55 = vadd.f32 %v4328_v22, %v4296_v1  ;;  %v4299_v11 = vadd.f32 %v4271_v16, %v6256_v59 }
0x15b3   : > { %4400 = vperm.xlu1 %5439, %v7400_v56   ;;  %4409 = vperm.xlu0 %5437, %v7402_v19   ;;  %v4330_v20 = vperm.slane %v4314_v53, 5  ;;  %v7433_v42 = vadd.f32 %v4324_v4, %v4292_v12  ;;  %v4300_v61 = vadd.f32 %v4271_v16, %v6292_v35  ;;  %v4332_v6 = vperm.slane %v4314_v53, 7 }
0x15b4   : > { %4406 = vperm.xlu2 %5435, %v7404_v17   ;;  %v7435_v33 = vadd.f32 %v4331_v52, %v4299_v11  ;;  %v4699_v44 = vperm.slane %v4691_v40, 1 }
0x15b5   : > { %v7431_v54 = vadd.f32 %v4330_v20, %v4298_v58  ;;  %v7441_v59 = vadd.f32 %v4332_v6, %v4300_v61 }
0x15bb   : > { %4412 = vperm.xlu1 %5439, %v7418_v31   ;;  %4418 = vperm.xlu0 %5437, %v7420_v15  }
0x15bc   : > { %4415 = vperm.xlu2 %5435, %v7422_v55  }
0x15c3   : > { %4421 = vperm.xlu1 %5439, %v7431_v54   ;;  %4403 = vperm.xlu0 %5437, %v7433_v42  }
0x15c4   : > { %4424 = vperm.xlu2 %5435, %v7435_v33  }
0x15cb   : > { %4427 = vperm.xlu1 %5439, %v7441_v59  }
0x15cc   : > { %4686 = vperm.xlu2 %5435, %v7316_v8  }
0x15d4   : > { %5440 = vset.pattern.permute.xlu2 %v6211_v9 }
0x15dc   : > { %4697 = vperm.xlu2 %5440, %v4692_v2  }
0x15ed   : > { %v4389_v60 = vpop.permute.xlu2 %4388 }
0x15ee   : > { %v4431_v57 = vperm.slane %v4389_v60, %v6228_v27 }
0x1605   : > { %v4383_v48 = vpop.permute.xlu1 %4382 }
0x1606   : > { %v4395_v38 = vpop.permute.xlu0 %4394  ;;  %v4429_v30 = vperm.slane %v4383_v48, %v6228_v27 }
0x1607   : > { %v4433_v12 = vperm.slane %v4395_v38, %v6228_v27 }
0x160d   : > { %v4386_v39 = vpop.permute.xlu1 %4385 }
0x160e   : > { %v4407_v14 = vpop.permute.xlu2 %4406  ;;  %v4430_v46 = vperm.slane %v4386_v39, %v6228_v27 }
0x160f   : > { %v4437_v36 = vperm.slane %v4407_v14, %v6228_v27 }
0x1610   : > { %v4445_v49 = vsel %vm1900_vm15, %v4430_v46, %v4429_v30 }
0x1611   : > { %v4446_v7 = vsel %vm2130_vm0, %v4431_v57, %v4445_v49 }
0x1615   : > { %v4392_v35 = vpop.permute.xlu1 %4391 }
0x1616   : > { %v4416_v34 = vpop.permute.xlu2 %4415  ;;  %v4432_v51 = vperm.slane %v4392_v35, %v6228_v27 }
0x1617   : > { %v4440_v40 = vperm.slane %v4416_v34, %v6228_v27 }
0x1618   : > { %v4447_v22 = vsel %vm2132_vm2, %v4432_v51, %v4446_v7 }
0x1619   : > { %v4448_v4 = vsel %vm2134_vm3, %v4433_v12, %v4447_v22 }
0x161d   : > { %v4398_v29 = vpop.permute.xlu1 %4397 }
0x161e   : > { %v4425_v24 = vpop.permute.xlu2 %4424  ;;  %v4434_v58 = vperm.slane %v4398_v29, %v6228_v27 }
0x1620   : > { %v4449_v2 = vsel %vm2136_vm4, %v4434_v58, %v4448_v4 }
0x1625   : > { %v4401_v0 = vpop.permute.xlu1 %4400  ;;  %v4410_v41 = vpop.permute.xlu0 %4409 }
0x1626   : > { %v4687_v32 = vpop.permute.xlu2 %4686  ;;  %v4438_v63 = vperm.slane %v4410_v41, %v6228_v27  ;;  %v4435_v11 = vperm.slane %v4401_v0, %v6228_v27  ;;  %v4443_v41 = vperm.slane %v4425_v24, %v6228_v27 }
0x1627   : > { %vm4688_vm11 = vcmp.lt.s32.totalorder %v6228_v27, %v4687_v32 }
0x1628   : > { %v5258_v53 = vsel %vm4688_vm11, 1.0, %v5811_v47  ;;  %v4452_v20 = vsel %vm1900_vm15, %v4438_v63, %v4437_v36  ;;  %v4450_v60 = vsel %vm2138_vm1, %v4435_v11, %v4449_v2 }
0x1629   : > { %v4712_v16 = vperm.slane %v5258_v53, 0  ;;  %v4719_v13 = vperm.slane %v5258_v53, 1 }
0x162b   : > { %v5441_v3 = vpack.i.bf16 %v4719_v13, %v4712_v16 }
0x162d   : > { %5442 = vperm.xlu2 %5440, %v5441_v3   ;;  %v4413_v62 = vpop.permute.xlu1 %4412  ;;  %v4419_v50 = vpop.permute.xlu0 %4418 }
0x162e   : > { %v4439_v1 = vperm.slane %v4413_v62, %v6228_v27  ;;  %v4441_v38 = vperm.slane %v4419_v50, %v6228_v27 }
0x1630   : > { %v4453_v52 = vsel %vm2130_vm0, %v4439_v1, %v4452_v20 }
0x1631   : > { %v4454_v39 = vsel %vm2132_vm2, %v4440_v40, %v4453_v52 }
0x1632   : > { %v4455_v0 = vsel %vm2134_vm3, %v4441_v38, %v4454_v39 }
0x1635   : > { %4704 = vperm.xlu2 %5440, %v4699_v44   ;;  %v4422_v61 = vpop.permute.xlu1 %4421  ;;  %v4404_v6 = vpop.permute.xlu0 %4403 }
0x1636   : > { %v4436_v48 = vperm.slane %v4404_v6, %v6228_v27  ;;  %v4442_v14 = vperm.slane %v4422_v61, %v6228_v27  ;;  %v4698_v3 = vpop.permute.xlu2 %4697 }
0x1637   : > { %vm4706_vm12 = vcmp.eq.s32.totalorder %v4698_v3, %v6228_v27 }
0x1638   : > { %v4451_v35 = vsel %vm2140_vm5, %v4436_v48, %v4450_v60  ;;  %v4456_v34 = vsel %vm2136_vm4, %v4442_v14, %v4455_v0  ;;  %v5259_v30 = vsel %vm4706_vm12, 1.0, %v5811_v47 }
0x1639   : > { %v4461_v29 = vsel %vm1865_vm13, %v4451_v35, -inf  ;;  %v4457_v16 = vsel %vm2138_vm1, %v4443_v41, %v4456_v34 }
0x163a   : > { %4462 = vmax.xlane.f32.xlu0 %v4461_v29 }
0x163d   : > { %v4428_v32 = vpop.permute.xlu1 %4427  ;;  %5446 = vset.pattern.permute.xlu2 %v5810_v45 }
0x163e   : > { %v4444_v53 = vperm.slane %v4428_v32, %v6228_v27 }
0x1640   : > { %v4458_v13 = vsel %vm2140_vm5, %v4444_v53, %v4457_v16 }
0x1641   : > { %v4464_v46 = vsel %vm1865_vm13, %v4458_v13, -inf }
0x1642   : > { %4465 = vmax.xlane.f32.xlu1 %v4464_v46 }
0x1687   : > { %v5443_v62 = vpop.permute.xlu2 %5442 }
0x1688   : > { %v5444_v50 = vunpack.i.l.bf16 %v5443_v62  ;;  %v5445_v51 = vunpack.i.h.bf16 %v5443_v62 }
0x168a   : > { %v7486_v24 = vmul.f32 %v5444_v50, %v5259_v30 }
0x168c   : > { %5263 = vmatmul.msk.f32.vlgmr.msra.gmra.mxu1 %vm1865_vm13, %v7486_v24 }
0x168f   : > { %v4705_v49 = vpop.permute.xlu2 %4704 }
0x1690   : > { %vm4707_vm14 = vcmp.eq.s32.totalorder %v4705_v49, %v6228_v27 }
0x1691   : > { %v5260_v57 = vsel %vm4707_vm14, 1.0, %v5811_v47 }
0x1692   : > { %v7492_v63 = vmul.f32 %v5445_v51, %v5260_v57 }
0x1694   : > { %5264 = vmatmul.msk.f32.gmra.mxu1 %vm1865_vm13, %v7492_v63 }
0x16ad   : > { %v7496_v7 = vpop.xlane.xlu0 %4462 }
0x16ae   : > { %v4469_v1 = vperm.slane %v7496_v7, 0  ;;  %v4471_v44 = vperm.slane %v7496_v7, 2  ;;  %v4475_v36 = vperm.slane %v7496_v7, 6  ;;  %v4474_v22 = vperm.slane %v7496_v7, 5 }
0x16af   : > { %v4470_v11 = vperm.slane %v7496_v7, 1 }
0x16b0   : > { %v4501_v58 = vsub.f32 %v7373_v5, %v4469_v1  ;;  %v4503_v12 = vsub.f32 %v7371_v10, %v4471_v44  ;;  %v4507_v20 = vsub.f32 %v7400_v56, %v4475_v36  ;;  %v4506_v61 = vsub.f32 %v7392_v37, %v4474_v22 }
0x16b1   : > { %v4502_v6 = vsub.f32 %v7382_v26, %v4470_v11  ;;  %v4472_v56 = vperm.slane %v7496_v7, 3 }
0x16b2   : > { %v4517_v4 = vmul.f32 1.442695, %v4501_v58  ;;  %v4521_v52 = vmul.f32 1.442695, %v4503_v12  ;;  %v4529_v2 = vmul.f32 1.442695, %v4507_v20 }
0x16b3   : > { %v4527_v5 = vmul.f32 1.442695, %v4506_v61  ;;  %v4519_v39 = vmul.f32 1.442695, %v4502_v6  ;;  %v4504_v38 = vsub.f32 %v7387_v28, %v4472_v56 }
0x16b4   : > { %5674 = vpow2.f32 %v4521_v52  ;;  %v4476_v52 = vperm.slane %v7496_v7, 7 }
0x16b5   : > { %v7508_v40 = vpop.xlane.xlu1 %4465  ;;  %5676 = vpow2.f32 %v4517_v4  ;;  %v4523_v41 = vmul.f32 1.442695, %v4504_v38 }
0x16b6   : > { %v4477_v48 = vperm.slane %v7508_v40, 0  ;;  %v4483_v10 = vperm.slane %v7508_v40, 6  ;;  %5678 = vpow2.f32 %v4529_v2  ;;  %v4480_v29 = vperm.slane %v7508_v40, 3 }
0x16b7   : > { %5680 = vpow2.f32 %v4527_v5  ;;  %v4481_v13 = vperm.slane %v7508_v40, 4  ;;  %v4478_v30 = vperm.slane %v7508_v40, 1  ;;  %v4479_v1 = vperm.slane %v7508_v40, 2 }
0x16b8   : > { %v4509_v60 = vsub.f32 %v7404_v17, %v4477_v48  ;;  %v4515_v26 = vsub.f32 %v7435_v33, %v4483_v10  ;;  %5682 = vpow2.f32 %v4519_v39  ;;  %v4473_v17 = vperm.slane %v7496_v7, 4 }
0x16b9   : > { %v4512_v53 = vsub.f32 %v7422_v55, %v4480_v29  ;;  %v4513_v50 = vsub.f32 %v7420_v15, %v4481_v13  ;;  %v4510_v49 = vsub.f32 %v7402_v19, %v4478_v30  ;;  %v4511_v15 = vsub.f32 %v7418_v31, %v4479_v1 }
0x16ba   : > { %v5675_v14 = vpop.eup %5674  ;;  %v4533_v35 = vmul.f32 1.442695, %v4509_v60  ;;  %v4545_v34 = vmul.f32 1.442695, %v4515_v26  ;;  %v4505_v33 = vsub.f32 %v7375_v23, %v4473_v17  ;;  %v4484_v23 = vperm.slane %v7508_v40, 7 }
0x16bb   : > { %v5677_v37 = vpop.eup %5676  ;;  %4572 = vperm.xlu1 %5439, %v5675_v14   ;;  %v4539_v46 = vmul.f32 1.442695, %v4512_v53  ;;  %v4541_v51 = vmul.f32 1.442695, %v4513_v50  ;;  %v4535_v44 = vmul.f32 1.442695, %v4510_v49  ;;  %v4508_v31 = vsub.f32 %v7433_v42, %v4476_v52 }
0x16bc   : > { %4566 = vperm.xlu2 %5446, %v5677_v37   ;;  %v5679_v0 = vpop.eup %5678  ;;  %5684 = vpow2.f32 %v4533_v35  ;;  %v4525_v3 = vmul.f32 1.442695, %v4505_v33  ;;  %v4516_v36 = vsub.f32 %v7441_v59, %v4484_v23  ;;  %v4482_v12 = vperm.slane %v7508_v40, 5 }
0x16bd   : > { %4584 = vperm.xlu0 %5437, %v5679_v0   ;;  %v5681_v32 = vpop.eup %5680  ;;  %5686 = vpow2.f32 %v4545_v34  ;;  %v4537_v11 = vmul.f32 1.442695, %v4511_v15  ;;  %v4658_v2 = vsel %vm4657_vm6, 1, %v5810_v45  ;;  %v4531_v48 = vmul.f32 1.442695, %v4508_v31 }
0x16be   : > { %v5683_v16 = vpop.eup %5682  ;;  %5688 = vpow2.f32 %v4523_v41  ;;  %v4547_v19 = vmul.f32 1.442695, %v4516_v36  ;;  %v4514_v4 = vsub.f32 %v7431_v54, %v4482_v12 }
0x16bf   : > { %5690 = vpow2.f32 %v4539_v46 }
0x16c0   : > { %5692 = vpow2.f32 %v4525_v3  ;;  %v4543_v61 = vmul.f32 1.442695, %v4514_v4 }
0x16c1   : > { %5694 = vpow2.f32 %v4541_v51 }
0x16c2   : > { %v5685_v28 = vpop.eup %5684  ;;  %5696 = vpow2.f32 %v4535_v44 }
0x16c3   : > { %4581 = vperm.xlu1 %5439, %v5681_v32   ;;  %v5687_v62 = vpop.eup %5686  ;;  %5698 = vpow2.f32 %v4547_v19 }
0x16c4   : > { %4569 = vperm.xlu2 %5446, %v5683_v16   ;;  %v5689_v55 = vpop.eup %5688  ;;  %5700 = vpow2.f32 %v4537_v11 }
0x16c5   : > { %4590 = vperm.xlu0 %5437, %v5685_v28   ;;  %v5691_v57 = vpop.eup %5690  ;;  %5702 = vpow2.f32 %v4543_v61 }
0x16c6   : > { %v5693_v22 = vpop.eup %5692  ;;  %5704 = vpow2.f32 %v4531_v48  ;;  %v4750_v48 = vmul.f32 %v7492_v63, %v6223_v21 }
0x16c7   : > { %v5695_v58 = vpop.eup %5694 }
0x16c8   : > { %v5697_v20 = vpop.eup %5696 }
0x16c9   : > { %v5699_v59 = vpop.eup %5698 }
0x16ca   : > { %v5701_v6 = vpop.eup %5700 }
0x16cb   : > { %4608 = vperm.xlu1 %5439, %v5687_v62   ;;  %v5703_v5 = vpop.eup %5702 }
0x16cc   : > { %4575 = vperm.xlu2 %5446, %v5689_v55   ;;  %v5705_v54 = vpop.eup %5704 }
0x16cd   : > { %4599 = vperm.xlu0 %5437, %v5691_v57  }
0x16d3   : > { %5447 = vset.pattern.permute.xlu1 %v6211_v9 }
0x16d4   : > { %4578 = vperm.xlu2 %5446, %v5693_v22  }
0x16d5   : > { %4602 = vperm.xlu0 %5437, %v5695_v58  }
0x16dc   : > { %4593 = vperm.xlu2 %5446, %v5697_v20  }
0x16dd   : > { %4611 = vperm.xlu0 %5437, %v5699_v59  }
0x16e4   : > { %4596 = vperm.xlu2 %5446, %v5701_v6   ;;  %v4728_v6 = vld [vmem:[%s7707_s17] sm:$0x3] }
0x16e5   : > { %4660 = vperm.xlu0 %5437, %v4658_v2   ;;  %v4736_v31 = vperm.slane %v4728_v6, 1  ;;  %v4729_v2 = vperm.slane %v4728_v6, 0 }
0x16ec   : > { %4605 = vperm.xlu2 %5446, %v5703_v5   ;;  %v4754_v5 = vsel %vm1865_vm13, %v4750_v48, 0.0 }
0x16f4   : > { %4587 = vperm.xlu2 %5446, %v5705_v54  }
0x16fc   : > { %5448 = vset.pattern.permute.xlu2 %v6211_v9 }
0x1716   : > { %v4567_v10 = vpop.permute.xlu2 %4566 }
0x1717   : > { %v4613_v38 = vperm.slane %v4567_v10, %v6228_v27 }
0x171e   : > { %v4570_v60 = vpop.permute.xlu2 %4569 }
0x171f   : > { %v4614_v45 = vperm.slane %v4570_v60, %v6228_v27 }
0x1721   : > { %v4629_v0 = vsel %vm1900_vm15, %v4614_v45, %v4613_v38 }
0x1726   : > { %v4576_v56 = vpop.permute.xlu2 %4575 }
0x1727   : > { %v4616_v53 = vperm.slane %v4576_v56, %v6228_v27 }
0x172d   : > { %v4573_v42 = vpop.permute.xlu1 %4572 }
0x172e   : > { %v4579_v39 = vpop.permute.xlu2 %4578  ;;  %v4615_v35 = vperm.slane %v4573_v42, %v6228_v27  ;;  %v4780_v42 = vpop.f32.mrf.mxu1 }
0x172f   : > { %v4585_v8 = vpop.permute.xlu0 %4584  ;;  %v4617_v13 = vperm.slane %v4579_v39, %v6228_v27 }
0x1730   : > { %v4630_v9 = vsel %vm2130_vm0, %v4615_v35, %v4629_v0  ;;  %v4619_v23 = vperm.slane %v4585_v8, %v6228_v27 }
0x1731   : > { %v4631_v33 = vsel %vm2132_vm2, %v4616_v53, %v4630_v9 }
0x1732   : > { %v4632_v50 = vsel %vm2134_vm3, %v4617_v13, %v4631_v33 }
0x1735   : > { %v4582_v17 = vpop.permute.xlu1 %4581 }
0x1736   : > { %v4594_v14 = vpop.permute.xlu2 %4593  ;;  %v4618_v28 = vperm.slane %v4582_v17, %v6228_v27  ;;  %v4783_v17 = vpop.f32.mrf.mxu1 }
0x1737   : > { %v4591_v37 = vpop.permute.xlu0 %4590  ;;  %v4622_v41 = vperm.slane %v4594_v14, %v6228_v27 }
0x1738   : > { %v4621_v34 = vperm.slane %v4591_v37, %v6228_v27  ;;  %v4633_v49 = vsel %vm2136_vm4, %v4618_v28, %v4632_v50 }
0x1739   : > { %v4634_v15 = vsel %vm2138_vm1, %v4619_v23, %v4633_v49 }
0x173a   : > { %v4636_v46 = vsel %vm1900_vm15, %v4622_v41, %v4621_v34 }
0x173d   : > { %v4609_v22 = vpop.permute.xlu1 %4608 }
0x173e   : > { %v4597_v26 = vpop.permute.xlu2 %4596  ;;  %v4627_v11 = vperm.slane %v4609_v22, %v6228_v27 }
0x173f   : > { %v4600_v29 = vpop.permute.xlu0 %4599  ;;  %v4623_v16 = vperm.slane %v4597_v26, %v6228_v27 }
0x1740   : > { %v4624_v3 = vperm.slane %v4600_v29, %v6228_v27 }
0x1741   : > { %v4637_v30 = vsel %vm2130_vm0, %v4623_v16, %v4636_v46  ;;  %v4749_v16 = vmul.f32 %v7486_v24, %v6220_v18 }
0x1742   : > { %v4638_v51 = vsel %vm2132_vm2, %v4624_v3, %v4637_v30 }
0x1743   : > { %v4751_v33 = vsel %vm1865_vm13, %v4749_v16, 0.0 }
0x1746   : > { %v4606_v32 = vpop.permute.xlu2 %4605 }
0x1747   : > { %v4603_v62 = vpop.permute.xlu0 %4602  ;;  %v4626_v57 = vperm.slane %v4606_v32, %v6228_v27 }
0x1748   : > { %v4625_v55 = vperm.slane %v4603_v62, %v6228_v27 }
0x174a   : > { %v4639_v44 = vsel %vm2134_vm3, %v4625_v55, %v4638_v51  ;;  %vm4672_vm3 = vcmask 58368  }
0x174b   : > { %v4640_v58 = vsel %vm2136_vm4, %v4626_v57, %v4639_v44 }
0x174c   : > { %v4641_v59 = vsel %vm2138_vm1, %v4627_v11, %v4640_v58 }
0x174e   : > { %v4588_v1 = vpop.permute.xlu2 %4587 }
0x174f   : > { %v4620_v36 = vperm.slane %v4588_v1, %v6228_v27  ;;  %v4612_v20 = vpop.permute.xlu0 %4611 }
0x1750   : > { %v4628_v4 = vperm.slane %v4612_v20, %v6228_v27 }
0x1751   : > { %v4635_v19 = vsel %vm2140_vm5, %v4620_v36, %v4634_v15 }
0x1752   : > { %v4645_v12 = vsel %vm1865_vm13, %v4635_v19, 0.0  ;;  %v4642_v52 = vsel %vm2140_vm5, %v4628_v4, %v4641_v59  ;;  %vm4840_vm5 = vcmask 0  }
0x1753   : > { %4646 = vadd.xlane.f32.xlu1 %v4645_v12  ;;  %v4648_v61 = vsel %vm1865_vm13, %v4642_v52, 0.0 }
0x1754   : > { %4649 = vadd.xlane.f32.xlu2 %v4648_v61 }
0x1757   : > { %v4661_v45 = vpop.permute.xlu0 %4660 }
0x1758   : > { %vm4662_vm2 = vcmp.eq.s32.totalorder %v4661_v45, 1 }
0x176c   : > { %4741 = vperm.xlu1 %5447, %v4736_v31   ;;  %4734 = vperm.xlu2 %5448, %v4729_v2  }
0x1796   : > { %4755 = vadd.xlane.f32.xlu1 %v4754_v5 }
0x17c6   : > { %v4647_v54 = vpop.xlane.xlu1 %4646 }
0x17c7   : > { %5706 = vlog2.f32 %v4647_v54  ;;  %v4650_v10 = vpop.xlane.xlu2 %4649 }
0x17c8   : > { %5708 = vlog2.f32 %v4650_v10 }
0x17cd   : > { %v5707_v60 = vpop.eup %5706 }
0x17ce   : > { %v4652_v56 = vmul.f32 0.6931472, %v5707_v60  ;;  %v5709_v8 = vpop.eup %5708 }
0x17cf   : > { %v4654_v14 = vmul.f32 0.6931472, %v5709_v8  ;;  %v4735_v37 = vpop.permute.xlu2 %4734 }
0x17d0   : > { %v4655_v39 = vadd.f32 %v4652_v56, %v7496_v7  ;;  %vm4743_vm0 = vcmp.eq.s32.totalorder %v4735_v37, %v6228_v27 }
0x17d1   : > { %v4656_v21 = vadd.f32 %v4654_v14, %v7508_v40  ;;  %v5261_v63 = vsel %vm4743_vm0, 1.0, %v5811_v47 }
0x17d2   : > { %v4665_v26 = vperm.slane %v4655_v39, %v6228_v27  ;;  %v4786_v35 = vmul.f32 %v5261_v63, %v4780_v42 }
0x17d3   : > { %v4666_v38 = vperm.slane %v4656_v21, %v6228_v27 }
0x17d4   : > { %v4788_v29 = vsel %vm1865_vm13, %v4786_v35, 0.0 }
0x17d5   : > { %4789 = vadd.xlane.f32.xlu1 %v4788_v29  ;;  %v4667_v7 = vsel %vm1900_vm15, %v4666_v38, %v4665_v26 }
0x17d6   : > { %v4669_v0 = vsel %vm4662_vm2, %v4667_v7, %v7416_v25  ;;  %v4808_v25 = vld [vmem:[%s7708_s28] sm:$0x3] }
0x17d7   : > { %v4671_v9 = vadd.f32 %v4669_v0, %v6237_v43 }
0x17d9   : > { %v4673_v34 = vsel %vm4672_vm3, %v4671_v9, -inf }
0x17da   : > { %4674 = vmax.xlane.f32.xlu0 %v4673_v34 }
0x17de   : > { %v4742_v40 = vpop.permute.xlu1 %4741 }
0x17df   : > { %vm4744_vm4 = vcmp.eq.s32.totalorder %v4742_v40, %v6228_v27 }
0x17e0   : > { %v5262_v41 = vsel %vm4744_vm4, 1.0, %v5811_v47 }
0x17e1   : > { %v4787_v32 = vmul.f32 %v5262_v41, %v4783_v17 }
0x17e3   : > { %v4791_v53 = vsel %vm1865_vm13, %v4787_v32, 0.0  ;;  %vm4831_vm13 = vcmask 1024  }
0x17e4   : > { %4792 = vadd.xlane.f32.xlu2 %v4791_v53 }
0x17ee   : > { %4810 = vperm.xlu0 %5437, %v4808_v25  }
0x1809   : > { %v4756_v24 = vpop.xlane.xlu1 %4755 }
0x1818   : > { %4752 = vadd.xlane.f32.xlu0 %v4751_v33 }
0x1848   : > { %v4790_v57 = vpop.xlane.xlu1 %4789 }
0x184d   : > { %v4675_v28 = vpop.xlane.xlu0 %4674 }
0x184e   : > { %v4676_v13 = vsub.f32 %v4671_v9, %v4675_v28 }
0x1850   : > { %v4677_v46 = vmul.f32 1.442695, %v4676_v13 }
0x1852   : > { %5710 = vpow2.f32 %v4677_v46 }
0x1857   : > { %v4793_v49 = vpop.xlane.xlu2 %4792 }
0x1858   : > { %v5711_v3 = vpop.eup %5710  ;;  %v4795_v51 = vadd.f32 %v4793_v49, %v4756_v24 }
0x1859   : > { %v4679_v30 = vsel %vm4672_vm3, %v5711_v3, 0.0 }
0x185a   : > { %4680 = vadd.xlane.f32.xlu2 %v4679_v30  ;;  %v4802_v44 = vrot.slane %v4795_v51, 4 }
0x185c   : > { %v4803_v22 = vadd.f32 %v4802_v44, %v4795_v51 }
0x185e   : > { %v4804_v19 = vrot.slane %v4803_v22, 2 }
0x1860   : > { %v4811_v62 = vpop.permute.xlu0 %4810  ;;  %v4805_v12 = vadd.f32 %v4804_v19, %v4803_v22 }
0x1861   : > { %vm4812_vm1 = vcmp.eq.s32.totalorder %v4811_v62, %v6228_v27 }
0x1862   : > { %v5265_v50 = vsel %vm4812_vm1, 1.0, %v5811_v47 }
0x1863   : > { %v4815_v55 = vmul.f32 %v5265_v50, %v6237_v43  ;;  %v4806_v43 = vrot.slane %v4805_v12, 1 }
0x1865   : > { %v4816_v18 = vsel %vm4672_vm3, %v4815_v55, 0.0  ;;  %v4807_v59 = vadd.f32 %v4806_v43, %v4805_v12 }
0x1866   : > { %4817 = vadd.xlane.f32.xlu1 %v4816_v18 }
0x188b   : > { %v4753_v23 = vpop.xlane.xlu0 %4752 }
0x188c   : > { %v4794_v1 = vadd.f32 %v4790_v57, %v4753_v23 }
0x188e   : > { %v4796_v36 = vrot.slane %v4794_v1, 4 }
0x1890   : > { %v4797_v15 = vadd.f32 %v4796_v36, %v4794_v1 }
0x1892   : > { %v4798_v27 = vrot.slane %v4797_v15, 2 }
0x1894   : > { %v4799_v47 = vadd.f32 %v4798_v27, %v4797_v15 }
0x1896   : > { %v4800_v20 = vrot.slane %v4799_v47, 1 }
0x1898   : > { %v4801_v6 = vadd.f32 %v4800_v20, %v4799_v47 }
0x18cd   : > { %v4681_v58 = vpop.xlane.xlu2 %4680 }
0x18ce   : > { %5712 = vlog2.f32 %v4681_v58 }
0x18d4   : > { %v5713_v11 = vpop.eup %5712 }
0x18d5   : > { %v4683_v61 = vmul.f32 0.6931472, %v5713_v11 }
0x18d7   : > { %v4684_v5 = vadd.f32 %v4683_v61, %v4675_v28 }
0x18d9   : > { %v4818_v4 = vpop.xlane.xlu1 %4817 }
0x18da   : > { %v4820_v52 = vrot.slane %v4818_v4, 1  ;;  %v4823_v2 = vadd.f32 %v4818_v4, %v4801_v6 }
0x18dc   : > { %v4824_v31 = vadd.f32 %v4820_v52, %v4807_v59 }
0x18de   : > { %v4827_v48 = vrot.slane %v4824_v31, 7 }
0x18e0   : > { %v4828_v54 = vsel %vm1900_vm15, %v4827_v48, %v4823_v2 }
0x18e1   : > { %v4830_v10 = vsub.f32 %v4684_v5, %v4828_v54 }
0x18e3   : > { %v4832_v60 = vsel %vm4831_vm13, %v4830_v10, 0.0 }
0x18e4   : > { %v4833_v56 = vrot.slane %v4832_v60, 4 }
0x18e6   : > { %v4834_v39 = vadd.f32 %v4833_v56, %v4832_v60 }
0x18e8   : > { %v4835_v8 = vrot.slane %v4834_v39, 2 }
0x18ea   : > { %v4836_v14 = vadd.f32 %v4835_v8, %v4834_v39 }
0x18ec   : > { %v4837_v37 = vrot.slane %v4836_v14, 1 }
0x18ee   : > { %v4838_v42 = vadd.f32 %v4837_v37, %v4836_v14 }
0x18f0   : > { %v4839_v26 = vmul.f32 0.5, %v4838_v42 }
0x18f2   : > { %4841 = vst.msk [vmem:[#allocation7] sm:$0x1] %vm4840_vm5, %v4839_v26 }
0x18f3 PF: > { %s7709_s13 = sld [smem:[#allocation13_spill]]  ;;  %s5812_s25 = smov [#allocation7]  }
0x18f4   : > { %s7711_s19 = sld [smem:[#allocation35_spill]]  ;;  %s4848_s14 = sshll.u32 %s5812_s25, 4  ;;  %s4849_s14 = int_to_ptr.vmem [resolvable:$true] %s4848_s14 }
0x18f9   : > { %s7710_s24 = sadd.s32 4294967295, %s7709_s13  }
0x18fa   : > { %p5325_p7 = scmp.eq.s32.totalorder %s7710_s24, 7  ;;  %s4850_s0 = sshll.u32 %s7711_s19, 4  ;;  %s4851_s0 = int_to_ptr.hbm [resolvable:$true] %s4850_s0 }
0x18fc   : > { %5322 = dma.vmem_to_hbm [thread:$0]  (%p5325_p7), %s4849_s14, 16, %s4851_s0, [#allocation8]  }
0x18fd   : > { %5774 = dma.done.wait (%p5325_p7), [#allocation8], 16  }
0x18fe   : > { %5776 = vsyncadd (%p5325_p7), [#allocation8], 4294967280 }
0x18ff PF: > { %s7712_s23 = sld [smem:[#allocation13_spill]] }
0x1900   : > { %s7713_s3 = sld [smem:[#allocation10_spill]] }
0x1901   : > { %s7714_s28 = sld [smem:[#allocation16_spill]] }
0x1902   : > { %s7715_s29 = sld [smem:[#allocation11_spill]] }
0x1903   : > { %s7716_s30 = sld [smem:[#allocation12_spill]] }
0x1904   : > { %s7717_s4 = sld [smem:[#allocation14_spill]] }
0x1905   : > { %s33_s23 = sadd.s32 1, %s7712_s23   ;;  %s7718_s0 = sld [smem:[#allocation15_spill]] }
0x1906   : > { %p30_p8 = scmp.ge.s32.totalorder %s33_s23, 10  }
0x1908   :  { %32 = sbr.rel (!%p30_p8) target bundleno = 23 (0x17), region = 212 }
0x190d   :  { %4864 = vsyncpa [#allocation8], 1 }
0x190e   :  { %4866 = vsyncpa [#allocation8 + $0x1], 1 }

</bundles_post_ra>
